<compile_context>
chip_gen: v7x
topology: tpu7x:2x2x1
jax: 0.10.0
libtpu: 0.0.40
codegen_flags: <defaults>
</compile_context>

<pallas_src>
import functools

import jax
import jax.numpy as jnp
from jax.experimental import pallas as pl
from jax.experimental.pallas import tpu as pltpu


def _round_up(x, m):
    return (x + m - 1) // m * m


def _vmem_limit_bytes():
    """Per-generation VMEM budget: 3/4 of physical capacity (v7x has only 64 MiB)."""
    try:
        cap = int(pltpu.get_tpu_info().vmem_capacity_bytes)
    except Exception:
        cap = 0
    if cap <= 0:
        cap = 64 << 20  # conservative fallback = v7x per-TC physical VMEM
    return (cap * 3) // 4


def _conv_block_kernel(p_ref, w_ref, b_ref, o_ref, acc_ref, *,
                       use_norm, use_act, eps, slope):
    """One (sample, Cout-tile) output block; accumulates over the K grid axis.

    p_ref  : (1, P, tk)   bf16 im2col patches (one K tile)
    w_ref  : (tk, tco)    bf16 weights
    b_ref  : (1, tco)     f32  bias
    o_ref  : (1, P, tco)  output block (bf16 hidden layers / f32 logits)
    acc_ref: (P, tco)     f32  VMEM accumulator scratch
    """
    k = pl.program_id(2)

    @pl.when(k == 0)
    def _():
        acc_ref[...] = jnp.zeros_like(acc_ref)

    acc_ref[...] += jnp.dot(p_ref[0], w_ref[...],
                            preferred_element_type=jnp.float32)

    @pl.when(k == pl.num_programs(2) - 1)
    def _():
        y = acc_ref[...] + b_ref[...]                # f32 math on the accumulator
        if use_norm:
            # nn.InstanceNorm2d defaults: affine=False, eps=1e-5, biased variance,
            # normalized over spatial positions per (sample, channel).
            mean = jnp.mean(y, axis=0, keepdims=True)
            mean_sq = jnp.mean(y * y, axis=0, keepdims=True)
            var = jnp.maximum(mean_sq - mean * mean, 0.0)
            y = (y - mean) * jax.lax.rsqrt(var + eps)
        if use_act:
            y = jnp.where(y > 0, y, slope * y)       # LeakyReLU(0.2)
        o_ref[0] = y.astype(o_ref.dtype)


def conv_block(patches, w_mat, bias, *, use_norm, use_act, out_dtype,
               eps=1e-5, slope=0.2):
    """Fused conv-as-matmul (+ bias [+ InstanceNorm] [+ LeakyReLU]).

    patches : [N, P, K_pad]  bf16  (K_pad multiple of the K tile)
    w_mat   : [K_pad, C_pad] bf16  (C_pad multiple of 128)
    bias    : [1, C_pad]     f32
    returns : [N, P, C_pad]  out_dtype
    """
    N, P, K_pad = patches.shape
    Kw, C_pad = w_mat.shape
    assert K_pad == Kw and C_pad % 128 == 0

    tco = 128
    tk = K_pad if K_pad <= 512 else 512
    assert K_pad % tk == 0
    n_k = K_pad // tk
    n_c = C_pad // tco

    kernel = functools.partial(_conv_block_kernel, use_norm=use_norm,
                               use_act=use_act, eps=eps, slope=slope)
    return pl.pallas_call(
        kernel,
        out_shape=jax.ShapeDtypeStruct((N, P, C_pad), out_dtype),
        grid_spec=pltpu.PrefetchScalarGridSpec(
            num_scalar_prefetch=0,
            grid=(N, n_c, n_k),                      # reduction axis innermost
            in_specs=[
                pl.BlockSpec((1, P, tk), lambda n, c, k: (n, 0, k)),
                pl.BlockSpec((tk, tco), lambda n, c, k: (k, c)),
                pl.BlockSpec((1, tco), lambda n, c, k: (0, c)),
            ],
            out_specs=pl.BlockSpec((1, P, tco), lambda n, c, k: (n, 0, c)),
            scratch_shapes=[pltpu.VMEM((P, tco), jnp.float32)],
        ),
        compiler_params=pltpu.CompilerParams(
            dimension_semantics=("parallel", "parallel", "arbitrary"),
            vmem_limit_bytes=_vmem_limit_bytes(),
        ),
    )(patches, w_mat, bias)


def _im2col(x_nhwc, k, stride, pad):
    """Extract conv patches (plain-JAX glue; slice/stack/reshape only)."""
    N, H, W, C = x_nhwc.shape
    H_out = (H + 2 * pad - k) // stride + 1
    W_out = (W + 2 * pad - k) // stride + 1
    x_pad = jnp.pad(x_nhwc, ((0, 0), (pad, pad), (pad, pad), (0, 0)))
    cols = []
    for di in range(k):
        for dj in range(k):
            sl = x_pad[
                :,
                di: di + stride * (H_out - 1) + 1: stride,
                dj: dj + stride * (W_out - 1) + 1: stride,
                :,
            ]
            cols.append(sl)
    # [N, H_out, W_out, kh*kw, C] -> [N, P, K]   (K ordering: kh, kw, C_in)
    patches = jnp.stack(cols, axis=3).reshape(N, H_out * W_out, k * k * C)
    return patches, H_out, W_out


def conv_layer(x_nhwc, w_torch, b, *, stride, use_norm, use_act, out_dtype):
    """Conv2d(k=4, p=1, bias=True) [+ InstanceNorm2d] [+ LeakyReLU(0.2)]."""
    k, pad = 4, 1
    C_out, C_in, kh, kw = w_torch.shape
    N = x_nhwc.shape[0]

    patches, H_out, W_out = _im2col(x_nhwc.astype(jnp.bfloat16), k, stride, pad)
    K = kh * kw * C_in

    # K tile: 512 (multiple of 256 MXU depth on v6e/v7x, of 128 on v5e), or the
    # whole (128-rounded) K when small.  C_out padded to 128-lane tiles.
    tk = 512 if K > 512 else _round_up(K, 128)
    K_pad = _round_up(K, tk)
    C_pad = _round_up(C_out, 128)

    if K_pad != K:
        patches = jnp.pad(patches, ((0, 0), (0, 0), (0, K_pad - K)))

    # PyTorch weight [C_out, C_in, kh, kw] -> [kh, kw, C_in, C_out] -> [K, C_out]
    w_mat = jnp.transpose(w_torch, (2, 3, 1, 0)).reshape(K, C_out)
    w_mat = jnp.pad(w_mat, ((0, K_pad - K), (0, C_pad - C_out))).astype(jnp.bfloat16)
    bias = jnp.pad(b.astype(jnp.float32), (0, C_pad - C_out)).reshape(1, C_pad)

    out = conv_block(patches, w_mat, bias, use_norm=use_norm, use_act=use_act,
                     out_dtype=out_dtype)
    out = out[:, :, :C_out]                          # drop padded channels
    return out.reshape(N, H_out, W_out, C_out)


def init_patchgan_params(key, in_channels=3):
    """Deterministic synthetic weights matching nn.Conv2d shapes in __init__."""
    specs = [(in_channels, 64), (64, 128), (128, 256), (256, 512), (512, 1)]
    params = []
    for i, (cin, cout) in enumerate(specs):
        kw_key, kb_key = jax.random.split(jax.random.fold_in(key, i))
        w = jax.random.normal(kw_key, (cout, cin, 4, 4), jnp.float32) * 0.02
        b = jax.random.normal(kb_key, (cout,), jnp.float32) * 0.01
        params.append((w, b))
    return params


def patchgan_forward(x_nchw, params):
    # PyTorch conv inputs are NCHW; kernels run channels-last (NHWC), bf16 hidden.
    x = jnp.transpose(x_nchw, (0, 2, 3, 1)).astype(jnp.bfloat16)
    layer_cfg = [
        dict(stride=2, use_norm=False, use_act=True, out_dtype=jnp.bfloat16),  # conv1 + lrelu
        dict(stride=2, use_norm=True, use_act=True, out_dtype=jnp.bfloat16),   # conv2 + IN + lrelu
        dict(stride=2, use_norm=True, use_act=True, out_dtype=jnp.bfloat16),   # conv3 + IN + lrelu
        dict(stride=1, use_norm=True, use_act=True, out_dtype=jnp.bfloat16),   # conv4 + IN + lrelu
        dict(stride=1, use_norm=False, use_act=False, out_dtype=jnp.float32),  # conv5 (logits)
    ]
    for (w, b), cfg in zip(params, layer_cfg):
        x = conv_layer(x, w, b, **cfg)
    return jnp.transpose(x, (0, 3, 1, 2))  # back to NCHW, f32 logits


if __name__ == "__main__":
    key = jax.random.PRNGKey(0)
    x = jax.random.normal(key, (2, 3, 32, 32), jnp.float32)  # NCHW, like PyTorch
    params = init_patchgan_params(jax.random.PRNGKey(1), in_channels=3)

    out = jax.jit(patchgan_forward)(x, params)
    out = jax.block_until_ready(out)

    # Spatial trace: 32 -> 16 -> 8 -> 4 -> 3 -> 2 ; channels 3->64->128->256->512->1
    assert out.shape == (2, 1, 2, 2), out.shape
    assert jnp.all(jnp.isfinite(out))
    print("KERNEL_OK")
</pallas_src>

<mosaic_0001>
module attributes {stable_mosaic.version = 11 : i64} {
  func.func @_conv_block_kernel(%arg0: i32, %arg1: i32, %arg2: i32, %arg3: memref<1x256x128xbf16, #tpu.memory_space<vmem>>, %arg4: memref<128x128xbf16, #tpu.memory_space<vmem>>, %arg5: memref<1x128xf32, #tpu.memory_space<vmem>>, %arg6: memref<1x256x128xbf16, #tpu.memory_space<vmem>>, %arg7: memref<256x128xf32, #tpu.memory_space<vmem>>) attributes {dimension_semantics = [#tpu.dimension_semantics<parallel>, #tpu.dimension_semantics<parallel>, #tpu.dimension_semantics<arbitrary>], iteration_bounds = array<i64: 2, 1, 1>, scalar_prefetch = 0 : i64, scratch_operands = 1 : i64, tpu.core_type = #tpu.core_type<tc>, window_params = [{transform_indices = @transform_0, window_bounds = array<i64: 1, 256, 128>}, {transform_indices = @transform_1, window_bounds = array<i64: 128, 128>}, {transform_indices = @transform_2, window_bounds = array<i64: 1, 128>}, {transform_indices = @transform_3, window_bounds = array<i64: 1, 256, 128>}]} {
    %c0_i32 = arith.constant 0 : i32
    %0 = arith.cmpi eq, %arg2, %c0_i32 : i32
    %1 = arith.extui %0 : i1 to i32
    %c0_i32_0 = arith.constant 0 : i32
    %2 = arith.cmpi ne, %1, %c0_i32_0 : i32
    scf.if %2 {
      %cst_11 = arith.constant 0.000000e+00 : f32
      %13 = vector.broadcast %cst_11 : f32 to vector<256x128xf32>
      %c0_12 = arith.constant 0 : index
      %c0_13 = arith.constant 0 : index
      %14 = vector.load %arg7[%c0_12, %c0_13] : memref<256x128xf32, #tpu.memory_space<vmem>>, vector<256x128xf32>
      tpu.vector_store %arg7[%c0_12, %c0_13], %13 {strides = array<i32>} : memref<256x128xf32, #tpu.memory_space<vmem>>, vector<256x128xf32>,
    } else {
    }
    %c0 = arith.constant 0 : index
    %c0_1 = arith.constant 0 : index
    %3 = vector.load %arg7[%c0, %c0_1] : memref<256x128xf32, #tpu.memory_space<vmem>>, vector<256x128xf32>
    %c0_2 = arith.constant 0 : index
    %c0_3 = arith.constant 0 : index
    %c0_4 = arith.constant 0 : index
    %4 = vector.load %arg3[%c0_2, %c0_3, %c0_4] : memref<1x256x128xbf16, #tpu.memory_space<vmem>>, vector<1x256x128xbf16>
    %5 = vector.shape_cast %4 : vector<1x256x128xbf16> to vector<256x128xbf16>
    %c0_5 = arith.constant 0 : index
    %c0_6 = arith.constant 0 : index
    %6 = vector.load %arg4[%c0_5, %c0_6] : memref<128x128xbf16, #tpu.memory_space<vmem>>, vector<128x128xbf16>
    %cst = arith.constant dense<0.000000e+00> : vector<256x128xf32>
    %7 = tpu.matmul %5, %6, %cst {dimension_numbers = #tpu.dot_dimension_numbers<[1], [0], [0], [1], [0, 0, 1, 1], [], []>} : vector<256x128xbf16>, vector<128x128xbf16>, vector<256x128xf32> -> vector<256x128xf32>
    %8 = arith.addf %3, %7 : vector<256x128xf32>
    %c0_7 = arith.constant 0 : index
    %c0_8 = arith.constant 0 : index
    %9 = vector.load %arg7[%c0_7, %c0_8] : memref<256x128xf32, #tpu.memory_space<vmem>>, vector<256x128xf32>
    tpu.vector_store %arg7[%c0_7, %c0_8], %8 {strides = array<i32>} : memref<256x128xf32, #tpu.memory_space<vmem>>, vector<256x128xf32>,
    %c0_i32_9 = arith.constant 0 : i32
    %10 = arith.cmpi eq, %arg2, %c0_i32_9 : i32
    %11 = arith.extui %10 : i1 to i32
    %c0_i32_10 = arith.constant 0 : i32
    %12 = arith.cmpi ne, %11, %c0_i32_10 : i32
    scf.if %12 {
      %c0_11 = arith.constant 0 : index
      %c0_12 = arith.constant 0 : index
      %13 = vector.load %arg7[%c0_11, %c0_12] : memref<256x128xf32, #tpu.memory_space<vmem>>, vector<256x128xf32>
      %c0_13 = arith.constant 0 : index
      %c0_14 = arith.constant 0 : index
      %14 = vector.load %arg5[%c0_13, %c0_14] : memref<1x128xf32, #tpu.memory_space<vmem>>, vector<1x128xf32>
      %15 = vector.broadcast %14 : vector<1x128xf32> to vector<256x128xf32>
      %16 = arith.addf %13, %15 : vector<256x128xf32>
      %cst_15 = arith.constant 0.000000e+00 : f32
      %17 = vector.broadcast %cst_15 : f32 to vector<256x128xf32>
      %18 = arith.cmpf ogt, %16, %17 : vector<256x128xf32>
      %cst_16 = arith.constant 2.000000e-01 : f32
      %19 = vector.broadcast %cst_16 : f32 to vector<256x128xf32>
      %20 = arith.mulf %19, %16 : vector<256x128xf32>
      %21 = arith.select %18, %16, %20 : vector<256x128xi1>, vector<256x128xf32>
      %22 = arith.truncf %21 : vector<256x128xf32> to vector<256x128xbf16>
      %c0_17 = arith.constant 0 : index
      %c0_18 = arith.constant 0 : index
      %c0_19 = arith.constant 0 : index
      %23 = vector.load %arg6[%c0_17, %c0_18, %c0_19] : memref<1x256x128xbf16, #tpu.memory_space<vmem>>, vector<1x256x128xbf16>
      %24 = vector.shape_cast %23 : vector<1x256x128xbf16> to vector<256x128xbf16>
      %25 = vector.shape_cast %22 : vector<256x128xbf16> to vector<1x256x128xbf16>
      tpu.vector_store %arg6[%c0_17, %c0_18, %c0_19], %25 {strides = array<i32>} : memref<1x256x128xbf16, #tpu.memory_space<vmem>>, vector<1x256x128xbf16>,
    } else {
    }
    return
  }
  func.func @transform_0(%arg0: i32, %arg1: i32, %arg2: i32) -> (i32, i32, i32) {
    %c0_i32 = arith.constant 0 : i32
    %c0_i32_0 = arith.constant 0 : i32
    return %arg0, %c0_i32, %arg2 : i32, i32, i32
  }
  func.func @transform_1(%arg0: i32, %arg1: i32, %arg2: i32) -> (i32, i32) {
    %c0_i32 = arith.constant 0 : i32
    return %arg2, %arg1 : i32, i32
  }
  func.func @transform_2(%arg0: i32, %arg1: i32, %arg2: i32) -> (i32, i32) {
    %c0_i32 = arith.constant 0 : i32
    %c0_i32_0 = arith.constant 0 : i32
    return %c0_i32, %arg1 : i32, i32
  }
  func.func @transform_3(%arg0: i32, %arg1: i32, %arg2: i32) -> (i32, i32, i32) {
    %c0_i32 = arith.constant 0 : i32
    %c0_i32_0 = arith.constant 0 : i32
    return %arg0, %c0_i32, %arg1 : i32, i32, i32
  }
}

module attributes {stable_mosaic.version = 11 : i64} {
  func.func @_conv_block_kernel(%arg0: i32, %arg1: i32, %arg2: i32, %arg3: memref<1x64x512xbf16, #tpu.memory_space<vmem>>, %arg4: memref<512x128xbf16, #tpu.memory_space<vmem>>, %arg5: memref<1x128xf32, #tpu.memory_space<vmem>>, %arg6: memref<1x64x128xbf16, #tpu.memory_space<vmem>>, %arg7: memref<64x128xf32, #tpu.memory_space<vmem>>) attributes {dimension_semantics = [#tpu.dimension_semantics<parallel>, #tpu.dimension_semantics<parallel>, #tpu.dimension_semantics<arbitrary>], iteration_bounds = array<i64: 2, 1, 2>, scalar_prefetch = 0 : i64, scratch_operands = 1 : i64, tpu.core_type = #tpu.core_type<tc>, window_params = [{transform_indices = @transform_0, window_bounds = array<i64: 1, 64, 512>}, {transform_indices = @transform_1, window_bounds = array<i64: 512, 128>}, {transform_indices = @transform_2, window_bounds = array<i64: 1, 128>}, {transform_indices = @transform_3, window_bounds = array<i64: 1, 64, 128>}]} {
    %c0_i32 = arith.constant 0 : i32
    %0 = arith.cmpi eq, %arg2, %c0_i32 : i32
    %1 = arith.extui %0 : i1 to i32
    %c0_i32_0 = arith.constant 0 : i32
    %2 = arith.cmpi ne, %1, %c0_i32_0 : i32
    scf.if %2 {
      %cst_10 = arith.constant 0.000000e+00 : f32
      %13 = vector.broadcast %cst_10 : f32 to vector<64x128xf32>
      %c0_11 = arith.constant 0 : index
      %c0_12 = arith.constant 0 : index
      %14 = vector.load %arg7[%c0_11, %c0_12] : memref<64x128xf32, #tpu.memory_space<vmem>>, vector<64x128xf32>
      tpu.vector_store %arg7[%c0_11, %c0_12], %13 {strides = array<i32>} : memref<64x128xf32, #tpu.memory_space<vmem>>, vector<64x128xf32>,
    } else {
    }
    %c0 = arith.constant 0 : index
    %c0_1 = arith.constant 0 : index
    %3 = vector.load %arg7[%c0, %c0_1] : memref<64x128xf32, #tpu.memory_space<vmem>>, vector<64x128xf32>
    %c0_2 = arith.constant 0 : index
    %c0_3 = arith.constant 0 : index
    %c0_4 = arith.constant 0 : index
    %4 = vector.load %arg3[%c0_2, %c0_3, %c0_4] : memref<1x64x512xbf16, #tpu.memory_space<vmem>>, vector<1x64x512xbf16>
    %5 = vector.shape_cast %4 : vector<1x64x512xbf16> to vector<64x512xbf16>
    %c0_5 = arith.constant 0 : index
    %c0_6 = arith.constant 0 : index
    %6 = vector.load %arg4[%c0_5, %c0_6] : memref<512x128xbf16, #tpu.memory_space<vmem>>, vector<512x128xbf16>
    %cst = arith.constant dense<0.000000e+00> : vector<64x128xf32>
    %7 = tpu.matmul %5, %6, %cst {dimension_numbers = #tpu.dot_dimension_numbers<[1], [0], [0], [1], [0, 0, 1, 1], [], []>} : vector<64x512xbf16>, vector<512x128xbf16>, vector<64x128xf32> -> vector<64x128xf32>
    %8 = arith.addf %3, %7 : vector<64x128xf32>
    %c0_7 = arith.constant 0 : index
    %c0_8 = arith.constant 0 : index
    %9 = vector.load %arg7[%c0_7, %c0_8] : memref<64x128xf32, #tpu.memory_space<vmem>>, vector<64x128xf32>
    tpu.vector_store %arg7[%c0_7, %c0_8], %8 {strides = array<i32>} : memref<64x128xf32, #tpu.memory_space<vmem>>, vector<64x128xf32>,
    %c1_i32 = arith.constant 1 : i32
    %10 = arith.cmpi eq, %arg2, %c1_i32 : i32
    %11 = arith.extui %10 : i1 to i32
    %c0_i32_9 = arith.constant 0 : i32
    %12 = arith.cmpi ne, %11, %c0_i32_9 : i32
    scf.if %12 {
      %c0_10 = arith.constant 0 : index
      %c0_11 = arith.constant 0 : index
      %13 = vector.load %arg7[%c0_10, %c0_11] : memref<64x128xf32, #tpu.memory_space<vmem>>, vector<64x128xf32>
      %c0_12 = arith.constant 0 : index
      %c0_13 = arith.constant 0 : index
      %14 = vector.load %arg5[%c0_12, %c0_13] : memref<1x128xf32, #tpu.memory_space<vmem>>, vector<1x128xf32>
      %15 = vector.broadcast %14 : vector<1x128xf32> to vector<64x128xf32>
      %16 = arith.addf %13, %15 : vector<64x128xf32>
      %cst_14 = arith.constant dense<0.000000e+00> : vector<128xf32>
      %17 = vector.multi_reduction <add>, %16, %cst_14 [0] : vector<64x128xf32> to vector<128xf32>
      %18 = vector.shape_cast %17 : vector<128xf32> to vector<1x128xf32>
      %cst_15 = arith.constant 6.400000e+01 : f32
      %19 = vector.broadcast %cst_15 : f32 to vector<1x128xf32>
      %20 = arith.divf %18, %19 : vector<1x128xf32>
      %21 = arith.mulf %16, %16 : vector<64x128xf32>
      %cst_16 = arith.constant dense<0.000000e+00> : vector<128xf32>
      %22 = vector.multi_reduction <add>, %21, %cst_16 [0] : vector<64x128xf32> to vector<128xf32>
      %23 = vector.shape_cast %22 : vector<128xf32> to vector<1x128xf32>
      %cst_17 = arith.constant 6.400000e+01 : f32
      %24 = vector.broadcast %cst_17 : f32 to vector<1x128xf32>
      %25 = arith.divf %23, %24 : vector<1x128xf32>
      %26 = arith.mulf %20, %20 : vector<1x128xf32>
      %27 = arith.subf %25, %26 : vector<1x128xf32>
      %cst_18 = arith.constant 0.000000e+00 : f32
      %28 = vector.broadcast %cst_18 : f32 to vector<1x128xf32>
      %29 = arith.maximumf %27, %28 : vector<1x128xf32>
      %30 = vector.broadcast %20 : vector<1x128xf32> to vector<64x128xf32>
      %31 = arith.subf %16, %30 : vector<64x128xf32>
      %cst_19 = arith.constant 9.99999974E-6 : f32
      %32 = vector.broadcast %cst_19 : f32 to vector<1x128xf32>
      %33 = arith.addf %29, %32 : vector<1x128xf32>
      %34 = math.rsqrt %33 : vector<1x128xf32>
      %35 = vector.broadcast %34 : vector<1x128xf32> to vector<64x128xf32>
      %36 = arith.mulf %31, %35 : vector<64x128xf32>
      %cst_20 = arith.constant 0.000000e+00 : f32
      %37 = vector.broadcast %cst_20 : f32 to vector<64x128xf32>
      %38 = arith.cmpf ogt, %36, %37 : vector<64x128xf32>
      %cst_21 = arith.constant 2.000000e-01 : f32
      %39 = vector.broadcast %cst_21 : f32 to vector<64x128xf32>
      %40 = arith.mulf %39, %36 : vector<64x128xf32>
      %41 = arith.select %38, %36, %40 : vector<64x128xi1>, vector<64x128xf32>
      %42 = arith.truncf %41 : vector<64x128xf32> to vector<64x128xbf16>
      %c0_22 = arith.constant 0 : index
      %c0_23 = arith.constant 0 : index
      %c0_24 = arith.constant 0 : index
      %43 = vector.load %arg6[%c0_22, %c0_23, %c0_24] : memref<1x64x128xbf16, #tpu.memory_space<vmem>>, vector<1x64x128xbf16>
      %44 = vector.shape_cast %43 : vector<1x64x128xbf16> to vector<64x128xbf16>
      %45 = vector.shape_cast %42 : vector<64x128xbf16> to vector<1x64x128xbf16>
      tpu.vector_store %arg6[%c0_22, %c0_23, %c0_24], %45 {strides = array<i32>} : memref<1x64x128xbf16, #tpu.memory_space<vmem>>, vector<1x64x128xbf16>,
    } else {
    }
    return
  }
  func.func @transform_0(%arg0: i32, %arg1: i32, %arg2: i32) -> (i32, i32, i32) {
    %c0_i32 = arith.constant 0 : i32
    %c0_i32_0 = arith.constant 0 : i32
    return %arg0, %c0_i32, %arg2 : i32, i32, i32
  }
  func.func @transform_1(%arg0: i32, %arg1: i32, %arg2: i32) -> (i32, i32) {
    %c0_i32 = arith.constant 0 : i32
    return %arg2, %arg1 : i32, i32
  }
  func.func @transform_2(%arg0: i32, %arg1: i32, %arg2: i32) -> (i32, i32) {
    %c0_i32 = arith.constant 0 : i32
    %c0_i32_0 = arith.constant 0 : i32
    return %c0_i32, %arg1 : i32, i32
  }
  func.func @transform_3(%arg0: i32, %arg1: i32, %arg2: i32) -> (i32, i32, i32) {
    %c0_i32 = arith.constant 0 : i32
    %c0_i32_0 = arith.constant 0 : i32
    return %arg0, %c0_i32, %arg1 : i32, i32, i32
  }
}

module attributes {stable_mosaic.version = 11 : i64} {
  func.func @_conv_block_kernel(%arg0: i32, %arg1: i32, %arg2: i32, %arg3: memref<1x16x512xbf16, #tpu.memory_space<vmem>>, %arg4: memref<512x128xbf16, #tpu.memory_space<vmem>>, %arg5: memref<1x128xf32, #tpu.memory_space<vmem>>, %arg6: memref<1x16x128xbf16, #tpu.memory_space<vmem>>, %arg7: memref<16x128xf32, #tpu.memory_space<vmem>>) attributes {dimension_semantics = [#tpu.dimension_semantics<parallel>, #tpu.dimension_semantics<parallel>, #tpu.dimension_semantics<arbitrary>], iteration_bounds = array<i64: 2, 2, 4>, scalar_prefetch = 0 : i64, scratch_operands = 1 : i64, tpu.core_type = #tpu.core_type<tc>, window_params = [{transform_indices = @transform_0, window_bounds = array<i64: 1, 16, 512>}, {transform_indices = @transform_1, window_bounds = array<i64: 512, 128>}, {transform_indices = @transform_2, window_bounds = array<i64: 1, 128>}, {transform_indices = @transform_3, window_bounds = array<i64: 1, 16, 128>}]} {
    %c0_i32 = arith.constant 0 : i32
    %0 = arith.cmpi eq, %arg2, %c0_i32 : i32
    %1 = arith.extui %0 : i1 to i32
    %c0_i32_0 = arith.constant 0 : i32
    %2 = arith.cmpi ne, %1, %c0_i32_0 : i32
    scf.if %2 {
      %cst_10 = arith.constant 0.000000e+00 : f32
      %13 = vector.broadcast %cst_10 : f32 to vector<16x128xf32>
      %c0_11 = arith.constant 0 : index
      %c0_12 = arith.constant 0 : index
      %14 = vector.load %arg7[%c0_11, %c0_12] : memref<16x128xf32, #tpu.memory_space<vmem>>, vector<16x128xf32>
      tpu.vector_store %arg7[%c0_11, %c0_12], %13 {strides = array<i32>} : memref<16x128xf32, #tpu.memory_space<vmem>>, vector<16x128xf32>,
    } else {
    }
    %c0 = arith.constant 0 : index
    %c0_1 = arith.constant 0 : index
    %3 = vector.load %arg7[%c0, %c0_1] : memref<16x128xf32, #tpu.memory_space<vmem>>, vector<16x128xf32>
    %c0_2 = arith.constant 0 : index
    %c0_3 = arith.constant 0 : index
    %c0_4 = arith.constant 0 : index
    %4 = vector.load %arg3[%c0_2, %c0_3, %c0_4] : memref<1x16x512xbf16, #tpu.memory_space<vmem>>, vector<1x16x512xbf16>
    %5 = vector.shape_cast %4 : vector<1x16x512xbf16> to vector<16x512xbf16>
    %c0_5 = arith.constant 0 : index
    %c0_6 = arith.constant 0 : index
    %6 = vector.load %arg4[%c0_5, %c0_6] : memref<512x128xbf16, #tpu.memory_space<vmem>>, vector<512x128xbf16>
    %cst = arith.constant dense<0.000000e+00> : vector<16x128xf32>
    %7 = tpu.matmul %5, %6, %cst {dimension_numbers = #tpu.dot_dimension_numbers<[1], [0], [0], [1], [0, 0, 1, 1], [], []>} : vector<16x512xbf16>, vector<512x128xbf16>, vector<16x128xf32> -> vector<16x128xf32>
    %8 = arith.addf %3, %7 : vector<16x128xf32>
    %c0_7 = arith.constant 0 : index
    %c0_8 = arith.constant 0 : index
    %9 = vector.load %arg7[%c0_7, %c0_8] : memref<16x128xf32, #tpu.memory_space<vmem>>, vector<16x128xf32>
    tpu.vector_store %arg7[%c0_7, %c0_8], %8 {strides = array<i32>} : memref<16x128xf32, #tpu.memory_space<vmem>>, vector<16x128xf32>,
    %c3_i32 = arith.constant 3 : i32
    %10 = arith.cmpi eq, %arg2, %c3_i32 : i32
    %11 = arith.extui %10 : i1 to i32
    %c0_i32_9 = arith.constant 0 : i32
    %12 = arith.cmpi ne, %11, %c0_i32_9 : i32
    scf.if %12 {
      %c0_10 = arith.constant 0 : index
      %c0_11 = arith.constant 0 : index
      %13 = vector.load %arg7[%c0_10, %c0_11] : memref<16x128xf32, #tpu.memory_space<vmem>>, vector<16x128xf32>
      %c0_12 = arith.constant 0 : index
      %c0_13 = arith.constant 0 : index
      %14 = vector.load %arg5[%c0_12, %c0_13] : memref<1x128xf32, #tpu.memory_space<vmem>>, vector<1x128xf32>
      %15 = vector.broadcast %14 : vector<1x128xf32> to vector<16x128xf32>
      %16 = arith.addf %13, %15 : vector<16x128xf32>
      %cst_14 = arith.constant dense<0.000000e+00> : vector<128xf32>
      %17 = vector.multi_reduction <add>, %16, %cst_14 [0] : vector<16x128xf32> to vector<128xf32>
      %18 = vector.shape_cast %17 : vector<128xf32> to vector<1x128xf32>
      %cst_15 = arith.constant 1.600000e+01 : f32
      %19 = vector.broadcast %cst_15 : f32 to vector<1x128xf32>
      %20 = arith.divf %18, %19 : vector<1x128xf32>
      %21 = arith.mulf %16, %16 : vector<16x128xf32>
      %cst_16 = arith.constant dense<0.000000e+00> : vector<128xf32>
      %22 = vector.multi_reduction <add>, %21, %cst_16 [0] : vector<16x128xf32> to vector<128xf32>
      %23 = vector.shape_cast %22 : vector<128xf32> to vector<1x128xf32>
      %cst_17 = arith.constant 1.600000e+01 : f32
      %24 = vector.broadcast %cst_17 : f32 to vector<1x128xf32>
      %25 = arith.divf %23, %24 : vector<1x128xf32>
      %26 = arith.mulf %20, %20 : vector<1x128xf32>
      %27 = arith.subf %25, %26 : vector<1x128xf32>
      %cst_18 = arith.constant 0.000000e+00 : f32
      %28 = vector.broadcast %cst_18 : f32 to vector<1x128xf32>
      %29 = arith.maximumf %27, %28 : vector<1x128xf32>
      %30 = vector.broadcast %20 : vector<1x128xf32> to vector<16x128xf32>
      %31 = arith.subf %16, %30 : vector<16x128xf32>
      %cst_19 = arith.constant 9.99999974E-6 : f32
      %32 = vector.broadcast %cst_19 : f32 to vector<1x128xf32>
      %33 = arith.addf %29, %32 : vector<1x128xf32>
      %34 = math.rsqrt %33 : vector<1x128xf32>
      %35 = vector.broadcast %34 : vector<1x128xf32> to vector<16x128xf32>
      %36 = arith.mulf %31, %35 : vector<16x128xf32>
      %cst_20 = arith.constant 0.000000e+00 : f32
      %37 = vector.broadcast %cst_20 : f32 to vector<16x128xf32>
      %38 = arith.cmpf ogt, %36, %37 : vector<16x128xf32>
      %cst_21 = arith.constant 2.000000e-01 : f32
      %39 = vector.broadcast %cst_21 : f32 to vector<16x128xf32>
      %40 = arith.mulf %39, %36 : vector<16x128xf32>
      %41 = arith.select %38, %36, %40 : vector<16x128xi1>, vector<16x128xf32>
      %42 = arith.truncf %41 : vector<16x128xf32> to vector<16x128xbf16>
      %c0_22 = arith.constant 0 : index
      %c0_23 = arith.constant 0 : index
      %c0_24 = arith.constant 0 : index
      %43 = vector.load %arg6[%c0_22, %c0_23, %c0_24] : memref<1x16x128xbf16, #tpu.memory_space<vmem>>, vector<1x16x128xbf16>
      %44 = vector.shape_cast %43 : vector<1x16x128xbf16> to vector<16x128xbf16>
      %45 = vector.shape_cast %42 : vector<16x128xbf16> to vector<1x16x128xbf16>
      tpu.vector_store %arg6[%c0_22, %c0_23, %c0_24], %45 {strides = array<i32>} : memref<1x16x128xbf16, #tpu.memory_space<vmem>>, vector<1x16x128xbf16>,
    } else {
    }
    return
  }
  func.func @transform_0(%arg0: i32, %arg1: i32, %arg2: i32) -> (i32, i32, i32) {
    %c0_i32 = arith.constant 0 : i32
    %c0_i32_0 = arith.constant 0 : i32
    return %arg0, %c0_i32, %arg2 : i32, i32, i32
  }
  func.func @transform_1(%arg0: i32, %arg1: i32, %arg2: i32) -> (i32, i32) {
    %c0_i32 = arith.constant 0 : i32
    return %arg2, %arg1 : i32, i32
  }
  func.func @transform_2(%arg0: i32, %arg1: i32, %arg2: i32) -> (i32, i32) {
    %c0_i32 = arith.constant 0 : i32
    %c0_i32_0 = arith.constant 0 : i32
    return %c0_i32, %arg1 : i32, i32
  }
  func.func @transform_3(%arg0: i32, %arg1: i32, %arg2: i32) -> (i32, i32, i32) {
    %c0_i32 = arith.constant 0 : i32
    %c0_i32_0 = arith.constant 0 : i32
    return %arg0, %c0_i32, %arg1 : i32, i32, i32
  }
}

module attributes {stable_mosaic.version = 11 : i64} {
  func.func @_conv_block_kernel(%arg0: i32, %arg1: i32, %arg2: i32, %arg3: memref<1x9x512xbf16, #tpu.memory_space<vmem>>, %arg4: memref<512x128xbf16, #tpu.memory_space<vmem>>, %arg5: memref<1x128xf32, #tpu.memory_space<vmem>>, %arg6: memref<1x9x128xbf16, #tpu.memory_space<vmem>>, %arg7: memref<9x128xf32, #tpu.memory_space<vmem>>) attributes {dimension_semantics = [#tpu.dimension_semantics<parallel>, #tpu.dimension_semantics<parallel>, #tpu.dimension_semantics<arbitrary>], iteration_bounds = array<i64: 2, 4, 8>, scalar_prefetch = 0 : i64, scratch_operands = 1 : i64, tpu.core_type = #tpu.core_type<tc>, window_params = [{transform_indices = @transform_0, window_bounds = array<i64: 1, 9, 512>}, {transform_indices = @transform_1, window_bounds = array<i64: 512, 128>}, {transform_indices = @transform_2, window_bounds = array<i64: 1, 128>}, {transform_indices = @transform_3, window_bounds = array<i64: 1, 9, 128>}]} {
    %c0_i32 = arith.constant 0 : i32
    %0 = arith.cmpi eq, %arg2, %c0_i32 : i32
    %1 = arith.extui %0 : i1 to i32
    %c0_i32_0 = arith.constant 0 : i32
    %2 = arith.cmpi ne, %1, %c0_i32_0 : i32
    scf.if %2 {
      %cst_10 = arith.constant 0.000000e+00 : f32
      %13 = vector.broadcast %cst_10 : f32 to vector<9x128xf32>
      %c0_11 = arith.constant 0 : index
      %c0_12 = arith.constant 0 : index
      %14 = vector.load %arg7[%c0_11, %c0_12] : memref<9x128xf32, #tpu.memory_space<vmem>>, vector<9x128xf32>
      tpu.vector_store %arg7[%c0_11, %c0_12], %13 {strides = array<i32>} : memref<9x128xf32, #tpu.memory_space<vmem>>, vector<9x128xf32>,
    } else {
    }
    %c0 = arith.constant 0 : index
    %c0_1 = arith.constant 0 : index
    %3 = vector.load %arg7[%c0, %c0_1] : memref<9x128xf32, #tpu.memory_space<vmem>>, vector<9x128xf32>
    %c0_2 = arith.constant 0 : index
    %c0_3 = arith.constant 0 : index
    %c0_4 = arith.constant 0 : index
    %4 = vector.load %arg3[%c0_2, %c0_3, %c0_4] : memref<1x9x512xbf16, #tpu.memory_space<vmem>>, vector<1x9x512xbf16>
    %5 = vector.shape_cast %4 : vector<1x9x512xbf16> to vector<9x512xbf16>
    %c0_5 = arith.constant 0 : index
    %c0_6 = arith.constant 0 : index
    %6 = vector.load %arg4[%c0_5, %c0_6] : memref<512x128xbf16, #tpu.memory_space<vmem>>, vector<512x128xbf16>
    %cst = arith.constant dense<0.000000e+00> : vector<9x128xf32>
    %7 = tpu.matmul %5, %6, %cst {dimension_numbers = #tpu.dot_dimension_numbers<[1], [0], [0], [1], [0, 0, 1, 1], [], []>} : vector<9x512xbf16>, vector<512x128xbf16>, vector<9x128xf32> -> vector<9x128xf32>
    %8 = arith.addf %3, %7 : vector<9x128xf32>
    %c0_7 = arith.constant 0 : index
    %c0_8 = arith.constant 0 : index
    %9 = vector.load %arg7[%c0_7, %c0_8] : memref<9x128xf32, #tpu.memory_space<vmem>>, vector<9x128xf32>
    tpu.vector_store %arg7[%c0_7, %c0_8], %8 {strides = array<i32>} : memref<9x128xf32, #tpu.memory_space<vmem>>, vector<9x128xf32>,
    %c7_i32 = arith.constant 7 : i32
    %10 = arith.cmpi eq, %arg2, %c7_i32 : i32
    %11 = arith.extui %10 : i1 to i32
    %c0_i32_9 = arith.constant 0 : i32
    %12 = arith.cmpi ne, %11, %c0_i32_9 : i32
    scf.if %12 {
      %c0_10 = arith.constant 0 : index
      %c0_11 = arith.constant 0 : index
      %13 = vector.load %arg7[%c0_10, %c0_11] : memref<9x128xf32, #tpu.memory_space<vmem>>, vector<9x128xf32>
      %c0_12 = arith.constant 0 : index
      %c0_13 = arith.constant 0 : index
      %14 = vector.load %arg5[%c0_12, %c0_13] : memref<1x128xf32, #tpu.memory_space<vmem>>, vector<1x128xf32>
      %15 = vector.broadcast %14 : vector<1x128xf32> to vector<9x128xf32>
      %16 = arith.addf %13, %15 : vector<9x128xf32>
      %cst_14 = arith.constant dense<0.000000e+00> : vector<128xf32>
      %17 = vector.multi_reduction <add>, %16, %cst_14 [0] : vector<9x128xf32> to vector<128xf32>
      %18 = vector.shape_cast %17 : vector<128xf32> to vector<1x128xf32>
      %cst_15 = arith.constant 9.000000e+00 : f32
      %19 = vector.broadcast %cst_15 : f32 to vector<1x128xf32>
      %20 = arith.divf %18, %19 : vector<1x128xf32>
      %21 = arith.mulf %16, %16 : vector<9x128xf32>
      %cst_16 = arith.constant dense<0.000000e+00> : vector<128xf32>
      %22 = vector.multi_reduction <add>, %21, %cst_16 [0] : vector<9x128xf32> to vector<128xf32>
      %23 = vector.shape_cast %22 : vector<128xf32> to vector<1x128xf32>
      %cst_17 = arith.constant 9.000000e+00 : f32
      %24 = vector.broadcast %cst_17 : f32 to vector<1x128xf32>
      %25 = arith.divf %23, %24 : vector<1x128xf32>
      %26 = arith.mulf %20, %20 : vector<1x128xf32>
      %27 = arith.subf %25, %26 : vector<1x128xf32>
      %cst_18 = arith.constant 0.000000e+00 : f32
      %28 = vector.broadcast %cst_18 : f32 to vector<1x128xf32>
      %29 = arith.maximumf %27, %28 : vector<1x128xf32>
      %30 = vector.broadcast %20 : vector<1x128xf32> to vector<9x128xf32>
      %31 = arith.subf %16, %30 : vector<9x128xf32>
      %cst_19 = arith.constant 9.99999974E-6 : f32
      %32 = vector.broadcast %cst_19 : f32 to vector<1x128xf32>
      %33 = arith.addf %29, %32 : vector<1x128xf32>
      %34 = math.rsqrt %33 : vector<1x128xf32>
      %35 = vector.broadcast %34 : vector<1x128xf32> to vector<9x128xf32>
      %36 = arith.mulf %31, %35 : vector<9x128xf32>
      %cst_20 = arith.constant 0.000000e+00 : f32
      %37 = vector.broadcast %cst_20 : f32 to vector<9x128xf32>
      %38 = arith.cmpf ogt, %36, %37 : vector<9x128xf32>
      %cst_21 = arith.constant 2.000000e-01 : f32
      %39 = vector.broadcast %cst_21 : f32 to vector<9x128xf32>
      %40 = arith.mulf %39, %36 : vector<9x128xf32>
      %41 = arith.select %38, %36, %40 : vector<9x128xi1>, vector<9x128xf32>
      %42 = arith.truncf %41 : vector<9x128xf32> to vector<9x128xbf16>
      %c0_22 = arith.constant 0 : index
      %c0_23 = arith.constant 0 : index
      %c0_24 = arith.constant 0 : index
      %43 = vector.load %arg6[%c0_22, %c0_23, %c0_24] : memref<1x9x128xbf16, #tpu.memory_space<vmem>>, vector<1x9x128xbf16>
      %44 = vector.shape_cast %43 : vector<1x9x128xbf16> to vector<9x128xbf16>
      %45 = vector.shape_cast %42 : vector<9x128xbf16> to vector<1x9x128xbf16>
      tpu.vector_store %arg6[%c0_22, %c0_23, %c0_24], %45 {strides = array<i32>} : memref<1x9x128xbf16, #tpu.memory_space<vmem>>, vector<1x9x128xbf16>,
    } else {
    }
    return
  }
  func.func @transform_0(%arg0: i32, %arg1: i32, %arg2: i32) -> (i32, i32, i32) {
    %c0_i32 = arith.constant 0 : i32
    %c0_i32_0 = arith.constant 0 : i32
    return %arg0, %c0_i32, %arg2 : i32, i32, i32
  }
  func.func @transform_1(%arg0: i32, %arg1: i32, %arg2: i32) -> (i32, i32) {
    %c0_i32 = arith.constant 0 : i32
    return %arg2, %arg1 : i32, i32
  }
  func.func @transform_2(%arg0: i32, %arg1: i32, %arg2: i32) -> (i32, i32) {
    %c0_i32 = arith.constant 0 : i32
    %c0_i32_0 = arith.constant 0 : i32
    return %c0_i32, %arg1 : i32, i32
  }
  func.func @transform_3(%arg0: i32, %arg1: i32, %arg2: i32) -> (i32, i32, i32) {
    %c0_i32 = arith.constant 0 : i32
    %c0_i32_0 = arith.constant 0 : i32
    return %arg0, %c0_i32, %arg1 : i32, i32, i32
  }
}

module attributes {stable_mosaic.version = 11 : i64} {
  func.func @_conv_block_kernel(%arg0: i32, %arg1: i32, %arg2: i32, %arg3: memref<1x4x512xbf16, #tpu.memory_space<vmem>>, %arg4: memref<512x128xbf16, #tpu.memory_space<vmem>>, %arg5: memref<1x128xf32, #tpu.memory_space<vmem>>, %arg6: memref<1x4x128xf32, #tpu.memory_space<vmem>>, %arg7: memref<4x128xf32, #tpu.memory_space<vmem>>) attributes {dimension_semantics = [#tpu.dimension_semantics<parallel>, #tpu.dimension_semantics<parallel>, #tpu.dimension_semantics<arbitrary>], iteration_bounds = array<i64: 2, 1, 16>, scalar_prefetch = 0 : i64, scratch_operands = 1 : i64, tpu.core_type = #tpu.core_type<tc>, window_params = [{transform_indices = @transform_0, window_bounds = array<i64: 1, 4, 512>}, {transform_indices = @transform_1, window_bounds = array<i64: 512, 128>}, {transform_indices = @transform_2, window_bounds = array<i64: 1, 128>}, {transform_indices = @transform_3, window_bounds = array<i64: 1, 4, 128>}]} {
    %c0_i32 = arith.constant 0 : i32
    %0 = arith.cmpi eq, %arg2, %c0_i32 : i32
    %1 = arith.extui %0 : i1 to i32
    %c0_i32_0 = arith.constant 0 : i32
    %2 = arith.cmpi ne, %1, %c0_i32_0 : i32
    scf.if %2 {
      %cst_10 = arith.constant 0.000000e+00 : f32
      %13 = vector.broadcast %cst_10 : f32 to vector<4x128xf32>
      %c0_11 = arith.constant 0 : index
      %c0_12 = arith.constant 0 : index
      %14 = vector.load %arg7[%c0_11, %c0_12] : memref<4x128xf32, #tpu.memory_space<vmem>>, vector<4x128xf32>
      tpu.vector_store %arg7[%c0_11, %c0_12], %13 {strides = array<i32>} : memref<4x128xf32, #tpu.memory_space<vmem>>, vector<4x128xf32>,
    } else {
    }
    %c0 = arith.constant 0 : index
    %c0_1 = arith.constant 0 : index
    %3 = vector.load %arg7[%c0, %c0_1] : memref<4x128xf32, #tpu.memory_space<vmem>>, vector<4x128xf32>
    %c0_2 = arith.constant 0 : index
    %c0_3 = arith.constant 0 : index
    %c0_4 = arith.constant 0 : index
    %4 = vector.load %arg3[%c0_2, %c0_3, %c0_4] : memref<1x4x512xbf16, #tpu.memory_space<vmem>>, vector<1x4x512xbf16>
    %5 = vector.shape_cast %4 : vector<1x4x512xbf16> to vector<4x512xbf16>
    %c0_5 = arith.constant 0 : index
    %c0_6 = arith.constant 0 : index
    %6 = vector.load %arg4[%c0_5, %c0_6] : memref<512x128xbf16, #tpu.memory_space<vmem>>, vector<512x128xbf16>
    %cst = arith.constant dense<0.000000e+00> : vector<4x128xf32>
    %7 = tpu.matmul %5, %6, %cst {dimension_numbers = #tpu.dot_dimension_numbers<[1], [0], [0], [1], [0, 0, 1, 1], [], []>} : vector<4x512xbf16>, vector<512x128xbf16>, vector<4x128xf32> -> vector<4x128xf32>
    %8 = arith.addf %3, %7 : vector<4x128xf32>
    %c0_7 = arith.constant 0 : index
    %c0_8 = arith.constant 0 : index
    %9 = vector.load %arg7[%c0_7, %c0_8] : memref<4x128xf32, #tpu.memory_space<vmem>>, vector<4x128xf32>
    tpu.vector_store %arg7[%c0_7, %c0_8], %8 {strides = array<i32>} : memref<4x128xf32, #tpu.memory_space<vmem>>, vector<4x128xf32>,
    %c15_i32 = arith.constant 15 : i32
    %10 = arith.cmpi eq, %arg2, %c15_i32 : i32
    %11 = arith.extui %10 : i1 to i32
    %c0_i32_9 = arith.constant 0 : i32
    %12 = arith.cmpi ne, %11, %c0_i32_9 : i32
    scf.if %12 {
      %c0_10 = arith.constant 0 : index
      %c0_11 = arith.constant 0 : index
      %13 = vector.load %arg7[%c0_10, %c0_11] : memref<4x128xf32, #tpu.memory_space<vmem>>, vector<4x128xf32>
      %c0_12 = arith.constant 0 : index
      %c0_13 = arith.constant 0 : index
      %14 = vector.load %arg5[%c0_12, %c0_13] : memref<1x128xf32, #tpu.memory_space<vmem>>, vector<1x128xf32>
      %15 = vector.broadcast %14 : vector<1x128xf32> to vector<4x128xf32>
      %16 = arith.addf %13, %15 : vector<4x128xf32>
      %c0_14 = arith.constant 0 : index
      %c0_15 = arith.constant 0 : index
      %c0_16 = arith.constant 0 : index
      %17 = vector.load %arg6[%c0_14, %c0_15, %c0_16] : memref<1x4x128xf32, #tpu.memory_space<vmem>>, vector<1x4x128xf32>
      %18 = vector.shape_cast %17 : vector<1x4x128xf32> to vector<4x128xf32>
      %19 = vector.shape_cast %16 : vector<4x128xf32> to vector<1x4x128xf32>
      tpu.vector_store %arg6[%c0_14, %c0_15, %c0_16], %19 {strides = array<i32>} : memref<1x4x128xf32, #tpu.memory_space<vmem>>, vector<1x4x128xf32>,
    } else {
    }
    return
  }
  func.func @transform_0(%arg0: i32, %arg1: i32, %arg2: i32) -> (i32, i32, i32) {
    %c0_i32 = arith.constant 0 : i32
    %c0_i32_0 = arith.constant 0 : i32
    return %arg0, %c0_i32, %arg2 : i32, i32, i32
  }
  func.func @transform_1(%arg0: i32, %arg1: i32, %arg2: i32) -> (i32, i32) {
    %c0_i32 = arith.constant 0 : i32
    return %arg2, %arg1 : i32, i32
  }
  func.func @transform_2(%arg0: i32, %arg1: i32, %arg2: i32) -> (i32, i32) {
    %c0_i32 = arith.constant 0 : i32
    %c0_i32_0 = arith.constant 0 : i32
    return %c0_i32, %arg1 : i32, i32
  }
  func.func @transform_3(%arg0: i32, %arg1: i32, %arg2: i32) -> (i32, i32, i32) {
    %c0_i32 = arith.constant 0 : i32
    %c0_i32_0 = arith.constant 0 : i32
    return %arg0, %c0_i32, %arg1 : i32, i32, i32
  }
}

</mosaic_0001>

<bundles_post_ra>
// kernel: patchgan_forward.5
= control target key start
LH: loop header
LB: loop body
LE: loop exit
PB: predicated region body
PF: predicated region fallthrough
CT: control target
= control target key end

     0   :  { %s1568_s12 = smov 0   ;;  %s1570_s13 = smov 0   ;;  %s1711_s0 = inlined_call_operand.vmem [shape: bf16[2,256,128], index: 0, kind: input, shape index: {}]   ;;  %s1712_s1 = inlined_call_operand.vmem [shape: bf16[128,128], index: 1, kind: input, shape index: {}]   ;;  %s1713_s2 = inlined_call_operand.vmem [shape: f32[1,128], index: 2, kind: input, shape index: {}]   ;;  %s1714_s3 = inlined_call_operand.vmem [shape: bf16[2,256,128], index: 3, kind: output, shape index: {}]  }
   0x1   :  { %s1572_s14 = smov 0  }
   0x2 LB: > { %s32_s15 = sadd.s32 1, %s1542_s13  ;;  %p1195_p0 = scmp.ge.s32.totalorder %s1546_s14, 1  ;;  %s1546_s14 = sphi %s1572_s14, %s13_s14   ;;  %s1542_s13 = sphi %s1570_s13, %s1716_s13   ;;  %s1538_s12 = sphi %s1568_s12, %s1715_s12  }
   0x3   : > { %p34_p1 = scmp.ge.s32.totalorder %s32_s15, 2  ;;  %p187_p2 = scmp.lt.s32.totalorder %s1546_s14, 3 }
   0x5   : > { %s1718_s15 = smov (%p34_p1, %s32_s15), 0  ;;  %p188_p3 = pnand %p1195_p0, %p187_p2 }
   0x6   : > { %v1500_v0 = vld [vmem:[%s1712_s1] sm:$0xff] (!%p188_p3)   ;;  %p228_p4 = scmp.lt.s32.totalorder (!%p188_p3), %s1538_s12, 1  ;;  %v1501_v1 = vld [vmem:[%s1712_s1 + $0x8] sm:$0xff] (!%p188_p3)   ;;  %v1502_v2 = vld [vmem:[%s1712_s1 + $0x10] sm:$0xff] (!%p188_p3)  }
   0x7   : > { %191 = sbr.rel (%p188_p3) target bundleno = 294 (0x126), region = 32  ;;  %1412 = vmatprep.subr.bf16.mxu0 (!%p188_p3), %v1500_v0  ;;  %1460 = vmatprep.subr.bf16.mxu1 (!%p188_p3), %v1500_v0  ;;  %v1503_v3 = vld [vmem:[%s1712_s1 + $0x18] sm:$0xff] (!%p188_p3)   ;;  %v1504_v6 = vld [vmem:[%s1712_s1 + $0x20] sm:$0xff] (!%p188_p3)   ;;  %v1505_v7 = vld [vmem:[%s1712_s1 + $0x28] sm:$0xff] (!%p188_p3)  }
   0x8   : > { %1413 = vmatpush3.bf16.msra.mxu0 (!%p188_p3), %v1500_v0  ;;  %1468 = vmatpush3.bf16.msra.mxu1 (!%p188_p3), %v1500_v0  ;;  %v1506_v8 = vld [vmem:[%s1712_s1 + $0x30] sm:$0xff] (!%p188_p3)   ;;  %v1507_v9 = vld [vmem:[%s1712_s1 + $0x38] sm:$0xff] (!%p188_p3)   ;;  %v1639_v24 = vld [vmem:[%s1713_s2] ss:$0 sm:$0xff] (!%p188_p3) }
   0x9   : > { %1414 = vmatprep.subr.bf16.mxu0 (!%p188_p3), %v1501_v1  ;;  %1461 = vmatprep.subr.bf16.mxu1 (!%p188_p3), %v1501_v1 }
   0xc   : > { %1415 = vmatpush3.bf16.msra.mxu0 (!%p188_p3), %v1501_v1  ;;  %1469 = vmatpush3.bf16.msra.mxu1 (!%p188_p3), %v1501_v1 }
   0xd   : > { %1416 = vmatprep.subr.bf16.mxu0 (!%p188_p3), %v1502_v2  ;;  %1462 = vmatprep.subr.bf16.mxu1 (!%p188_p3), %v1502_v2 }
   0xe   : > { %s1720_s12 = smov (!%p228_p4, %s1538_s12), 1 }
   0xf   : > { %s1259_s22 = sshll.u32 %s1720_s12, 7 }
  0x10   : > { %s1603_s25 = scalar_lea.vmem %s1711_s0, %s1259_s22  ;;  %1417 = vmatpush3.bf16.msra.mxu0 %v1502_v2  ;;  %1470 = vmatpush3.bf16.msra.mxu1 %v1502_v2  ;;  %s1656_s17 = scalar_lea.vmem %s1714_s3, %s1259_s22 }
  0x11   : > { %v1508_v4 = vld [vmem:[%s1603_s25] sm:$0xff]   ;;  %1418 = vmatprep.subr.bf16.mxu0 %v1503_v3  ;;  %1463 = vmatprep.subr.bf16.mxu1 %v1503_v3  ;;  %v1510_v10 = vld [vmem:[%s1603_s25 + $0x8] sm:$0xff]   ;;  %v1512_v12 = vld [vmem:[%s1603_s25 + $0x10] sm:$0xff]  }
  0x12   : > { %v1509_v5 = vld [vmem:[%s1603_s25 + $0x40] sm:$0xff]   ;;  %1428 = vmatprep.mubr.bf16.mxu0 %v1508_v4  ;;  %v1511_v11 = vld [vmem:[%s1603_s25 + $0x48] sm:$0xff]   ;;  %v1513_v13 = vld [vmem:[%s1603_s25 + $0x50] sm:$0xff]  }
  0x13   : > { %1444 = vmatprep.mubr.bf16.mxu1 %v1509_v5  ;;  %v1514_v14 = vld [vmem:[%s1603_s25 + $0x18] sm:$0xff]   ;;  %v1516_v16 = vld [vmem:[%s1603_s25 + $0x20] sm:$0xff]   ;;  %v1518_v18 = vld [vmem:[%s1603_s25 + $0x28] sm:$0xff]  }
  0x14   : > { %1419 = vmatpush3.bf16.msra.mxu0 %v1503_v3  ;;  %1471 = vmatpush3.bf16.msra.mxu1 %v1503_v3  ;;  %v1515_v15 = vld [vmem:[%s1603_s25 + $0x58] sm:$0xff]   ;;  %v1517_v17 = vld [vmem:[%s1603_s25 + $0x60] sm:$0xff]   ;;  %v1519_v19 = vld [vmem:[%s1603_s25 + $0x68] sm:$0xff]  }
  0x15   : > { %1420 = vmatprep.subr.bf16.mxu0 %v1504_v6  ;;  %1464 = vmatprep.subr.bf16.mxu1 %v1504_v6  ;;  %v1520_v20 = vld [vmem:[%s1603_s25 + $0x30] sm:$0xff]   ;;  %v1522_v22 = vld [vmem:[%s1603_s25 + $0x38] sm:$0xff]  }
  0x16   : > { %v1521_v21 = vld [vmem:[%s1603_s25 + $0x70] sm:$0xff]   ;;  %v1523_v23 = vld [vmem:[%s1603_s25 + $0x78] sm:$0xff]  }
  0x18   : > { %1421 = vmatpush3.bf16.msra.mxu0 %v1504_v6  ;;  %1472 = vmatpush3.bf16.msra.mxu1 %v1504_v6 }
  0x19   : > { %1422 = vmatprep.subr.bf16.mxu0 %v1505_v7  ;;  %1465 = vmatprep.subr.bf16.mxu1 %v1505_v7 }
  0x1c   : > { %1423 = vmatpush3.bf16.msra.mxu0 %v1505_v7  ;;  %1473 = vmatpush3.bf16.msra.mxu1 %v1505_v7 }
  0x1d   : > { %1424 = vmatprep.subr.bf16.mxu0 %v1506_v8  ;;  %1466 = vmatprep.subr.bf16.mxu1 %v1506_v8 }
  0x20   : > { %1425 = vmatpush3.bf16.msra.mxu0 %v1506_v8  ;;  %1474 = vmatpush3.bf16.msra.mxu1 %v1506_v8 }
  0x21   : > { %1426 = vmatprep.subr.bf16.mxu0 %v1507_v9  ;;  %1467 = vmatprep.subr.bf16.mxu1 %v1507_v9 }
  0x24   : > { %1427 = vmatpush3.bf16.msra.mxu0 %v1507_v9  ;;  %1475 = vmatpush3.bf16.msra.mxu1 %v1507_v9 }
  0x27   : > { %1429 = vmatmul.mubr.bf16.vlgmr.msra.gmra.mrb[0].mxu0 %v1510_v10  ;;  %1445 = vmatmul.mubr.bf16.vlgmr.msra.gmra.mrb[0].mxu1 %v1511_v11 }
  0x28   : > { %1432 = vmatprep.mubr.bf16.mxu0 %v1512_v12  ;;  %1448 = vmatprep.mubr.bf16.mxu1 %v1513_v13 }
  0x2f   : > { %1433 = vmatmul.mubr.bf16.gmra.mrb[4].mxu0 %v1514_v14  ;;  %1449 = vmatmul.mubr.bf16.gmra.mrb[4].mxu1 %v1515_v15 }
  0x30   : > { %1436 = vmatprep.mubr.bf16.mxu0 %v1516_v16  ;;  %1452 = vmatprep.mubr.bf16.mxu1 %v1517_v17 }
  0x37   : > { %1437 = vmatmul.mubr.bf16.gmra.mrb[8].mxu0 %v1518_v18  ;;  %1453 = vmatmul.mubr.bf16.gmra.mrb[8].mxu1 %v1519_v19 }
  0x38   : > { %1440 = vmatprep.mubr.bf16.mxu0 %v1520_v20  ;;  %1456 = vmatprep.mubr.bf16.mxu1 %v1521_v21 }
  0x3f   : > { %1441 = vmatmul.mubr.bf16.gmra.mrb[12].mxu0 %v1522_v22  ;;  %1457 = vmatmul.mubr.bf16.gmra.mrb[12].mxu1 %v1523_v23 }
  0xfa   : > { %v1430_v25 = vpop.f32.mrb[0].mxu0  ;;  %v1446_v26 = vpop.f32.mrb[0].mxu1 }
  0xfb   : > { %v786_v27 = vadd.f32 %v1430_v25, %v1639_v24  ;;  %v802_v28 = vadd.f32 %v1446_v26, %v1639_v24  ;;  %v551_v29 = vpop.f32.mrb[1].mxu0  ;;  %v615_v30 = vpop.f32.mrb[1].mxu1 }
  0xfc   : > { %v784_v31 = vadd.f32 %v1639_v24, %v551_v29  ;;  %v800_v32 = vadd.f32 %v1639_v24, %v615_v30  ;;  %v1431_v33 = vpop.f32.mrb[2].mxu0  ;;  %v1447_v34 = vpop.f32.mrb[2].mxu1 }
  0xfd   : > { %vm818_vm0 = vcmp.gt.f32.partialorder %v786_v27, 0.0  ;;  %v850_v35 = vmul.f32 0.2, %v786_v27  ;;  %vm834_vm1 = vcmp.gt.f32.partialorder %v802_v28, 0.0  ;;  %v866_v36 = vmul.f32 0.2, %v802_v28 }
  0xfe   : > { %vm816_vm2 = vcmp.gt.f32.partialorder %v784_v31, 0.0  ;;  %v848_v37 = vmul.f32 0.2, %v784_v31  ;;  %vm832_vm3 = vcmp.gt.f32.partialorder %v800_v32, 0.0  ;;  %v864_v38 = vmul.f32 0.2, %v800_v32 }
  0xff   : > { %v787_v39 = vadd.f32 %v1431_v33, %v1639_v24  ;;  %v803_v40 = vadd.f32 %v1447_v34, %v1639_v24  ;;  %v554_v41 = vpop.f32.mrb[3].mxu0  ;;  %v618_v42 = vpop.f32.mrb[3].mxu1  ;;  %v882_v43 = vsel %vm818_vm0, %v786_v27, %v850_v35  ;;  %v898_v44 = vsel %vm834_vm1, %v802_v28, %v866_v36 }
 0x100   : > { %v785_v45 = vadd.f32 %v1639_v24, %v554_v41  ;;  %v801_v46 = vadd.f32 %v1639_v24, %v618_v42  ;;  %v880_v51 = vsel %vm816_vm2, %v784_v31, %v848_v37  ;;  %v896_v52 = vsel %vm832_vm3, %v800_v32, %v864_v38 }
 0x101   : > { %vm819_vm4 = vcmp.gt.f32.partialorder %v787_v39, 0.0  ;;  %v851_v47 = vmul.f32 0.2, %v787_v39  ;;  %vm835_vm5 = vcmp.gt.f32.partialorder %v803_v40, 0.0  ;;  %v867_v48 = vmul.f32 0.2, %v803_v40 }
 0x102   : > { %vm817_vm6 = vcmp.gt.f32.partialorder %v785_v45, 0.0  ;;  %v849_v49 = vmul.f32 0.2, %v785_v45  ;;  %vm833_vm7 = vcmp.gt.f32.partialorder %v801_v46, 0.0  ;;  %v865_v50 = vmul.f32 0.2, %v801_v46 }
 0x103   : > { %v883_v53 = vsel %vm819_vm4, %v787_v39, %v851_v47  ;;  %v899_v54 = vsel %vm835_vm5, %v803_v40, %v867_v48  ;;  %v1434_v55 = vpop.f32.mrb[4].mxu0  ;;  %v1450_v56 = vpop.f32.mrb[4].mxu1 }
 0x104   : > { %v1301_v57 = vpack.c.bf16 %v883_v53, %v882_v43  ;;  %v1341_v58 = vpack.c.bf16 %v899_v54, %v898_v44  ;;  %v881_v59 = vsel %vm817_vm6, %v785_v45, %v849_v49  ;;  %v897_v60 = vsel %vm833_vm7, %v801_v46, %v865_v50  ;;  %v567_v61 = vpop.f32.mrb[5].mxu0  ;;  %v631_v62 = vpop.f32.mrb[5].mxu1 }
 0x105   : > { %v1296_v63 = vpack.c.bf16 %v881_v59, %v880_v51  ;;  %v1336_v0 = vpack.c.bf16 %v897_v60, %v896_v52  ;;  %v790_v1 = vadd.f32 %v1434_v55, %v1639_v24  ;;  %v806_v2 = vadd.f32 %v1450_v56, %v1639_v24  ;;  %v1435_v3 = vpop.f32.mrb[6].mxu0  ;;  %v1451_v4 = vpop.f32.mrb[6].mxu1 }
 0x106   : > { %1373 = vst [vmem:[%s1656_s17 + $0x8] sm:$0xff] %v1301_v57   ;;  %1381 = vst [vmem:[%s1656_s17 + $0x48] sm:$0xff] %v1341_v58   ;;  %v788_v5 = vadd.f32 %v1639_v24, %v567_v61  ;;  %v804_v6 = vadd.f32 %v1639_v24, %v631_v62  ;;  %v791_v7 = vadd.f32 %v1435_v3, %v1639_v24  ;;  %v570_v9 = vpop.f32.mrb[7].mxu0  ;;  %v634_v10 = vpop.f32.mrb[7].mxu1 }
 0x107   : > { %v807_v8 = vadd.f32 %v1451_v4, %v1639_v24  ;;  %1297 = vst [vmem:[%s1656_s17] sm:$0xff] %v1296_v63   ;;  %1380 = vst [vmem:[%s1656_s17 + $0x40] sm:$0xff] %v1336_v0   ;;  %vm822_vm8 = vcmp.gt.f32.partialorder %v790_v1, 0.0  ;;  %v854_v11 = vmul.f32 0.2, %v790_v1  ;;  %vm838_vm9 = vcmp.gt.f32.partialorder %v806_v2, 0.0 }
 0x108   : > { %v870_v12 = vmul.f32 0.2, %v806_v2  ;;  %vm820_vm10 = vcmp.gt.f32.partialorder %v788_v5, 0.0  ;;  %v852_v13 = vmul.f32 0.2, %v788_v5  ;;  %vm836_vm11 = vcmp.gt.f32.partialorder %v804_v6, 0.0 }
 0x109   : > { %v886_v14 = vsel %vm822_vm8, %v790_v1, %v854_v11  ;;  %v868_v15 = vmul.f32 0.2, %v804_v6  ;;  %vm823_vm12 = vcmp.gt.f32.partialorder %v791_v7, 0.0  ;;  %v855_v16 = vmul.f32 0.2, %v791_v7 }
 0x10a   : > { %v902_v17 = vsel %vm838_vm9, %v806_v2, %v870_v12  ;;  %v884_v18 = vsel %vm820_vm10, %v788_v5, %v852_v13  ;;  %vm839_vm13 = vcmp.gt.f32.partialorder %v807_v8, 0.0  ;;  %v871_v19 = vmul.f32 0.2, %v807_v8  ;;  %v1438_v20 = vpop.f32.mrb[8].mxu0  ;;  %v1454_v21 = vpop.f32.mrb[8].mxu1 }
 0x10b   : > { %v887_v22 = vsel %vm823_vm12, %v791_v7, %v855_v16  ;;  %v789_v23 = vadd.f32 %v1639_v24, %v570_v9  ;;  %v805_v25 = vadd.f32 %v1639_v24, %v634_v10  ;;  %v794_v26 = vadd.f32 %v1438_v20, %v1639_v24  ;;  %v583_v27 = vpop.f32.mrb[9].mxu0  ;;  %v647_v28 = vpop.f32.mrb[9].mxu1 }
 0x10c   : > { %v1311_v29 = vpack.c.bf16 %v887_v22, %v886_v14  ;;  %v903_v30 = vsel %vm839_vm13, %v807_v8, %v871_v19  ;;  %v810_v31 = vadd.f32 %v1454_v21, %v1639_v24  ;;  %v792_v32 = vadd.f32 %v1639_v24, %v583_v27  ;;  %v1439_v33 = vpop.f32.mrb[10].mxu0  ;;  %v1455_v34 = vpop.f32.mrb[10].mxu1 }
 0x10d   : > { %v1351_v35 = vpack.c.bf16 %v903_v30, %v902_v17  ;;  %vm821_vm14 = vcmp.gt.f32.partialorder %v789_v23, 0.0  ;;  %v853_v36 = vmul.f32 0.2, %v789_v23  ;;  %vm837_vm15 = vcmp.gt.f32.partialorder %v805_v25, 0.0  ;;  %v586_v37 = vpop.f32.mrb[11].mxu0  ;;  %v650_v38 = vpop.f32.mrb[11].mxu1 }
 0x10e   : > { %1375 = vst [vmem:[%s1656_s17 + $0x18] sm:$0xff] %v1311_v29   ;;  %v869_v39 = vmul.f32 0.2, %v805_v25  ;;  %vm826_vm0 = vcmp.gt.f32.partialorder %v794_v26, 0.0  ;;  %v858_v40 = vmul.f32 0.2, %v794_v26  ;;  %v900_v41 = vsel %vm836_vm11, %v804_v6, %v868_v15 }
 0x10f   : > { %vm842_vm1 = vcmp.gt.f32.partialorder %v810_v31, 0.0  ;;  %1383 = vst [vmem:[%s1656_s17 + $0x58] sm:$0xff] %v1351_v35   ;;  %v885_v42 = vsel %vm821_vm14, %v789_v23, %v853_v36  ;;  %v874_v43 = vmul.f32 0.2, %v810_v31  ;;  %vm824_vm2 = vcmp.gt.f32.partialorder %v792_v32, 0.0 }
 0x110   : > { %v1306_v44 = vpack.c.bf16 %v885_v42, %v884_v18  ;;  %v901_v45 = vsel %vm837_vm15, %v805_v25, %v869_v39  ;;  %v856_v46 = vmul.f32 0.2, %v792_v32  ;;  %v808_v47 = vadd.f32 %v1639_v24, %v647_v28 }
 0x111   : > { %v1346_v48 = vpack.c.bf16 %v901_v45, %v900_v41  ;;  %v890_v49 = vsel %vm826_vm0, %v794_v26, %v858_v40  ;;  %v906_v50 = vsel %vm842_vm1, %v810_v31, %v874_v43  ;;  %v795_v51 = vadd.f32 %v1439_v33, %v1639_v24 }
 0x112   : > { %1374 = vst [vmem:[%s1656_s17 + $0x10] sm:$0xff] %v1306_v44   ;;  %vm840_vm3 = vcmp.gt.f32.partialorder %v808_v47, 0.0  ;;  %v872_v52 = vmul.f32 0.2, %v808_v47  ;;  %v811_v53 = vadd.f32 %v1455_v34, %v1639_v24  ;;  %v793_v54 = vadd.f32 %v1639_v24, %v586_v37  ;;  %v1442_v55 = vpop.f32.mrb[12].mxu0  ;;  %v1458_v56 = vpop.f32.mrb[12].mxu1 }
 0x113   : > { %1382 = vst [vmem:[%s1656_s17 + $0x50] sm:$0xff] %v1346_v48   ;;  %vm827_vm4 = vcmp.gt.f32.partialorder %v795_v51, 0.0  ;;  %v859_v57 = vmul.f32 0.2, %v795_v51  ;;  %v809_v58 = vadd.f32 %v1639_v24, %v650_v38  ;;  %v798_v59 = vadd.f32 %v1442_v55, %v1639_v24  ;;  %v599_v60 = vpop.f32.mrb[13].mxu0  ;;  %v663_v61 = vpop.f32.mrb[13].mxu1 }
 0x114   : > { %v888_v62 = vsel %vm824_vm2, %v792_v32, %v856_v46  ;;  %vm843_vm5 = vcmp.gt.f32.partialorder %v811_v53, 0.0  ;;  %v875_v63 = vmul.f32 0.2, %v811_v53  ;;  %vm825_vm6 = vcmp.gt.f32.partialorder %v793_v54, 0.0  ;;  %v1443_v0 = vpop.f32.mrb[14].mxu0  ;;  %v1459_v1 = vpop.f32.mrb[14].mxu1 }
 0x115   : > { %v891_v2 = vsel %vm827_vm4, %v795_v51, %v859_v57  ;;  %v857_v3 = vmul.f32 0.2, %v793_v54  ;;  %vm841_vm7 = vcmp.gt.f32.partialorder %v809_v58, 0.0  ;;  %v873_v4 = vmul.f32 0.2, %v809_v58  ;;  %v602_v5 = vpop.f32.mrb[15].mxu0 }
 0x116   : > { %v904_v6 = vsel %vm840_vm3, %v808_v47, %v872_v52  ;;  %v1321_v7 = vpack.c.bf16 %v891_v2, %v890_v49  ;;  %v907_v8 = vsel %vm843_vm5, %v811_v53, %v875_v63  ;;  %v862_v9 = vmul.f32 0.2, %v798_v59  ;;  %v666_v10 = vpop.f32.mrb[15].mxu1 }
 0x117   : > { %v1361_v11 = vpack.c.bf16 %v907_v8, %v906_v50  ;;  %v889_v12 = vsel %vm825_vm6, %v793_v54, %v857_v3  ;;  %v905_v13 = vsel %vm841_vm7, %v809_v58, %v873_v4  ;;  %v814_v14 = vadd.f32 %v1458_v56, %v1639_v24 }
 0x118   : > { %1377 = vst [vmem:[%s1656_s17 + $0x28] sm:$0xff] %v1321_v7   ;;  %v1316_v15 = vpack.c.bf16 %v889_v12, %v888_v62  ;;  %v1356_v16 = vpack.c.bf16 %v905_v13, %v904_v6  ;;  %vm830_vm8 = vcmp.gt.f32.partialorder %v798_v59, 0.0  ;;  %v796_v17 = vadd.f32 %v1639_v24, %v599_v60 }
 0x119   : > { %1385 = vst [vmem:[%s1656_s17 + $0x68] sm:$0xff] %v1361_v11   ;;  %vm846_vm9 = vcmp.gt.f32.partialorder %v814_v14, 0.0  ;;  %v878_v18 = vmul.f32 0.2, %v814_v14  ;;  %v812_v19 = vadd.f32 %v1639_v24, %v663_v61  ;;  %v799_v20 = vadd.f32 %v1443_v0, %v1639_v24 }
 0x11a   : > { %1376 = vst [vmem:[%s1656_s17 + $0x20] sm:$0xff] %v1316_v15   ;;  %1384 = vst [vmem:[%s1656_s17 + $0x60] sm:$0xff] %v1356_v16   ;;  %v860_v21 = vmul.f32 0.2, %v796_v17  ;;  %v815_v22 = vadd.f32 %v1459_v1, %v1639_v24  ;;  %v797_v23 = vadd.f32 %v1639_v24, %v602_v5  ;;  %v894_v25 = vsel %vm830_vm8, %v798_v59, %v862_v9 }
 0x11b   : > { %vm828_vm10 = vcmp.gt.f32.partialorder %v796_v17, 0.0  ;;  %vm831_vm11 = vcmp.gt.f32.partialorder %v799_v20, 0.0  ;;  %v910_v26 = vsel %vm846_vm9, %v814_v14, %v878_v18  ;;  %v863_v27 = vmul.f32 0.2, %v799_v20 }
 0x11c   : > { %vm847_vm12 = vcmp.gt.f32.partialorder %v815_v22, 0.0  ;;  %v879_v28 = vmul.f32 0.2, %v815_v22  ;;  %vm844_vm13 = vcmp.gt.f32.partialorder %v812_v19, 0.0  ;;  %vm829_vm14 = vcmp.gt.f32.partialorder %v797_v23, 0.0 }
 0x11d   : > { %v861_v29 = vmul.f32 0.2, %v797_v23  ;;  %v813_v30 = vadd.f32 %v1639_v24, %v666_v10  ;;  %v892_v31 = vsel %vm828_vm10, %v796_v17, %v860_v21  ;;  %v876_v32 = vmul.f32 0.2, %v812_v19 }
 0x11e   : > { %v895_v33 = vsel %vm831_vm11, %v799_v20, %v863_v27  ;;  %v911_v34 = vsel %vm847_vm12, %v815_v22, %v879_v28 }
 0x11f   : > { %v1331_v35 = vpack.c.bf16 %v895_v33, %v894_v25  ;;  %v1371_v36 = vpack.c.bf16 %v911_v34, %v910_v26  ;;  %v893_v37 = vsel %vm829_vm14, %v797_v23, %v861_v29  ;;  %vm845_vm15 = vcmp.gt.f32.partialorder %v813_v30, 0.0 }
 0x120   : > { %v1326_v38 = vpack.c.bf16 %v893_v37, %v892_v31  ;;  %v877_v39 = vmul.f32 0.2, %v813_v30  ;;  %v908_v40 = vsel %vm844_vm13, %v812_v19, %v876_v32 }
 0x121   : > { %1379 = vst [vmem:[%s1656_s17 + $0x38] sm:$0xff] %v1331_v35   ;;  %1387 = vst [vmem:[%s1656_s17 + $0x78] sm:$0xff] %v1371_v36  }
 0x122   : > { %1378 = vst [vmem:[%s1656_s17 + $0x30] sm:$0xff] %v1326_v38   ;;  %v909_v41 = vsel %vm845_vm15, %v813_v30, %v877_v39 }
 0x123   : > { %v1366_v42 = vpack.c.bf16 %v909_v41, %v908_v40 }
 0x125   : > { %1386 = vst [vmem:[%s1656_s17 + $0x70] sm:$0xff] %v1366_v42  }
 0x126 PF: > { %s13_s14 = sadd.s32 1, %s1546_s14   ;;  %s1715_s12 = smov %s1542_s13 }
 0x127   : > { %p10_p5 = scmp.ge.s32.totalorder %s13_s14, 4   ;;  %s1716_s13 = smov %s1718_s15 }
 0x129   :  { %12 = sbr.rel (!%p10_p5) target bundleno = 2 (0x2), region = 76 }

// kernel: patchgan_forward.6
= control target key start
LH: loop header
LB: loop body
LE: loop exit
PB: predicated region body
PF: predicated region fallthrough
CT: control target
= control target key end

     0   :  { %s1468_s12 = smov 0   ;;  %s1470_s13 = smov 0   ;;  %s1642_s0 = inlined_call_operand.vmem [shape: bf16[2,64,1024], index: 0, kind: input, shape index: {}]   ;;  %s1643_s1 = inlined_call_operand.vmem [shape: bf16[1024,128], index: 1, kind: input, shape index: {}]   ;;  %s1644_s2 = inlined_call_operand.vmem [shape: f32[1,128], index: 2, kind: input, shape index: {}]   ;;  %s1645_s3 = inlined_call_operand.vmem [shape: bf16[2,64,128], index: 3, kind: output, shape index: {}]  }
   0x1   :  { %s1472_s14 = smov 0   ;;  %s1474_s15 = smov 0  }
   0x2   :  { %s1476_s16 = smov 0   ;;  %s1478_s17 = smov 0  }
   0x3   :  { %s1480_s18 = smov 0  }
   0x4 LB: > { %s25_s19 = sadd.s32 1, %s1437_s16  ;;  %s32_s20 = sadd.s32 1, %s1441_s17  ;;  %s1445_s18 = sphi %s1480_s18, %s13_s18   ;;  %s1441_s17 = sphi %s1478_s17, %s1651_s17   ;;  %s1437_s16 = sphi %s1476_s16, %s1650_s16   ;;  %s1433_s15 = sphi %s1474_s15, %s1649_s15   ;;  %s1429_s14 = sphi %s1472_s14, %s1648_s14   ;;  %s1425_s13 = sphi %s1470_s13, %s1647_s13   ;;  %s1421_s12 = sphi %s1468_s12, %s1646_s12  }
   0x5   : > { %p26_p0 = scmp.ge.s32.totalorder %s25_s19, 2  ;;  %p48_p1 = scmp.ne.s32.totalorder %s1425_s13, %s1421_s12 }
   0x6   : > { %p49_p2 = scmp.eq.s32.totalorder %s1445_s18, 0  ;;  %s41_s24 = sadd.s32 1, %s1425_s13 }
   0x7   : > { %s1653_s19 = smov (%p26_p0, %s25_s19), 0  ;;  %s1655_s20 = smov (!%p26_p0, %s32_s20), %s1441_s17 }
   0x8   : > { %p50_p3 = por %p49_p2, %p48_p1  ;;  %p34_p4 = scmp.ge.s32.totalorder %s1655_s20, 2 }
   0x9   : > { %s37_s21 = ssub.s32 %s1437_s16, %s1653_s19  ;;  %p1092_p6 = scmp.ge.s32.totalorder %s1445_s18, 4 }
   0xa   : > { %s1657_s20 = smov (%p34_p4, %s1655_s20), 0 }
   0xb   : > { %s36_s22 = ssub.s32 %s1441_s17, %s1657_s20  ;;  %162 = sbr.rel (%p1092_p6) target bundleno = 33 (0x21), region = 20 }
   0xc   : > { %s38_s23 = sor.u32 %s37_s21, %s36_s22 }
   0xd   : > { %p39_p5 = scmp.eq.s32.totalorder %s38_s23, 0 }
   0xf   : > { %s1519_s25 = scalar_select %p39_p5, %s1425_s13, %s41_s24  }
  0x12   : > { %165 = sbr.rel (!%p50_p3) target bundleno = 33 (0x21), region = 24  ;;  %s167_s26 = sand.u32 (%p50_p3), 1, %s1425_s13  }
  0x13   : > { %s1094_s27 = sshll.u32 (%p50_p3), %s1437_s16, 2  ;;  %s1093_s28 = sshll.u32 (%p50_p3), %s167_s26, 7 }
  0x14   : > { %s1095_s29 = sshll.u32 (%p50_p3), %s1441_s17, 6  ;;  %s169_s8 = scalar_lea.vmem (%p50_p3), [#allocation3], %s1093_s28 }
  0x15   : > { %s172_s30 = sadd.s32 (%p50_p3), %s1095_s29, %s1094_s27 }
  0x16   : > { %s1096_s4 = sshll.u32 (%p50_p3), %s172_s30, 2 }
  0x17   : > { %s1528_s7 = scalar_lea.vmem (%p50_p3), %s1642_s0, %s1096_s4 }
  0x18   : > { %v187_v0 = vld [vmem:[%s1528_s7] sm:$0xff] (%p50_p3)  ;;  %v189_v1 = vld [vmem:[%s1528_s7 + $0x8] sm:$0xff] (%p50_p3) }
  0x19   : > { %v191_v2 = vld [vmem:[%s1528_s7 + $0x20] sm:$0xff]  ;;  %188 = vst [vmem:[%s169_s8] sm:$0xff] %v187_v0  ;;  %190 = vst [vmem:[%s169_s8 + $0x8] sm:$0xff] %v189_v1  ;;  %v193_v3 = vld [vmem:[%s1528_s7 + $0x28] sm:$0xff] }
  0x1a   : > { %192 = vst [vmem:[%s169_s8 + $0x10] sm:$0xff] %v191_v2  ;;  %v195_v4 = vld [vmem:[%s1528_s7 + $0x40] sm:$0xff]  ;;  %v197_v5 = vld [vmem:[%s1528_s7 + $0x48] sm:$0xff]  ;;  %194 = vst [vmem:[%s169_s8 + $0x18] sm:$0xff] %v193_v3 }
  0x1b   : > { %196 = vst [vmem:[%s169_s8 + $0x20] sm:$0xff] %v195_v4  ;;  %198 = vst [vmem:[%s169_s8 + $0x28] sm:$0xff] %v197_v5  ;;  %v199_v6 = vld [vmem:[%s1528_s7 + $0x60] sm:$0xff]  ;;  %v201_v7 = vld [vmem:[%s1528_s7 + $0x68] sm:$0xff] }
  0x1c   : > { %v203_v8 = vld [vmem:[%s1528_s7 + $0x80] sm:$0xff]  ;;  %200 = vst [vmem:[%s169_s8 + $0x30] sm:$0xff] %v199_v6  ;;  %202 = vst [vmem:[%s169_s8 + $0x38] sm:$0xff] %v201_v7  ;;  %v205_v9 = vld [vmem:[%s1528_s7 + $0x88] sm:$0xff] }
  0x1d   : > { %204 = vst [vmem:[%s169_s8 + $0x40] sm:$0xff] %v203_v8  ;;  %v207_v10 = vld [vmem:[%s1528_s7 + $0xa0] sm:$0xff]  ;;  %v209_v11 = vld [vmem:[%s1528_s7 + $0xa8] sm:$0xff]  ;;  %206 = vst [vmem:[%s169_s8 + $0x48] sm:$0xff] %v205_v9 }
  0x1e   : > { %208 = vst [vmem:[%s169_s8 + $0x50] sm:$0xff] %v207_v10  ;;  %210 = vst [vmem:[%s169_s8 + $0x58] sm:$0xff] %v209_v11  ;;  %v211_v12 = vld [vmem:[%s1528_s7 + $0xc0] sm:$0xff]  ;;  %v213_v13 = vld [vmem:[%s1528_s7 + $0xc8] sm:$0xff] }
  0x1f   : > { %v215_v14 = vld [vmem:[%s1528_s7 + $0xe0] sm:$0xff]  ;;  %212 = vst [vmem:[%s169_s8 + $0x60] sm:$0xff] %v211_v12  ;;  %214 = vst [vmem:[%s169_s8 + $0x68] sm:$0xff] %v213_v13  ;;  %v217_v15 = vld [vmem:[%s1528_s7 + $0xe8] sm:$0xff] }
  0x20   : > { %216 = vst [vmem:[%s169_s8 + $0x70] sm:$0xff] %v215_v14  ;;  %218 = vst [vmem:[%s169_s8 + $0x78] sm:$0xff] %v217_v15 }
  0x21 PF: > { %p1097_p7 = scmp.ge.s32.totalorder %s1445_s18, 1  ;;  %p235_p8 = scmp.lt.s32.totalorder %s1445_s18, 5 }
  0x23   : > { %p236_p9 = pnand %p1097_p7, %p235_p8 }
  0x24   : > { %s242_s9 = sand.u32 (!%p236_p9), 1, %s1421_s12   ;;  %s1099_s10 = sshll.u32 (!%p236_p9), %s1429_s14, 6 }
  0x25   : > { %239 = sbr.rel (%p236_p9) target bundleno = 392 (0x188), region = 51  ;;  %s1098_s11 = sshll.u32 (!%p236_p9), %s242_s9, 7 }
  0x26   : > { %p281_p10 = scmp.lt.s32.totalorder (!%p236_p9), %s1099_s10, 127  ;;  %p292_p11 = scmp.lt.s32.totalorder (!%p236_p9), %s1433_s15, 1 }
  0x27   : > { %s1562_s30 = scalar_lea.vmem (!%p236_p9), [#allocation3], %s1098_s11  ;;  %p1103_p12 = scmp.ne.s32.totalorder (!%p236_p9), %s1429_s14, 0 }
  0x2c   : > { %s1659_s10 = smov (!%p281_p10, %s1099_s10), 127  ;;  %s1661_s15 = smov (!%p292_p11, %s1433_s15), 1 }
  0x2d   : > { %s1100_s21 = sshll.u32 %s1659_s10, 2  ;;  %s1164_s26 = sshll.u32 %s1661_s15, 5  ;;  %v1447_v16 = vmov (!%p1103_p12), 0.0  }
  0x2e   : > { %s1555_s24 = scalar_lea.vmem %s1643_s1, %s1100_s21  ;;  %s1560_s29 = scalar_lea.vmem %s1645_s3, %s1164_s26  ;;  %305 = vst [vmem:[#allocation2] sm:$0xff] (!%p1103_p12), %v1447_v16  ;;  %306 = vst [vmem:[#allocation2 + $0x8] sm:$0xff] (!%p1103_p12), %v1447_v16 }
  0x2f   : > { %304 = sbr.rel (%p1103_p12) target bundleno = 54 (0x36), region = 59  ;;  %307 = vst [vmem:[#allocation2 + $0x10] sm:$0xff] (!%p1103_p12), %v1447_v16  ;;  %308 = vst [vmem:[#allocation2 + $0x18] sm:$0xff] (!%p1103_p12), %v1447_v16 }
  0x30   : > { %309 = vst [vmem:[#allocation2 + $0x20] sm:$0xff] (!%p1103_p12), %v1447_v16  ;;  %310 = vst [vmem:[#allocation2 + $0x28] sm:$0xff] (!%p1103_p12), %v1447_v16 }
  0x31   : > { %311 = vst [vmem:[#allocation2 + $0x30] sm:$0xff] (!%p1103_p12), %v1447_v16  ;;  %312 = vst [vmem:[#allocation2 + $0x38] sm:$0xff] (!%p1103_p12), %v1447_v16 }
  0x36 PF: > { %v1333_v17 = vld [vmem:[%s1555_s24 + $0x40] sm:$0xff]   ;;  %v1337_v21 = vld [vmem:[%s1555_s24 + $0x48] sm:$0xff]   ;;  %v1341_v25 = vld [vmem:[%s1555_s24 + $0x50] sm:$0xff]   ;;  %p1152_p13 = scmp.ne.s32.totalorder %s1429_s14, 1 }
  0x37   : > { %v1334_v18 = vld [vmem:[%s1555_s24 + $0xc0] sm:$0xff]   ;;  %1196 = vmatprep.subr.bf16.mxu0 %v1333_v17  ;;  %v1338_v22 = vld [vmem:[%s1555_s24 + $0xc8] sm:$0xff]   ;;  %v1342_v26 = vld [vmem:[%s1555_s24 + $0xd0] sm:$0xff]  }
  0x38   : > { %v1335_v19 = vld [vmem:[%s1555_s24] sm:$0xff]   ;;  %1236 = vmatprep.subr.bf16.mxu1 %v1334_v18  ;;  %v1339_v23 = vld [vmem:[%s1555_s24 + $0x8] sm:$0xff]   ;;  %v1343_v27 = vld [vmem:[%s1555_s24 + $0x10] sm:$0xff]  }
  0x39   : > { %v1336_v20 = vld [vmem:[%s1555_s24 + $0x80] sm:$0xff]   ;;  %1197 = vmatpush3.bf16.msra.mxu0 %v1335_v19  ;;  %v1340_v24 = vld [vmem:[%s1555_s24 + $0x88] sm:$0xff]   ;;  %v1344_v28 = vld [vmem:[%s1555_s24 + $0x90] sm:$0xff]  }
  0x3a   : > { %1237 = vmatpush3.bf16.msra.mxu1 %v1336_v20  ;;  %1198 = vmatprep.subr.bf16.mxu0 %v1337_v21  ;;  %v1345_v29 = vld [vmem:[%s1555_s24 + $0x58] sm:$0xff]   ;;  %v1349_v33 = vld [vmem:[%s1555_s24 + $0x60] sm:$0xff]   ;;  %v1353_v37 = vld [vmem:[%s1555_s24 + $0x68] sm:$0xff]  }
  0x3b   : > { %1238 = vmatprep.subr.bf16.mxu1 %v1338_v22  ;;  %v1346_v30 = vld [vmem:[%s1555_s24 + $0xd8] sm:$0xff]   ;;  %v1350_v34 = vld [vmem:[%s1555_s24 + $0xe0] sm:$0xff]   ;;  %v1354_v38 = vld [vmem:[%s1555_s24 + $0xe8] sm:$0xff]  }
  0x3c   : > { %v1347_v31 = vld [vmem:[%s1555_s24 + $0x18] sm:$0xff]   ;;  %v1351_v35 = vld [vmem:[%s1555_s24 + $0x20] sm:$0xff]   ;;  %v1355_v39 = vld [vmem:[%s1555_s24 + $0x28] sm:$0xff]  }
  0x3d   : > { %1199 = vmatpush3.bf16.msra.mxu0 %v1339_v23  ;;  %v1348_v32 = vld [vmem:[%s1555_s24 + $0x98] sm:$0xff]   ;;  %v1352_v36 = vld [vmem:[%s1555_s24 + $0xa0] sm:$0xff]   ;;  %v1356_v40 = vld [vmem:[%s1555_s24 + $0xa8] sm:$0xff]  }
  0x3e   : > { %1239 = vmatpush3.bf16.msra.mxu1 %v1340_v24  ;;  %1200 = vmatprep.subr.bf16.mxu0 %v1341_v25  ;;  %v1357_v41 = vld [vmem:[%s1555_s24 + $0x70] sm:$0xff]   ;;  %v1361_v45 = vld [vmem:[%s1555_s24 + $0x78] sm:$0xff]   ;;  %v313_v10 = vld [vmem:[#allocation2] sm:$0xff] }
  0x3f   : > { %1240 = vmatprep.subr.bf16.mxu1 %v1342_v26  ;;  %v1358_v42 = vld [vmem:[%s1555_s24 + $0xf0] sm:$0xff]   ;;  %v1362_v46 = vld [vmem:[%s1555_s24 + $0xf8] sm:$0xff]   ;;  %v314_v15 = vld [vmem:[#allocation2 + $0x8] sm:$0xff] }
  0x40   : > { %v1359_v43 = vld [vmem:[%s1555_s24 + $0x30] sm:$0xff]   ;;  %v1363_v47 = vld [vmem:[%s1555_s24 + $0x38] sm:$0xff]  }
  0x41   : > { %1201 = vmatpush3.bf16.msra.mxu0 %v1343_v27  ;;  %v1360_v44 = vld [vmem:[%s1555_s24 + $0xb0] sm:$0xff]   ;;  %v1364_v48 = vld [vmem:[%s1555_s24 + $0xb8] sm:$0xff]  }
  0x42   : > { %1241 = vmatpush3.bf16.msra.mxu1 %v1344_v28  ;;  %1202 = vmatprep.subr.bf16.mxu0 %v1345_v29  ;;  %v1365_v49 = vld [vmem:[%s1562_s30] ss:$16 sps:$4 sm:$0xff]   ;;  %v1367_v50 = vld [vmem:[%s1562_s30 + $0x4] ss:$16 sps:$4 sm:$0xff]   ;;  %v1368_v51 = vld [vmem:[%s1562_s30 + $0x8] ss:$16 sps:$4 sm:$0xff]  }
  0x43   : > { %1242 = vmatprep.subr.bf16.mxu1 %v1346_v30  ;;  %v1370_v52 = vld [vmem:[%s1562_s30 + $0xc] ss:$16 sps:$4 sm:$0xff]   ;;  %705 = vmatprep.mubr.bf16.mxu0 %v1367_v50  ;;  %v1371_v53 = vld [vmem:[%s1562_s30 + $0x24] ss:$16 sps:$4 sm:$0xff]   ;;  %v1375_v55 = vld [vmem:[%s1562_s30 + $0x20] ss:$16 sps:$4 sm:$0xff]  }
  0x44   : > { %770 = vmatprep.mubr.bf16.mxu1 %v1370_v52  ;;  %v1373_v54 = vld [vmem:[%s1562_s30 + $0x2c] ss:$16 sps:$4 sm:$0xff]   ;;  %v1376_v56 = vld [vmem:[%s1562_s30 + $0x28] ss:$16 sps:$4 sm:$0xff]   ;;  %v1377_v57 = vld [vmem:[%s1562_s30 + $0x44] ss:$16 sps:$4 sm:$0xff]  }
  0x45   : > { %1203 = vmatpush3.bf16.msra.mxu0 %v1347_v31  ;;  %v1379_v58 = vld [vmem:[%s1562_s30 + $0x4c] ss:$16 sps:$4 sm:$0xff]   ;;  %v1381_v59 = vld [vmem:[%s1562_s30 + $0x40] ss:$16 sps:$4 sm:$0xff]   ;;  %v1382_v60 = vld [vmem:[%s1562_s30 + $0x48] ss:$16 sps:$4 sm:$0xff]  }
  0x46   : > { %1243 = vmatpush3.bf16.msra.mxu1 %v1348_v32  ;;  %1204 = vmatprep.subr.bf16.mxu0 %v1349_v33  ;;  %v1383_v61 = vld [vmem:[%s1562_s30 + $0x64] ss:$16 sps:$4 sm:$0xff]   ;;  %v1385_v62 = vld [vmem:[%s1562_s30 + $0x6c] ss:$16 sps:$4 sm:$0xff]   ;;  %v1387_v63 = vld [vmem:[%s1562_s30 + $0x60] ss:$16 sps:$4 sm:$0xff]  }
  0x47   : > { %1244 = vmatprep.subr.bf16.mxu1 %v1350_v34  ;;  %v1388_v0 = vld [vmem:[%s1562_s30 + $0x68] ss:$16 sps:$4 sm:$0xff]   ;;  %v315_v28 = vld [vmem:[#allocation2 + $0x10] sm:$0xff] }
  0x48   : > { %v316_v33 = vld [vmem:[#allocation2 + $0x18] sm:$0xff] }
  0x49   : > { %1205 = vmatpush3.bf16.msra.mxu0 %v1351_v35 }
  0x4a   : > { %1245 = vmatpush3.bf16.msra.mxu1 %v1352_v36  ;;  %1206 = vmatprep.subr.bf16.mxu0 %v1353_v37 }
  0x4b   : > { %1246 = vmatprep.subr.bf16.mxu1 %v1354_v38 }
  0x4d   : > { %1207 = vmatpush3.bf16.msra.mxu0 %v1355_v39 }
  0x4e   : > { %1247 = vmatpush3.bf16.msra.mxu1 %v1356_v40  ;;  %1208 = vmatprep.subr.bf16.mxu0 %v1357_v41 }
  0x4f   : > { %1248 = vmatprep.subr.bf16.mxu1 %v1358_v42 }
  0x51   : > { %1209 = vmatpush3.bf16.msra.mxu0 %v1359_v43 }
  0x52   : > { %1249 = vmatpush3.bf16.msra.mxu1 %v1360_v44  ;;  %1210 = vmatprep.subr.bf16.mxu0 %v1361_v45 }
  0x53   : > { %1250 = vmatprep.subr.bf16.mxu1 %v1362_v46  ;;  %v317_v46 = vld [vmem:[#allocation2 + $0x20] sm:$0xff] }
  0x55   : > { %1211 = vmatpush3.bf16.msra.mxu0 %v1363_v47 }
  0x56   : > { %1251 = vmatpush3.bf16.msra.mxu1 %v1364_v48 }
  0x58   : > { %706 = vmatmul.mubr.bf16.vlgmr.msra.gmra.mrb[0].mxu0 %v1365_v49 }
  0x59   : > { %771 = vmatmul.mubr.bf16.vlgmr.msra.gmra.mrb[0].mxu1 %v1368_v51  ;;  %713 = vmatprep.mubr.bf16.mxu0 %v1371_v53  ;;  %v318_v51 = vld [vmem:[#allocation2 + $0x28] sm:$0xff] }
  0x5a   : > { %778 = vmatprep.mubr.bf16.mxu1 %v1373_v54 }
  0x60   : > { %714 = vmatmul.mubr.bf16.gmra.mrb[4].mxu0 %v1375_v55 }
  0x61   : > { %779 = vmatmul.mubr.bf16.gmra.mrb[4].mxu1 %v1376_v56  ;;  %721 = vmatprep.mubr.bf16.mxu0 %v1377_v57 }
  0x62   : > { %786 = vmatprep.mubr.bf16.mxu1 %v1379_v58 }
  0x68   : > { %722 = vmatmul.mubr.bf16.gmra.mrb[8].mxu0 %v1381_v59 }
  0x69   : > { %787 = vmatmul.mubr.bf16.gmra.mrb[8].mxu1 %v1382_v60  ;;  %729 = vmatprep.mubr.bf16.mxu0 %v1383_v61 }
  0x6a   : > { %794 = vmatprep.mubr.bf16.mxu1 %v1385_v62 }
  0x70   : > { %730 = vmatmul.mubr.bf16.gmra.mrb[12].mxu0 %v1387_v63 }
  0x71   : > { %795 = vmatmul.mubr.bf16.gmra.mrb[12].mxu1 %v1388_v0  ;;  %v319_v0 = vld [vmem:[#allocation2 + $0x30] sm:$0xff] }
 0x12b   : > { %v1212_v1 = vpop.f32.mrb[0].mxu0 }
 0x12c   : > { %v1252_v2 = vpop.f32.mrb[0].mxu1  ;;  %v1213_v3 = vpop.f32.mrb[1].mxu0 }
 0x12d   : > { %v1214_v4 = vadd.f32 %v1213_v3, %v1212_v1  ;;  %v1253_v5 = vpop.f32.mrb[1].mxu1  ;;  %v1215_v6 = vpop.f32.mrb[2].mxu0 }
 0x12e   : > { %v1254_v7 = vadd.f32 %v1253_v5, %v1252_v2  ;;  %v1255_v8 = vpop.f32.mrb[2].mxu1  ;;  %v1216_v9 = vpop.f32.mrb[3].mxu0  ;;  %v320_v5 = vld [vmem:[#allocation2 + $0x38] sm:$0xff] }
 0x12f   : > { %v1217_v11 = vadd.f32 %v1216_v9, %v1215_v6  ;;  %v1256_v12 = vpop.f32.mrb[3].mxu1 }
 0x130   : > { %v773_v13 = vadd.f32 %v1254_v7, %v1214_v4  ;;  %v1257_v14 = vadd.f32 %v1256_v12, %v1255_v8 }
 0x132   : > { %v803_v16 = vadd.f32 %v773_v13, %v313_v10  ;;  %v776_v17 = vadd.f32 %v1257_v14, %v1217_v11  ;;  %v1153_v14 = vld [vmem:[%s1644_s2] ss:$0 sm:$0xff] (!%p1152_p13) }
 0x133   : > { %v1218_v18 = vpop.f32.mrb[4].mxu0 }
 0x134   : > { %811 = vst [vmem:[#allocation2] sm:$0xff] %v803_v16  ;;  %v804_v19 = vadd.f32 %v776_v17, %v314_v15  ;;  %v1258_v20 = vpop.f32.mrb[4].mxu1  ;;  %v1219_v21 = vpop.f32.mrb[5].mxu0 }
 0x135   : > { %v1220_v22 = vadd.f32 %v1219_v21, %v1218_v18  ;;  %v1259_v23 = vpop.f32.mrb[5].mxu1  ;;  %v1221_v24 = vpop.f32.mrb[6].mxu0 }
 0x136   : > { %812 = vst [vmem:[#allocation2 + $0x8] sm:$0xff] %v804_v19  ;;  %v1260_v25 = vadd.f32 %v1259_v23, %v1258_v20  ;;  %v1261_v26 = vpop.f32.mrb[6].mxu1  ;;  %v1222_v27 = vpop.f32.mrb[7].mxu0 }
 0x137   : > { %v1223_v29 = vadd.f32 %v1222_v27, %v1221_v24  ;;  %v1262_v30 = vpop.f32.mrb[7].mxu1 }
 0x138   : > { %v781_v31 = vadd.f32 %v1260_v25, %v1220_v22  ;;  %v1263_v32 = vadd.f32 %v1262_v30, %v1261_v26 }
 0x13a   : > { %v805_v34 = vadd.f32 %v781_v31, %v315_v28  ;;  %v784_v35 = vadd.f32 %v1263_v32, %v1223_v29 }
 0x13b   : > { %v1224_v36 = vpop.f32.mrb[8].mxu0  ;;  %v823_v9 = vld [vmem:[#allocation2] sm:$0xff] (!%p1152_p13) }
 0x13c   : > { %813 = vst [vmem:[#allocation2 + $0x10] sm:$0xff] %v805_v34  ;;  %v806_v37 = vadd.f32 %v784_v35, %v316_v33  ;;  %v1264_v38 = vpop.f32.mrb[8].mxu1  ;;  %v1225_v39 = vpop.f32.mrb[9].mxu0  ;;  %v838_v15 = vadd.f32 (!%p1152_p13), %v1153_v14, %v823_v9 }
 0x13d   : > { %v1226_v40 = vadd.f32 %v1225_v39, %v1224_v36  ;;  %v1265_v41 = vpop.f32.mrb[9].mxu1  ;;  %v1227_v42 = vpop.f32.mrb[10].mxu0  ;;  %v824_v10 = vld [vmem:[#allocation2 + $0x8] sm:$0xff] (!%p1152_p13) }
 0x13e   : > { %814 = vst [vmem:[#allocation2 + $0x18] sm:$0xff] %v806_v37  ;;  %v1266_v43 = vadd.f32 %v1265_v41, %v1264_v38  ;;  %v1267_v44 = vpop.f32.mrb[10].mxu1  ;;  %v1228_v45 = vpop.f32.mrb[11].mxu0  ;;  %v839_v16 = vadd.f32 (!%p1152_p13), %v1153_v14, %v824_v10  ;;  %v861_v22 = vmul.f32 (!%p1152_p13), %v838_v15, %v838_v15 }
 0x13f   : > { %v1229_v47 = vadd.f32 %v1228_v45, %v1227_v42  ;;  %v1268_v48 = vpop.f32.mrb[11].mxu1 }
 0x140   : > { %v789_v49 = vadd.f32 %v1266_v43, %v1226_v40  ;;  %v1269_v50 = vadd.f32 %v1268_v48, %v1267_v44  ;;  %v846_v21 = vadd.f32 (!%p1152_p13), %v839_v16, %v838_v15  ;;  %v862_v23 = vmul.f32 (!%p1152_p13), %v839_v16, %v839_v16 }
 0x142   : > { %v807_v52 = vadd.f32 %v789_v49, %v317_v46  ;;  %v792_v53 = vadd.f32 %v1269_v50, %v1229_v47  ;;  %v869_v29 = vadd.f32 (!%p1152_p13), %v862_v23, %v861_v22 }
 0x143   : > { %v1230_v54 = vpop.f32.mrb[12].mxu0  ;;  %v825_v11 = vld [vmem:[#allocation2 + $0x10] sm:$0xff] (!%p1152_p13) }
 0x144   : > { %815 = vst [vmem:[#allocation2 + $0x20] sm:$0xff] %v807_v52  ;;  %v808_v55 = vadd.f32 %v792_v53, %v318_v51  ;;  %v1270_v56 = vpop.f32.mrb[12].mxu1  ;;  %v1231_v57 = vpop.f32.mrb[13].mxu0  ;;  %v840_v17 = vadd.f32 (!%p1152_p13), %v1153_v14, %v825_v11 }
 0x145   : > { %v1232_v58 = vadd.f32 %v1231_v57, %v1230_v54  ;;  %v1271_v59 = vpop.f32.mrb[13].mxu1  ;;  %v1233_v60 = vpop.f32.mrb[14].mxu0  ;;  %v826_v12 = vld [vmem:[#allocation2 + $0x18] sm:$0xff] (!%p1152_p13) }
 0x146   : > { %816 = vst [vmem:[#allocation2 + $0x28] sm:$0xff] %v808_v55  ;;  %v1272_v61 = vadd.f32 %v1271_v59, %v1270_v56  ;;  %v1273_v62 = vpop.f32.mrb[14].mxu1  ;;  %v1234_v63 = vpop.f32.mrb[15].mxu0  ;;  %v841_v18 = vadd.f32 (!%p1152_p13), %v1153_v14, %v826_v12  ;;  %v863_v24 = vmul.f32 (!%p1152_p13), %v840_v17, %v840_v17  ;;  %v847_v27 = vadd.f32 (!%p1152_p13), %v846_v21, %v840_v17 }
 0x147   : > { %v1235_v1 = vadd.f32 %v1234_v63, %v1233_v60  ;;  %v1274_v2 = vpop.f32.mrb[15].mxu1 }
 0x148   : > { %v797_v3 = vadd.f32 %v1272_v61, %v1232_v58  ;;  %v1275_v4 = vadd.f32 %v1274_v2, %v1273_v62  ;;  %822 = sbr.rel (%p1152_p13) target bundleno = 392 (0x188), region = 63  ;;  %v864_v28 = vmul.f32 (!%p1152_p13), %v841_v18, %v841_v18  ;;  %v848_v32 = vadd.f32 (!%p1152_p13), %v847_v27, %v841_v18 }
 0x149   : > { %v870_v34 = vadd.f32 (!%p1152_p13), %v869_v29, %v863_v24 }
 0x14a   : > { %v809_v6 = vadd.f32 %v797_v3, %v319_v0  ;;  %v800_v7 = vadd.f32 %v1275_v4, %v1235_v1 }
 0x14b   : > { %v827_v13 = vld [vmem:[#allocation2 + $0x20] sm:$0xff] (!%p1152_p13)  ;;  %v871_v38 = vadd.f32 (!%p1152_p13), %v870_v34, %v864_v28 }
 0x14c   : > { %817 = vst [vmem:[#allocation2 + $0x30] sm:$0xff] %v809_v6  ;;  %v810_v8 = vadd.f32 %v800_v7, %v320_v5  ;;  %v842_v20 = vadd.f32 (!%p1152_p13), %v1153_v14, %v827_v13 }
 0x14d   : > { %v828_v19 = vld [vmem:[#allocation2 + $0x28] sm:$0xff] (!%p1152_p13) }
 0x14e   : > { %818 = vst [vmem:[#allocation2 + $0x38] sm:$0xff] %v810_v8  ;;  %v843_v26 = vadd.f32 (!%p1152_p13), %v1153_v14, %v828_v19  ;;  %v865_v33 = vmul.f32 (!%p1152_p13), %v842_v20, %v842_v20  ;;  %v849_v36 = vadd.f32 (!%p1152_p13), %v848_v32, %v842_v20 }
 0x150   : > { %v866_v37 = vmul.f32 %v843_v26, %v843_v26  ;;  %v850_v39 = vadd.f32 %v849_v36, %v843_v26  ;;  %v872_v41 = vadd.f32 %v871_v38, %v865_v33 }
 0x152   : > { %v873_v44 = vadd.f32 %v872_v41, %v866_v37 }
 0x153   : > { %v829_v25 = vld [vmem:[#allocation2 + $0x30] sm:$0xff] }
 0x154   : > { %v844_v31 = vadd.f32 %v1153_v14, %v829_v25 }
 0x155   : > { %v830_v30 = vld [vmem:[#allocation2 + $0x38] sm:$0xff] }
 0x156   : > { %v845_v35 = vadd.f32 %v1153_v14, %v830_v30  ;;  %v867_v40 = vmul.f32 %v844_v31, %v844_v31  ;;  %v851_v42 = vadd.f32 %v850_v39, %v844_v31 }
 0x158   : > { %v868_v43 = vmul.f32 %v845_v35, %v845_v35  ;;  %v852_v45 = vadd.f32 %v851_v42, %v845_v35  ;;  %v874_v46 = vadd.f32 %v873_v44, %v867_v40 }
 0x15a   : > { %v853_v47 = vrot.slane %v852_v45, 4  ;;  %v875_v48 = vadd.f32 %v874_v46, %v868_v43 }
 0x15c   : > { %v854_v49 = vadd.f32 %v853_v47, %v852_v45  ;;  %v876_v50 = vrot.slane %v875_v48, 4 }
 0x15e   : > { %v855_v51 = vrot.slane %v854_v49, 2  ;;  %v877_v52 = vadd.f32 %v876_v50, %v875_v48 }
 0x160   : > { %v856_v53 = vadd.f32 %v855_v51, %v854_v49  ;;  %v878_v54 = vrot.slane %v877_v52, 2 }
 0x162   : > { %v857_v55 = vrot.slane %v856_v53, 1  ;;  %v879_v56 = vadd.f32 %v878_v54, %v877_v52 }
 0x164   : > { %v858_v57 = vadd.f32 %v857_v55, %v856_v53  ;;  %v880_v58 = vrot.slane %v879_v56, 1 }
 0x166   : > { %v860_v59 = vmul.f32 0.015625, %v858_v57  ;;  %v881_v60 = vadd.f32 %v880_v58, %v879_v56 }
 0x168   : > { %v882_v61 = vmul.f32 0.015625, %v881_v60  ;;  %v883_v62 = vmul.f32 %v860_v59, %v860_v59  ;;  %v886_v2 = vsub.f32 %v838_v15, %v860_v59  ;;  %v887_v3 = vsub.f32 %v839_v16, %v860_v59 }
 0x169   : > { %v888_v4 = vsub.f32 %v840_v17, %v860_v59  ;;  %v889_v5 = vsub.f32 %v841_v18, %v860_v59  ;;  %v890_v6 = vsub.f32 %v842_v20, %v860_v59  ;;  %v891_v7 = vsub.f32 %v843_v26, %v860_v59 }
 0x16a   : > { %v884_v63 = vsub.f32 %v882_v61, %v883_v62  ;;  %v892_v8 = vsub.f32 %v844_v31, %v860_v59  ;;  %v893_v9 = vsub.f32 %v845_v35, %v860_v59 }
 0x16c   : > { %v885_v0 = vmax.f32 %v884_v63, 0.0 }
 0x16e   : > { %v894_v1 = vadd.f32 1e-05, %v885_v0 }
 0x170   : > { %1389 = vrsqrt.f32 %v894_v1 }
 0x17a   : > { %v1390_v10 = vpop.eup %1389 }
 0x17b   : > { %v896_v11 = vmul.f32 %v1390_v10, %v886_v2  ;;  %v897_v12 = vmul.f32 %v1390_v10, %v887_v3  ;;  %v898_v13 = vmul.f32 %v1390_v10, %v888_v4  ;;  %v899_v14 = vmul.f32 %v1390_v10, %v889_v5 }
 0x17c   : > { %v900_v19 = vmul.f32 %v1390_v10, %v890_v6  ;;  %v901_v21 = vmul.f32 %v1390_v10, %v891_v7  ;;  %v902_v22 = vmul.f32 %v1390_v10, %v892_v8  ;;  %v903_v23 = vmul.f32 %v1390_v10, %v893_v9 }
 0x17d   : > { %vm904_vm0 = vcmp.gt.f32.partialorder %v896_v11, 0.0  ;;  %vm905_vm1 = vcmp.gt.f32.partialorder %v897_v12, 0.0  ;;  %v912_v24 = vmul.f32 0.2, %v896_v11  ;;  %v913_v15 = vmul.f32 0.2, %v897_v12 }
 0x17e   : > { %vm906_vm2 = vcmp.gt.f32.partialorder %v898_v13, 0.0  ;;  %vm907_vm3 = vcmp.gt.f32.partialorder %v899_v14, 0.0  ;;  %v914_v16 = vmul.f32 0.2, %v898_v13  ;;  %v915_v17 = vmul.f32 0.2, %v899_v14 }
 0x17f   : > { %v920_v18 = vsel %vm904_vm0, %v896_v11, %v912_v24  ;;  %v921_v20 = vsel %vm905_vm1, %v897_v12, %v913_v15  ;;  %vm908_vm4 = vcmp.gt.f32.partialorder %v900_v19, 0.0  ;;  %vm909_vm5 = vcmp.gt.f32.partialorder %v901_v21, 0.0 }
 0x180   : > { %v1176_v25 = vpack.c.bf16 %v921_v20, %v920_v18  ;;  %v922_v26 = vsel %vm906_vm2, %v898_v13, %v914_v16  ;;  %v923_v27 = vsel %vm907_vm3, %v899_v14, %v915_v17  ;;  %v916_v28 = vmul.f32 0.2, %v900_v19 }
 0x181   : > { %v1181_v29 = vpack.c.bf16 %v923_v27, %v922_v26  ;;  %v917_v30 = vmul.f32 0.2, %v901_v21  ;;  %vm910_vm6 = vcmp.gt.f32.partialorder %v902_v22, 0.0  ;;  %vm911_vm7 = vcmp.gt.f32.partialorder %v903_v23, 0.0 }
 0x182   : > { %1177 = vst [vmem:[%s1560_s29] sm:$0xff] %v1176_v25   ;;  %v924_v31 = vsel %vm908_vm4, %v900_v19, %v916_v28  ;;  %v918_v32 = vmul.f32 0.2, %v902_v22  ;;  %v919_v33 = vmul.f32 0.2, %v903_v23 }
 0x183   : > { %1193 = vst [vmem:[%s1560_s29 + $0x8] sm:$0xff] %v1181_v29   ;;  %v925_v34 = vsel %vm909_vm5, %v901_v21, %v917_v30 }
 0x184   : > { %v1186_v35 = vpack.c.bf16 %v925_v34, %v924_v31  ;;  %v926_v36 = vsel %vm910_vm6, %v902_v22, %v918_v32  ;;  %v927_v37 = vsel %vm911_vm7, %v903_v23, %v919_v33 }
 0x185   : > { %v1191_v38 = vpack.c.bf16 %v927_v37, %v926_v36 }
 0x186   : > { %1194 = vst [vmem:[%s1560_s29 + $0x10] sm:$0xff] %v1186_v35  }
 0x187   : > { %1195 = vst [vmem:[%s1560_s29 + $0x18] sm:$0xff] %v1191_v38  }
 0x188 PF: > { %s13_s18 = sadd.s32 1, %s1445_s18   ;;  %s1646_s12 = smov %s1425_s13 }
 0x189   : > { %p10_p0 = scmp.ge.s32.totalorder %s13_s18, 6   ;;  %s1647_s13 = smov %s1519_s25 }
 0x18a   : > { %s1648_s14 = smov %s1437_s16  ;;  %s1649_s15 = smov %s1441_s17 }
 0x18b   : > { %s1650_s16 = smov %s1653_s19  ;;  %s1651_s17 = smov %s1657_s20 }
 0x18c   :  { %12 = sbr.rel (!%p10_p0) target bundleno = 4 (0x4), region = 104 }

// kernel: patchgan_forward.7
= control target key start
LH: loop header
LB: loop body
LE: loop exit
PB: predicated region body
PF: predicated region fallthrough
CT: control target
= control target key end

     0   :  { %s1912_s0 = inlined_call_operand.vmem [shape: bf16[2,16,2048], index: 0, kind: input, shape index: {}]   ;;  %s1913_s1 = inlined_call_operand.vmem [shape: bf16[2048,256], index: 1, kind: input, shape index: {}]   ;;  %s1914_s2 = inlined_call_operand.vmem [shape: f32[1,256], index: 2, kind: input, shape index: {}]   ;;  %s1915_s3 = inlined_call_operand.vmem [shape: bf16[2,16,256], index: 3, kind: output, shape index: {}]  }
   0x1   :  { %1919 = sst [smem:[#allocation10_spill]] %s1912_s0 }
   0x2   :  { %1920 = sst [smem:[#allocation11_spill]] %s1915_s3 }
   0x3   :  { %s1530_s12 = smov 0   ;;  %s1532_s13 = smov 0  }
   0x4   :  { %s1534_s14 = smov 0   ;;  %s1536_s15 = smov 0  }
   0x5   :  { %s1538_s16 = smov 0   ;;  %s1540_s17 = smov 0  }
   0x6   :  { %s1542_s18 = smov 0   ;;  %s1544_s19 = smov 0  }
   0x7   :  { %s1546_s20 = smov 0   ;;  %s1548_s21 = smov 0  }
   0x8   :  { %s1550_s22 = smov 0   ;;  %s1552_s23 = smov 0  }
   0x9   :  { %s1554_s24 = smov 0  }
   0xa LB: > { %1921 = sst [smem:[#allocation6_spill]] %s1491_s20  ;;  %s25_s26 = sadd.s32 1, %s1495_s21  ;;  %s1507_s24 = sphi %s1554_s24, %s13_s24   ;;  %s1503_s23 = sphi %s1552_s23, %s1948_s23   ;;  %s1499_s22 = sphi %s1550_s22, %s1947_s22   ;;  %s1495_s21 = sphi %s1548_s21, %s1946_s21   ;;  %s1491_s20 = sphi %s1546_s20, %s1945_s20   ;;  %s1487_s19 = sphi %s1544_s19, %s1944_s19   ;;  %s1483_s18 = sphi %s1542_s18, %s1943_s18   ;;  %s1479_s17 = sphi %s1540_s17, %s1942_s17   ;;  %s1475_s16 = sphi %s1538_s16, %s1941_s16   ;;  %s1471_s15 = sphi %s1536_s15, %s1940_s15   ;;  %s1467_s14 = sphi %s1534_s14, %s1939_s14   ;;  %s1463_s13 = sphi %s1532_s13, %s1938_s13   ;;  %s1459_s12 = sphi %s1530_s12, %s1937_s12  }
   0xb   : > { %p26_p0 = scmp.ge.s32.totalorder %s25_s26, 4  ;;  %s28_s27 = sadd.s32 1, %s1499_s22 }
   0xc   : > { %s32_s28 = sadd.s32 1, %s1503_s23  ;;  %s41_s29 = sadd.s32 1, %s1479_s17 }
   0xd   : > { %s1950_s26 = smov (%p26_p0, %s25_s26), 0  ;;  %s1952_s27 = smov (!%p26_p0, %s28_s27), %s1499_s22 }
   0xe   : > { %1922 = sst [smem:[#allocation7_spill]] %s1950_s26  ;;  %s37_s30 = ssub.s32 %s1495_s21, %s1950_s26 }
   0xf   : > { %p48_p1 = scmp.ne.s32.totalorder %s1479_s17, %s1475_s16  ;;  %p30_p2 = scmp.ge.s32.totalorder %s1952_s27, 2 }
  0x10   : > { %p49_p3 = scmp.eq.s32.totalorder %s1507_s24, 0  ;;  %s69_s4 = sadd.s32 1, %s1471_s15 }
  0x11   : > { %p76_p4 = scmp.ne.s32.totalorder %s1471_s15, %s1467_s14  ;;  %s1954_s27 = smov (%p30_p2, %s1952_s27), 0 }
  0x12   : > { %1923 = sst [smem:[#allocation8_spill]] %s1954_s27  ;;  %s1956_s28 = smov (!%p30_p2, %s32_s28), %s1503_s23 }
  0x13   : > { %p1614_p5 = por %p49_p3, %p48_p1  ;;  %s65_s6 = ssub.s32 %s1499_s22, %s1954_s27 }
  0x14   : > { %p34_p6 = scmp.ge.s32.totalorder %s1956_s28, 2  ;;  %s66_s7 = sor.u32 %s65_s6, %s37_s30 }
  0x15   : > { %p67_p7 = scmp.eq.s32.totalorder %s66_s7, 0  ;;  %p1620_p8 = por %p76_p4, %p49_p3 }
  0x16   : > { %s1958_s28 = smov (%p34_p6, %s1956_s28), 0  ;;  %s123_s11 = sadd.s32 1, %s1463_s13 }
  0x17   : > { %1926 = sst [smem:[#allocation9_spill]] %s1958_s28  ;;  %s36_s10 = ssub.s32 %s1503_s23, %s1958_s28 }
  0x18   : > { %s1627_s9 = scalar_select %p67_p7, %s1471_s15, %s69_s4  }
  0x19   : > { %s38_s25 = sor.u32 %s37_s30, %s36_s10  ;;  %s120_s26 = sor.u32 %s65_s6, %s36_s10 }
  0x1a   : > { %p39_p9 = scmp.eq.s32.totalorder %s38_s25, 0  ;;  %p121_p10 = scmp.eq.s32.totalorder %s120_s26, 0 }
  0x1b   : > { %p133_p11 = scmp.ne.s32.totalorder %s1463_s13, %s1459_s12  ;;  %s1927_s27 = sadd.s32 4294967295, %s1507_s24  }
  0x1c   : > { %p134_p12 = scmp.eq.s32.totalorder %s1927_s27, 15  ;;  %p1149_p0 = scmp.ge.s32.totalorder %s1507_s24, 16 }
  0x1d   : > { %s1637_s3 = scalar_select %p39_p9, %s1479_s17, %s41_s29  }
  0x1e   : > { %s1640_s7 = scalar_select %p121_p10, %s1463_s13, %s123_s11  }
  0x1f   : > { %p1642_p13 = por %p134_p12, %p133_p11  ;;  %156 = sbr.rel (%p1149_p0) target bundleno = 98 (0x62), region = 16 }
  0x26   : > { %159 = sbr.rel (!%p1614_p5) target bundleno = 50 (0x32), region = 20  ;;  %s161_s25 = sand.u32 (%p1614_p5), 1, %s1479_s17  }
  0x27   : > { %s1151_s26 = sshll.u32 (%p1614_p5), %s1495_s21, 2  ;;  %s1150_s27 = sshll.u32 (%p1614_p5), %s161_s25, 5 }
  0x28   : > { %s1152_s29 = sshll.u32 (%p1614_p5), %s1503_s23, 5  ;;  %s1929_s0 = sld [smem:[#allocation10_spill]] (%p1614_p5) }
  0x29   : > { %s166_s30 = sadd.s32 (%p1614_p5), %s1152_s29, %s1151_s26  ;;  %s163_s28 = scalar_lea.vmem (%p1614_p5), [#allocation3], %s1150_s27 }
  0x2a   : > { %s1153_s4 = sshll.u32 (%p1614_p5), %s166_s30, 2 }
  0x2e   : > { %s168_s11 = scalar_lea.vmem %s1929_s0, %s1153_s4 }
  0x2f   : > { %v181_v0 = vld [vmem:[%s168_s11] sm:$0xff]  ;;  %v183_v1 = vld [vmem:[%s168_s11 + $0x8] sm:$0xff] }
  0x30   : > { %v185_v2 = vld [vmem:[%s168_s11 + $0x40] sm:$0xff]  ;;  %182 = vst [vmem:[%s163_s28] sm:$0xff] %v181_v0  ;;  %184 = vst [vmem:[%s163_s28 + $0x8] sm:$0xff] %v183_v1  ;;  %v187_v3 = vld [vmem:[%s168_s11 + $0x48] sm:$0xff] }
  0x31   : > { %186 = vst [vmem:[%s163_s28 + $0x10] sm:$0xff] %v185_v2  ;;  %188 = vst [vmem:[%s163_s28 + $0x18] sm:$0xff] %v187_v3 }
  0x32 PF: > { %194 = sbr.rel (!%p1620_p8) target bundleno = 98 (0x62), region = 43  ;;  %s196_s5 = sand.u32 (%p1620_p8), 1, %s1471_s15  }
  0x33   : > { %s1208_s25 = sshll.u32 (%p1620_p8), %s1495_s21, 7  ;;  %s1154_s26 = sshll.u32 (%p1620_p8), %s196_s5, 8 }
  0x34   : > { %s201_s29 = sadd.s32 (%p1620_p8), %s1499_s22, %s1208_s25  ;;  %s1668_s28 = scalar_lea.vmem (%p1620_p8), [#allocation4], %s1154_s26 }
  0x35   : > { %s1157_s30 = sshll.u32 (%p1620_p8), %s201_s29, 2 }
  0x36   : > { %s1663_s27 = scalar_lea.vmem (%p1620_p8), %s1913_s1, %s1157_s30 }
  0x37   : > { %v219_v4 = vld [vmem:[%s1663_s27] sm:$0xf] (%p1620_p8)  ;;  %v221_v5 = vld [vmem:[%s1663_s27 + $0x8] sm:$0xf] (%p1620_p8)  ;;  %v223_v6 = vld [vmem:[%s1663_s27 + $0x10] sm:$0xf] (%p1620_p8) }
  0x38   : > { %220 = vst [vmem:[%s1668_s28] sm:$0xf] (%p1620_p8), %v219_v4  ;;  %222 = vst [vmem:[%s1668_s28 + $0x4] sm:$0xf] (%p1620_p8), %v221_v5  ;;  %v225_v7 = vld [vmem:[%s1663_s27 + $0x18] sm:$0xf] (%p1620_p8) }
  0x39   : > { %224 = vst [vmem:[%s1668_s28 + $0x8] sm:$0xf] %v223_v6  ;;  %v227_v8 = vld [vmem:[%s1663_s27 + $0x20] sm:$0xf]  ;;  %v229_v9 = vld [vmem:[%s1663_s27 + $0x28] sm:$0xf] }
  0x3a   : > { %226 = vst [vmem:[%s1668_s28 + $0xc] sm:$0xf] %v225_v7  ;;  %228 = vst [vmem:[%s1668_s28 + $0x10] sm:$0xf] %v227_v8  ;;  %v231_v10 = vld [vmem:[%s1663_s27 + $0x30] sm:$0xf] }
  0x3b   : > { %230 = vst [vmem:[%s1668_s28 + $0x14] sm:$0xf] %v229_v9  ;;  %v233_v11 = vld [vmem:[%s1663_s27 + $0x38] sm:$0xf]  ;;  %v235_v12 = vld [vmem:[%s1663_s27 + $0x40] sm:$0xf] }
  0x3c   : > { %232 = vst [vmem:[%s1668_s28 + $0x18] sm:$0xf] %v231_v10  ;;  %234 = vst [vmem:[%s1668_s28 + $0x1c] sm:$0xf] %v233_v11  ;;  %v237_v13 = vld [vmem:[%s1663_s27 + $0x48] sm:$0xf] }
  0x3d   : > { %236 = vst [vmem:[%s1668_s28 + $0x20] sm:$0xf] %v235_v12  ;;  %v239_v14 = vld [vmem:[%s1663_s27 + $0x50] sm:$0xf]  ;;  %v241_v15 = vld [vmem:[%s1663_s27 + $0x58] sm:$0xf] }
  0x3e   : > { %238 = vst [vmem:[%s1668_s28 + $0x24] sm:$0xf] %v237_v13  ;;  %240 = vst [vmem:[%s1668_s28 + $0x28] sm:$0xf] %v239_v14  ;;  %v243_v16 = vld [vmem:[%s1663_s27 + $0x60] sm:$0xf] }
  0x3f   : > { %242 = vst [vmem:[%s1668_s28 + $0x2c] sm:$0xf] %v241_v15  ;;  %v245_v17 = vld [vmem:[%s1663_s27 + $0x68] sm:$0xf]  ;;  %v247_v18 = vld [vmem:[%s1663_s27 + $0x70] sm:$0xf] }
  0x40   : > { %244 = vst [vmem:[%s1668_s28 + $0x30] sm:$0xf] %v243_v16  ;;  %246 = vst [vmem:[%s1668_s28 + $0x34] sm:$0xf] %v245_v17  ;;  %v249_v19 = vld [vmem:[%s1663_s27 + $0x78] sm:$0xf] }
  0x41   : > { %248 = vst [vmem:[%s1668_s28 + $0x38] sm:$0xf] %v247_v18  ;;  %v251_v20 = vld [vmem:[%s1663_s27 + $0x80] sm:$0xf]  ;;  %v253_v21 = vld [vmem:[%s1663_s27 + $0x88] sm:$0xf] }
  0x42   : > { %250 = vst [vmem:[%s1668_s28 + $0x3c] sm:$0xf] %v249_v19  ;;  %252 = vst [vmem:[%s1668_s28 + $0x40] sm:$0xf] %v251_v20  ;;  %v255_v22 = vld [vmem:[%s1663_s27 + $0x90] sm:$0xf] }
  0x43   : > { %254 = vst [vmem:[%s1668_s28 + $0x44] sm:$0xf] %v253_v21  ;;  %v257_v23 = vld [vmem:[%s1663_s27 + $0x98] sm:$0xf]  ;;  %v259_v24 = vld [vmem:[%s1663_s27 + $0xa0] sm:$0xf] }
  0x44   : > { %256 = vst [vmem:[%s1668_s28 + $0x48] sm:$0xf] %v255_v22  ;;  %258 = vst [vmem:[%s1668_s28 + $0x4c] sm:$0xf] %v257_v23  ;;  %v261_v25 = vld [vmem:[%s1663_s27 + $0xa8] sm:$0xf] }
  0x45   : > { %260 = vst [vmem:[%s1668_s28 + $0x50] sm:$0xf] %v259_v24  ;;  %v263_v26 = vld [vmem:[%s1663_s27 + $0xb0] sm:$0xf]  ;;  %v265_v27 = vld [vmem:[%s1663_s27 + $0xb8] sm:$0xf] }
  0x46   : > { %262 = vst [vmem:[%s1668_s28 + $0x54] sm:$0xf] %v261_v25  ;;  %264 = vst [vmem:[%s1668_s28 + $0x58] sm:$0xf] %v263_v26  ;;  %v267_v28 = vld [vmem:[%s1663_s27 + $0xc0] sm:$0xf] }
  0x47   : > { %266 = vst [vmem:[%s1668_s28 + $0x5c] sm:$0xf] %v265_v27  ;;  %v269_v29 = vld [vmem:[%s1663_s27 + $0xc8] sm:$0xf]  ;;  %v271_v30 = vld [vmem:[%s1663_s27 + $0xd0] sm:$0xf] }
  0x48   : > { %268 = vst [vmem:[%s1668_s28 + $0x60] sm:$0xf] %v267_v28  ;;  %270 = vst [vmem:[%s1668_s28 + $0x64] sm:$0xf] %v269_v29  ;;  %v273_v31 = vld [vmem:[%s1663_s27 + $0xd8] sm:$0xf] }
  0x49   : > { %272 = vst [vmem:[%s1668_s28 + $0x68] sm:$0xf] %v271_v30  ;;  %v275_v32 = vld [vmem:[%s1663_s27 + $0xe0] sm:$0xf]  ;;  %v277_v33 = vld [vmem:[%s1663_s27 + $0xe8] sm:$0xf] }
  0x4a   : > { %274 = vst [vmem:[%s1668_s28 + $0x6c] sm:$0xf] %v273_v31  ;;  %276 = vst [vmem:[%s1668_s28 + $0x70] sm:$0xf] %v275_v32  ;;  %v279_v34 = vld [vmem:[%s1663_s27 + $0xf0] sm:$0xf] }
  0x4b   : > { %278 = vst [vmem:[%s1668_s28 + $0x74] sm:$0xf] %v277_v33  ;;  %v281_v35 = vld [vmem:[%s1663_s27 + $0xf8] sm:$0xf]  ;;  %v283_v36 = vld [vmem:[%s1663_s27 + $0x100] sm:$0xf] }
  0x4c   : > { %280 = vst [vmem:[%s1668_s28 + $0x78] sm:$0xf] %v279_v34  ;;  %282 = vst [vmem:[%s1668_s28 + $0x7c] sm:$0xf] %v281_v35  ;;  %v285_v37 = vld [vmem:[%s1663_s27 + $0x108] sm:$0xf] }
  0x4d   : > { %284 = vst [vmem:[%s1668_s28 + $0x80] sm:$0xf] %v283_v36  ;;  %v287_v38 = vld [vmem:[%s1663_s27 + $0x110] sm:$0xf]  ;;  %v289_v39 = vld [vmem:[%s1663_s27 + $0x118] sm:$0xf] }
  0x4e   : > { %286 = vst [vmem:[%s1668_s28 + $0x84] sm:$0xf] %v285_v37  ;;  %288 = vst [vmem:[%s1668_s28 + $0x88] sm:$0xf] %v287_v38  ;;  %v291_v40 = vld [vmem:[%s1663_s27 + $0x120] sm:$0xf] }
  0x4f   : > { %290 = vst [vmem:[%s1668_s28 + $0x8c] sm:$0xf] %v289_v39  ;;  %v293_v41 = vld [vmem:[%s1663_s27 + $0x128] sm:$0xf]  ;;  %v295_v42 = vld [vmem:[%s1663_s27 + $0x130] sm:$0xf] }
  0x50   : > { %292 = vst [vmem:[%s1668_s28 + $0x90] sm:$0xf] %v291_v40  ;;  %294 = vst [vmem:[%s1668_s28 + $0x94] sm:$0xf] %v293_v41  ;;  %v297_v43 = vld [vmem:[%s1663_s27 + $0x138] sm:$0xf] }
  0x51   : > { %296 = vst [vmem:[%s1668_s28 + $0x98] sm:$0xf] %v295_v42  ;;  %v299_v44 = vld [vmem:[%s1663_s27 + $0x140] sm:$0xf]  ;;  %v301_v45 = vld [vmem:[%s1663_s27 + $0x148] sm:$0xf] }
  0x52   : > { %298 = vst [vmem:[%s1668_s28 + $0x9c] sm:$0xf] %v297_v43  ;;  %300 = vst [vmem:[%s1668_s28 + $0xa0] sm:$0xf] %v299_v44  ;;  %v303_v46 = vld [vmem:[%s1663_s27 + $0x150] sm:$0xf] }
  0x53   : > { %302 = vst [vmem:[%s1668_s28 + $0xa4] sm:$0xf] %v301_v45  ;;  %v305_v47 = vld [vmem:[%s1663_s27 + $0x158] sm:$0xf]  ;;  %v307_v48 = vld [vmem:[%s1663_s27 + $0x160] sm:$0xf] }
  0x54   : > { %304 = vst [vmem:[%s1668_s28 + $0xa8] sm:$0xf] %v303_v46  ;;  %306 = vst [vmem:[%s1668_s28 + $0xac] sm:$0xf] %v305_v47  ;;  %v309_v49 = vld [vmem:[%s1663_s27 + $0x168] sm:$0xf] }
  0x55   : > { %308 = vst [vmem:[%s1668_s28 + $0xb0] sm:$0xf] %v307_v48  ;;  %v311_v50 = vld [vmem:[%s1663_s27 + $0x170] sm:$0xf]  ;;  %v313_v51 = vld [vmem:[%s1663_s27 + $0x178] sm:$0xf] }
  0x56   : > { %310 = vst [vmem:[%s1668_s28 + $0xb4] sm:$0xf] %v309_v49  ;;  %312 = vst [vmem:[%s1668_s28 + $0xb8] sm:$0xf] %v311_v50  ;;  %v315_v52 = vld [vmem:[%s1663_s27 + $0x180] sm:$0xf] }
  0x57   : > { %314 = vst [vmem:[%s1668_s28 + $0xbc] sm:$0xf] %v313_v51  ;;  %v317_v53 = vld [vmem:[%s1663_s27 + $0x188] sm:$0xf]  ;;  %v319_v54 = vld [vmem:[%s1663_s27 + $0x190] sm:$0xf] }
  0x58   : > { %316 = vst [vmem:[%s1668_s28 + $0xc0] sm:$0xf] %v315_v52  ;;  %318 = vst [vmem:[%s1668_s28 + $0xc4] sm:$0xf] %v317_v53  ;;  %v321_v55 = vld [vmem:[%s1663_s27 + $0x198] sm:$0xf] }
  0x59   : > { %320 = vst [vmem:[%s1668_s28 + $0xc8] sm:$0xf] %v319_v54  ;;  %v323_v56 = vld [vmem:[%s1663_s27 + $0x1a0] sm:$0xf]  ;;  %v325_v57 = vld [vmem:[%s1663_s27 + $0x1a8] sm:$0xf] }
  0x5a   : > { %322 = vst [vmem:[%s1668_s28 + $0xcc] sm:$0xf] %v321_v55  ;;  %324 = vst [vmem:[%s1668_s28 + $0xd0] sm:$0xf] %v323_v56  ;;  %v327_v58 = vld [vmem:[%s1663_s27 + $0x1b0] sm:$0xf] }
  0x5b   : > { %326 = vst [vmem:[%s1668_s28 + $0xd4] sm:$0xf] %v325_v57  ;;  %v329_v59 = vld [vmem:[%s1663_s27 + $0x1b8] sm:$0xf]  ;;  %v331_v60 = vld [vmem:[%s1663_s27 + $0x1c0] sm:$0xf] }
  0x5c   : > { %328 = vst [vmem:[%s1668_s28 + $0xd8] sm:$0xf] %v327_v58  ;;  %330 = vst [vmem:[%s1668_s28 + $0xdc] sm:$0xf] %v329_v59  ;;  %v333_v61 = vld [vmem:[%s1663_s27 + $0x1c8] sm:$0xf] }
  0x5d   : > { %332 = vst [vmem:[%s1668_s28 + $0xe0] sm:$0xf] %v331_v60  ;;  %v335_v62 = vld [vmem:[%s1663_s27 + $0x1d0] sm:$0xf]  ;;  %v337_v63 = vld [vmem:[%s1663_s27 + $0x1d8] sm:$0xf] }
  0x5e   : > { %334 = vst [vmem:[%s1668_s28 + $0xe4] sm:$0xf] %v333_v61  ;;  %336 = vst [vmem:[%s1668_s28 + $0xe8] sm:$0xf] %v335_v62  ;;  %v339_v0 = vld [vmem:[%s1663_s27 + $0x1e0] sm:$0xf] }
  0x5f   : > { %338 = vst [vmem:[%s1668_s28 + $0xec] sm:$0xf] %v337_v63  ;;  %v341_v1 = vld [vmem:[%s1663_s27 + $0x1e8] sm:$0xf]  ;;  %v343_v2 = vld [vmem:[%s1663_s27 + $0x1f0] sm:$0xf] }
  0x60   : > { %340 = vst [vmem:[%s1668_s28 + $0xf0] sm:$0xf] %v339_v0  ;;  %342 = vst [vmem:[%s1668_s28 + $0xf4] sm:$0xf] %v341_v1  ;;  %v345_v3 = vld [vmem:[%s1663_s27 + $0x1f8] sm:$0xf] }
  0x61   : > { %344 = vst [vmem:[%s1668_s28 + $0xf8] sm:$0xf] %v343_v2  ;;  %346 = vst [vmem:[%s1668_s28 + $0xfc] sm:$0xf] %v345_v3 }
  0x62 PF: > { %p1158_p1 = scmp.ge.s32.totalorder %s1507_s24, 1  ;;  %p502_p2 = scmp.lt.s32.totalorder %s1507_s24, 17 }
  0x64   : > { %p503_p3 = pnand %p1158_p1, %p502_p2 }
  0x65   : > { %s509_s8 = sand.u32 (!%p503_p3), 1, %s1475_s16   ;;  %s516_s10 = sand.u32 (!%p503_p3), 1, %s1467_s14  }
  0x66   : > { %506 = sbr.rel (%p503_p3) target bundleno = 437 (0x1b5), region = 88  ;;  %s1159_s11 = sshll.u32 (!%p503_p3), %s509_s8, 5 }
  0x67   : > { %s1160_s5 = sshll.u32 (!%p503_p3), %s516_s10, 8  ;;  %s542_s25 = sand.u32 (!%p503_p3), 1, %s1459_s12  }
  0x68   : > { %p547_p4 = scmp.lt.s32.totalorder (!%p503_p3), %s1487_s19, 1  ;;  %s1161_s26 = sshll.u32 (!%p503_p3), %s542_s25, 3 }
  0x69   : > { %s1808_s27 = scalar_lea.vmem (!%p503_p3), [#allocation3], %s1159_s11  ;;  %s1810_s28 = scalar_lea.vmem (!%p503_p3), [#allocation4], %s1160_s5 }
  0x6a   : > { %s1812_s0 = scalar_lea.vmem (!%p503_p3), [#allocation5], %s1161_s26  ;;  %p1162_p5 = scmp.ne.s32.totalorder (!%p503_p3), %s1483_s18, 0 }
  0x6d   : > { %s1802_s29 = scalar_select %p547_p4, %s1487_s19, 1 }
  0x6e   : > { %554 = sbr.rel (%p1162_p5) target bundleno = 117 (0x75), region = 100  ;;  %v1509_v4 = vmov (!%p1162_p5), 0.0  }
  0x6f   : > { %s549_s6 = scalar_lea.vmem %s1914_s2, %s1802_s29  ;;  %555 = vst [vmem:[#allocation2] sm:$0xff] (!%p1162_p5), %v1509_v4  ;;  %556 = vst [vmem:[#allocation2 + $0x8] sm:$0xff] (!%p1162_p5), %v1509_v4 }
  0x75 PF: > { %v1365_v5 = vld [vmem:[%s1810_s28 + $0x40] sm:$0xff]   ;;  %v1369_v9 = vld [vmem:[%s1810_s28 + $0x48] sm:$0xff]   ;;  %v1373_v13 = vld [vmem:[%s1810_s28 + $0x50] sm:$0xff]   ;;  %p1199_p6 = scmp.ne.s32.totalorder %s1483_s18, 3 }
  0x76   : > { %v1366_v6 = vld [vmem:[%s1810_s28 + $0xc0] sm:$0xff]   ;;  %1216 = vmatprep.subr.bf16.mxu0 %v1365_v5  ;;  %v1370_v10 = vld [vmem:[%s1810_s28 + $0xc8] sm:$0xff]   ;;  %v1374_v14 = vld [vmem:[%s1810_s28 + $0xd0] sm:$0xff]  }
  0x77   : > { %v1367_v7 = vld [vmem:[%s1810_s28] sm:$0xff]   ;;  %1238 = vmatprep.subr.bf16.mxu1 %v1366_v6  ;;  %v1371_v11 = vld [vmem:[%s1810_s28 + $0x8] sm:$0xff]   ;;  %v1375_v15 = vld [vmem:[%s1810_s28 + $0x10] sm:$0xff]  }
  0x78   : > { %v1368_v8 = vld [vmem:[%s1810_s28 + $0x80] sm:$0xff]   ;;  %1217 = vmatpush3.bf16.msra.mxu0 %v1367_v7  ;;  %v1372_v12 = vld [vmem:[%s1810_s28 + $0x88] sm:$0xff]   ;;  %v1376_v16 = vld [vmem:[%s1810_s28 + $0x90] sm:$0xff]  }
  0x79   : > { %1239 = vmatpush3.bf16.msra.mxu1 %v1368_v8  ;;  %1218 = vmatprep.subr.bf16.mxu0 %v1369_v9  ;;  %v1377_v17 = vld [vmem:[%s1810_s28 + $0x58] sm:$0xff]   ;;  %v1381_v21 = vld [vmem:[%s1810_s28 + $0x60] sm:$0xff]   ;;  %v1385_v25 = vld [vmem:[%s1810_s28 + $0x68] sm:$0xff]  }
  0x7a   : > { %1240 = vmatprep.subr.bf16.mxu1 %v1370_v10  ;;  %v1378_v18 = vld [vmem:[%s1810_s28 + $0xd8] sm:$0xff]   ;;  %v1382_v22 = vld [vmem:[%s1810_s28 + $0xe0] sm:$0xff]   ;;  %v1386_v26 = vld [vmem:[%s1810_s28 + $0xe8] sm:$0xff]  }
  0x7b   : > { %v1379_v19 = vld [vmem:[%s1810_s28 + $0x18] sm:$0xff]   ;;  %v1383_v23 = vld [vmem:[%s1810_s28 + $0x20] sm:$0xff]   ;;  %v1387_v27 = vld [vmem:[%s1810_s28 + $0x28] sm:$0xff]  }
  0x7c   : > { %1219 = vmatpush3.bf16.msra.mxu0 %v1371_v11  ;;  %v1380_v20 = vld [vmem:[%s1810_s28 + $0x98] sm:$0xff]   ;;  %v1384_v24 = vld [vmem:[%s1810_s28 + $0xa0] sm:$0xff]   ;;  %v1388_v28 = vld [vmem:[%s1810_s28 + $0xa8] sm:$0xff]  }
  0x7d   : > { %1241 = vmatpush3.bf16.msra.mxu1 %v1372_v12  ;;  %1220 = vmatprep.subr.bf16.mxu0 %v1373_v13  ;;  %v1389_v29 = vld [vmem:[%s1810_s28 + $0x70] sm:$0xff]   ;;  %v1393_v33 = vld [vmem:[%s1810_s28 + $0x78] sm:$0xff]  }
  0x7e   : > { %1242 = vmatprep.subr.bf16.mxu1 %v1374_v14  ;;  %v1390_v30 = vld [vmem:[%s1810_s28 + $0xf0] sm:$0xff]   ;;  %v1394_v34 = vld [vmem:[%s1810_s28 + $0xf8] sm:$0xff]  }
  0x7f   : > { %v1391_v31 = vld [vmem:[%s1810_s28 + $0x30] sm:$0xff]   ;;  %v1395_v35 = vld [vmem:[%s1810_s28 + $0x38] sm:$0xff]  }
  0x80   : > { %1221 = vmatpush3.bf16.msra.mxu0 %v1375_v15  ;;  %v1392_v32 = vld [vmem:[%s1810_s28 + $0xb0] sm:$0xff]   ;;  %v1396_v36 = vld [vmem:[%s1810_s28 + $0xb8] sm:$0xff]  }
  0x81   : > { %1243 = vmatpush3.bf16.msra.mxu1 %v1376_v16  ;;  %1222 = vmatprep.subr.bf16.mxu0 %v1377_v17  ;;  %v1397_v37 = vld [vmem:[%s1808_s27] ss:$16 sps:$4 sm:$0xff]   ;;  %v1399_v38 = vld [vmem:[%s1808_s27 + $0x4] ss:$16 sps:$4 sm:$0xff]   ;;  %v1400_v39 = vld [vmem:[%s1808_s27 + $0x8] ss:$16 sps:$4 sm:$0xff]  }
  0x82   : > { %1244 = vmatprep.subr.bf16.mxu1 %v1378_v18  ;;  %v1402_v40 = vld [vmem:[%s1808_s27 + $0xc] ss:$16 sps:$4 sm:$0xff]   ;;  %871 = vmatprep.mubr.bf16.mxu0 %v1399_v38  ;;  %v557_v50 = vld [vmem:[#allocation2] sm:$0xff] }
  0x83   : > { %912 = vmatprep.mubr.bf16.mxu1 %v1402_v40  ;;  %v558_v55 = vld [vmem:[#allocation2 + $0x8] sm:$0xff]  ;;  %v1200_v61 = vld [vmem:[%s549_s6] ss:$0 sm:$0xff] (!%p1199_p6) }
  0x84   : > { %1223 = vmatpush3.bf16.msra.mxu0 %v1379_v19 }
  0x85   : > { %1245 = vmatpush3.bf16.msra.mxu1 %v1380_v20  ;;  %1224 = vmatprep.subr.bf16.mxu0 %v1381_v21 }
  0x86   : > { %1246 = vmatprep.subr.bf16.mxu1 %v1382_v22 }
  0x88   : > { %1225 = vmatpush3.bf16.msra.mxu0 %v1383_v23 }
  0x89   : > { %1247 = vmatpush3.bf16.msra.mxu1 %v1384_v24  ;;  %1226 = vmatprep.subr.bf16.mxu0 %v1385_v25 }
  0x8a   : > { %1248 = vmatprep.subr.bf16.mxu1 %v1386_v26 }
  0x8c   : > { %1227 = vmatpush3.bf16.msra.mxu0 %v1387_v27 }
  0x8d   : > { %1249 = vmatpush3.bf16.msra.mxu1 %v1388_v28  ;;  %1228 = vmatprep.subr.bf16.mxu0 %v1389_v29 }
  0x8e   : > { %1250 = vmatprep.subr.bf16.mxu1 %v1390_v30 }
  0x90   : > { %1229 = vmatpush3.bf16.msra.mxu0 %v1391_v31 }
  0x91   : > { %1251 = vmatpush3.bf16.msra.mxu1 %v1392_v32  ;;  %1230 = vmatprep.subr.bf16.mxu0 %v1393_v33 }
  0x92   : > { %1252 = vmatprep.subr.bf16.mxu1 %v1394_v34 }
  0x94   : > { %1231 = vmatpush3.bf16.msra.mxu0 %v1395_v35 }
  0x95   : > { %1253 = vmatpush3.bf16.msra.mxu1 %v1396_v36 }
  0x97   : > { %872 = vmatmul.mubr.bf16.vlgmr.msra.gmra.mrb[0].mxu0 %v1397_v37 }
  0x98   : > { %913 = vmatmul.mubr.bf16.vlgmr.msra.gmra.mrb[0].mxu1 %v1400_v39 }
 0x16a   : > { %v1232_v41 = vpop.f32.mrb[0].mxu0 }
 0x16b   : > { %v1254_v42 = vpop.f32.mrb[0].mxu1  ;;  %v1233_v43 = vpop.f32.mrb[1].mxu0 }
 0x16c   : > { %v1234_v44 = vadd.f32 %v1233_v43, %v1232_v41  ;;  %v1255_v45 = vpop.f32.mrb[1].mxu1  ;;  %v1235_v46 = vpop.f32.mrb[2].mxu0 }
 0x16d   : > { %v1256_v47 = vadd.f32 %v1255_v45, %v1254_v42  ;;  %v1257_v48 = vpop.f32.mrb[2].mxu1  ;;  %v1236_v49 = vpop.f32.mrb[3].mxu0 }
 0x16e   : > { %v1237_v51 = vadd.f32 %v1236_v49, %v1235_v46  ;;  %v1258_v52 = vpop.f32.mrb[3].mxu1 }
 0x16f   : > { %v915_v53 = vadd.f32 %v1256_v47, %v1234_v44  ;;  %v1259_v54 = vadd.f32 %v1258_v52, %v1257_v48  ;;  %928 = sbr.rel (%p1199_p6) target bundleno = 426 (0x1aa), region = 104 }
 0x171   : > { %v921_v56 = vadd.f32 %v915_v53, %v557_v50  ;;  %v918_v57 = vadd.f32 %v1259_v54, %v1237_v51 }
 0x173   : > { %923 = vst [vmem:[#allocation2] sm:$0xff] %v921_v56  ;;  %v922_v58 = vadd.f32 %v918_v57, %v558_v55 }
 0x175   : > { %924 = vst [vmem:[#allocation2 + $0x8] sm:$0xff] %v922_v58 }
 0x17a   : > { %v929_v59 = vld [vmem:[#allocation2] sm:$0xff] }
 0x17b   : > { %v938_v62 = vadd.f32 %v1200_v61, %v929_v59 }
 0x17c   : > { %v930_v60 = vld [vmem:[#allocation2 + $0x8] sm:$0xff] }
 0x17d   : > { %v939_v63 = vadd.f32 %v1200_v61, %v930_v60  ;;  %v949_v1 = vmul.f32 %v938_v62, %v938_v62 }
 0x17f   : > { %v940_v0 = vadd.f32 %v939_v63, %v938_v62  ;;  %v950_v2 = vmul.f32 %v939_v63, %v939_v63 }
 0x181   : > { %v941_v3 = vrot.slane %v940_v0, 4  ;;  %v951_v4 = vadd.f32 %v950_v2, %v949_v1 }
 0x183   : > { %v942_v5 = vadd.f32 %v941_v3, %v940_v0  ;;  %v952_v6 = vrot.slane %v951_v4, 4 }
 0x185   : > { %v943_v7 = vrot.slane %v942_v5, 2  ;;  %v953_v8 = vadd.f32 %v952_v6, %v951_v4 }
 0x187   : > { %v944_v9 = vadd.f32 %v943_v7, %v942_v5  ;;  %v954_v10 = vrot.slane %v953_v8, 2 }
 0x189   : > { %v945_v11 = vrot.slane %v944_v9, 1  ;;  %v955_v12 = vadd.f32 %v954_v10, %v953_v8 }
 0x18b   : > { %v946_v13 = vadd.f32 %v945_v11, %v944_v9  ;;  %v956_v14 = vrot.slane %v955_v12, 1 }
 0x18d   : > { %v948_v15 = vmul.f32 0.0625, %v946_v13  ;;  %v957_v16 = vadd.f32 %v956_v14, %v955_v12 }
 0x18f   : > { %v958_v17 = vmul.f32 0.0625, %v957_v16  ;;  %v959_v18 = vmul.f32 %v948_v15, %v948_v15  ;;  %v962_v22 = vsub.f32 %v938_v62, %v948_v15  ;;  %v963_v23 = vsub.f32 %v939_v63, %v948_v15 }
 0x191   : > { %v960_v19 = vsub.f32 %v958_v17, %v959_v18 }
 0x193   : > { %v961_v20 = vmax.f32 %v960_v19, 0.0 }
 0x195   : > { %v964_v21 = vadd.f32 1e-05, %v961_v20 }
 0x197   : > { %1403 = vrsqrt.f32 %v964_v21 }
 0x1a1   : > { %v1404_v24 = vpop.eup %1403 }
 0x1a2   : > { %v966_v25 = vmul.f32 %v1404_v24, %v962_v22  ;;  %v967_v26 = vmul.f32 %v1404_v24, %v963_v23 }
 0x1a4   : > { %vm968_vm0 = vcmp.gt.f32.partialorder %v966_v25, 0.0  ;;  %vm969_vm1 = vcmp.gt.f32.partialorder %v967_v26, 0.0  ;;  %v970_v27 = vmul.f32 0.2, %v966_v25  ;;  %v971_v28 = vmul.f32 0.2, %v967_v26 }
 0x1a6   : > { %v972_v29 = vsel %vm968_vm0, %v966_v25, %v970_v27  ;;  %v973_v30 = vsel %vm969_vm1, %v967_v26, %v971_v28 }
 0x1a7   : > { %v1214_v31 = vpack.c.bf16 %v973_v30, %v972_v29 }
 0x1a9   : > { %1215 = vst [vmem:[%s1812_s0] sm:$0xff] %v1214_v31  }
 0x1aa PF: > { %990 = sbr.rel (!%p1642_p13) target bundleno = 437 (0x1b5), region = 108  ;;  %s1930_s16 = sld [smem:[#allocation6_spill]] (%p1642_p13) }
 0x1ab   : > { %s1931_s25 = sld [smem:[#allocation11_spill]] (%p1642_p13) }
 0x1b0   : > { %s1204_s18 = sshll.u32 (%p1642_p13), %s1930_s16, 2  ;;  %v1010_v32 = vld [vmem:[%s1812_s0] sm:$0xf] (%p1642_p13)  ;;  %v1012_v33 = vld [vmem:[%s1812_s0 + $0x4] sm:$0xf] (%p1642_p13) }
 0x1b1   : > { %s992_s8 = sadd.s32 %s1487_s19, %s1204_s18 }
 0x1b2   : > { %s1205_s10 = sshll.u32 %s992_s8, 2 }
 0x1b3   : > { %s994_s26 = scalar_lea.vmem %s1931_s25, %s1205_s10 }
 0x1b4   : > { %1011 = vst [vmem:[%s994_s26] sm:$0xf] %v1010_v32  ;;  %1013 = vst [vmem:[%s994_s26 + $0x8] sm:$0xf] %v1012_v33 }
 0x1b5 PF: > { %s13_s24 = sadd.s32 1, %s1507_s24   ;;  %s1933_s0 = sld [smem:[#allocation7_spill]] }
 0x1b6   : > { %p1868_p7 = scmp.ge.s32.totalorder %s13_s24, 18   ;;  %s1934_s29 = sld [smem:[#allocation8_spill]] }
 0x1b7   : > { %s1935_s30 = sld [smem:[#allocation9_spill]]  ;;  %s1937_s12 = smov %s1463_s13 }
 0x1b8   : > { %s1938_s13 = smov %s1640_s7  ;;  %s1939_s14 = smov %s1471_s15 }
 0x1b9   : > { %s1940_s15 = smov %s1627_s9  ;;  %s1941_s16 = smov %s1479_s17 }
 0x1ba   : > { %s1942_s17 = smov %s1637_s3  ;;  %s1943_s18 = smov %s1495_s21 }
 0x1bb   : > { %s1944_s19 = smov %s1499_s22  ;;  %s1945_s20 = smov %s1503_s23 }
 0x1bc   : > { %s1946_s21 = smov %s1933_s0  ;;  %s1947_s22 = smov %s1934_s29 }
 0x1bd   : > { %s1948_s23 = smov %s1935_s30  ;;  %12 = sbr.rel (!%p1868_p7) target bundleno = 10 (0xa), region = 191 }

// kernel: patchgan_forward.8
= control target key start
LH: loop header
LB: loop body
LE: loop exit
PB: predicated region body
PF: predicated region fallthrough
CT: control target
= control target key end

     0   :  { %s1920_s0 = inlined_call_operand.vmem [shape: bf16[2,9,4096], index: 0, kind: input, shape index: {}]   ;;  %s1921_s1 = inlined_call_operand.vmem [shape: bf16[4096,512], index: 1, kind: input, shape index: {}]   ;;  %s1922_s2 = inlined_call_operand.vmem [shape: f32[1,512], index: 2, kind: input, shape index: {}]   ;;  %s1923_s3 = inlined_call_operand.vmem [shape: bf16[2,9,512], index: 3, kind: output, shape index: {}]  }
   0x1   :  { %1927 = sst [smem:[#allocation10_spill]] %s1920_s0 }
   0x2   :  { %1928 = sst [smem:[#allocation11_spill]] %s1923_s3 }
   0x3   :  { %s1533_s12 = smov 0   ;;  %s1535_s13 = smov 0  }
   0x4   :  { %s1537_s14 = smov 0   ;;  %s1539_s15 = smov 0  }
   0x5   :  { %s1541_s16 = smov 0   ;;  %s1543_s17 = smov 0  }
   0x6   :  { %s1545_s18 = smov 0   ;;  %s1547_s19 = smov 0  }
   0x7   :  { %s1549_s20 = smov 0   ;;  %s1551_s21 = smov 0  }
   0x8   :  { %s1553_s22 = smov 0   ;;  %s1555_s23 = smov 0  }
   0x9   :  { %s1557_s24 = smov 0  }
   0xa LB: > { %1929 = sst [smem:[#allocation6_spill]] %s1494_s20  ;;  %s25_s26 = sadd.s32 1, %s1498_s21  ;;  %s1510_s24 = sphi %s1557_s24, %s13_s24   ;;  %s1506_s23 = sphi %s1555_s23, %s1956_s23   ;;  %s1502_s22 = sphi %s1553_s22, %s1955_s22   ;;  %s1498_s21 = sphi %s1551_s21, %s1954_s21   ;;  %s1494_s20 = sphi %s1549_s20, %s1953_s20   ;;  %s1490_s19 = sphi %s1547_s19, %s1952_s19   ;;  %s1486_s18 = sphi %s1545_s18, %s1951_s18   ;;  %s1482_s17 = sphi %s1543_s17, %s1950_s17   ;;  %s1478_s16 = sphi %s1541_s16, %s1949_s16   ;;  %s1474_s15 = sphi %s1539_s15, %s1948_s15   ;;  %s1470_s14 = sphi %s1537_s14, %s1947_s14   ;;  %s1466_s13 = sphi %s1535_s13, %s1946_s13   ;;  %s1462_s12 = sphi %s1533_s12, %s1945_s12  }
   0xb   : > { %p26_p0 = scmp.ge.s32.totalorder %s25_s26, 8  ;;  %s28_s27 = sadd.s32 1, %s1502_s22 }
   0xc   : > { %s32_s28 = sadd.s32 1, %s1506_s23  ;;  %s41_s29 = sadd.s32 1, %s1482_s17 }
   0xd   : > { %s1958_s26 = smov (%p26_p0, %s25_s26), 0  ;;  %s1960_s27 = smov (!%p26_p0, %s28_s27), %s1502_s22 }
   0xe   : > { %1930 = sst [smem:[#allocation7_spill]] %s1958_s26  ;;  %s37_s30 = ssub.s32 %s1498_s21, %s1958_s26 }
   0xf   : > { %p48_p1 = scmp.ne.s32.totalorder %s1482_s17, %s1478_s16  ;;  %p30_p2 = scmp.ge.s32.totalorder %s1960_s27, 4 }
  0x10   : > { %p49_p3 = scmp.eq.s32.totalorder %s1510_s24, 0  ;;  %s69_s4 = sadd.s32 1, %s1474_s15 }
  0x11   : > { %p76_p4 = scmp.ne.s32.totalorder %s1474_s15, %s1470_s14  ;;  %s1962_s27 = smov (%p30_p2, %s1960_s27), 0 }
  0x12   : > { %1931 = sst [smem:[#allocation8_spill]] %s1962_s27  ;;  %s1964_s28 = smov (!%p30_p2, %s32_s28), %s1506_s23 }
  0x13   : > { %p1617_p5 = por %p49_p3, %p48_p1  ;;  %s65_s6 = ssub.s32 %s1502_s22, %s1962_s27 }
  0x14   : > { %p34_p6 = scmp.ge.s32.totalorder %s1964_s28, 2  ;;  %s66_s7 = sor.u32 %s65_s6, %s37_s30 }
  0x15   : > { %p67_p7 = scmp.eq.s32.totalorder %s66_s7, 0  ;;  %p1623_p8 = por %p76_p4, %p49_p3 }
  0x16   : > { %s1966_s28 = smov (%p34_p6, %s1964_s28), 0  ;;  %s123_s11 = sadd.s32 1, %s1466_s13 }
  0x17   : > { %1934 = sst [smem:[#allocation9_spill]] %s1966_s28  ;;  %s36_s10 = ssub.s32 %s1506_s23, %s1966_s28 }
  0x18   : > { %s1630_s9 = scalar_select %p67_p7, %s1474_s15, %s69_s4  }
  0x19   : > { %s38_s25 = sor.u32 %s37_s30, %s36_s10  ;;  %s120_s26 = sor.u32 %s65_s6, %s36_s10 }
  0x1a   : > { %p39_p9 = scmp.eq.s32.totalorder %s38_s25, 0  ;;  %p121_p10 = scmp.eq.s32.totalorder %s120_s26, 0 }
  0x1b   : > { %p133_p11 = scmp.ne.s32.totalorder %s1466_s13, %s1462_s12  ;;  %s1935_s27 = sadd.s32 4294967295, %s1510_s24  }
  0x1c   : > { %p134_p12 = scmp.eq.s32.totalorder %s1935_s27, 63  ;;  %p1157_p0 = scmp.ge.s32.totalorder %s1510_s24, 64 }
  0x1d   : > { %s1640_s3 = scalar_select %p39_p9, %s1482_s17, %s41_s29  }
  0x1e   : > { %s1643_s7 = scalar_select %p121_p10, %s1466_s13, %s123_s11  }
  0x1f   : > { %p1645_p13 = por %p134_p12, %p133_p11  ;;  %156 = sbr.rel (%p1157_p0) target bundleno = 99 (0x63), region = 16 }
  0x26   : > { %159 = sbr.rel (!%p1617_p5) target bundleno = 50 (0x32), region = 20  ;;  %s161_s25 = sand.u32 (%p1617_p5), 1, %s1482_s17  }
  0x27   : > { %s1159_s26 = sshll.u32 (%p1617_p5), %s1498_s21, 2  ;;  %s1158_s27 = sshll.u32 (%p1617_p5), %s161_s25, 5 }
  0x28   : > { %s1160_s29 = sshll.u32 (%p1617_p5), %s1506_s23, 6  ;;  %s1937_s0 = sld [smem:[#allocation10_spill]] (%p1617_p5) }
  0x29   : > { %s166_s30 = sadd.s32 (%p1617_p5), %s1160_s29, %s1159_s26  ;;  %s163_s28 = scalar_lea.vmem (%p1617_p5), [#allocation3], %s1158_s27 }
  0x2a   : > { %s1161_s4 = sshll.u32 (%p1617_p5), %s166_s30, 2 }
  0x2e   : > { %s168_s11 = scalar_lea.vmem %s1937_s0, %s1161_s4 }
  0x2f   : > { %v181_v0 = vld [vmem:[%s168_s11] sm:$0xff]  ;;  %v183_v1 = vld [vmem:[%s168_s11 + $0x8] sm:$0xff] }
  0x30   : > { %v185_v2 = vld [vmem:[%s168_s11 + $0x80] sm:$0xff]  ;;  %182 = vst [vmem:[%s163_s28] sm:$0xff] %v181_v0  ;;  %184 = vst [vmem:[%s163_s28 + $0x8] sm:$0xff] %v183_v1  ;;  %v187_v3 = vld [vmem:[%s168_s11 + $0x88] sm:$0xff] }
  0x31   : > { %186 = vst [vmem:[%s163_s28 + $0x10] sm:$0xff] %v185_v2  ;;  %188 = vst [vmem:[%s163_s28 + $0x18] sm:$0xff] %v187_v3 }
  0x32 PF: > { %194 = sbr.rel (!%p1623_p8) target bundleno = 99 (0x63), region = 43  ;;  %s196_s5 = sand.u32 (%p1623_p8), 1, %s1474_s15  }
  0x33   : > { %s1216_s25 = sshll.u32 (%p1623_p8), %s1498_s21, 8  ;;  %s1162_s26 = sshll.u32 (%p1623_p8), %s196_s5, 8 }
  0x34   : > { %s201_s29 = sadd.s32 (%p1623_p8), %s1502_s22, %s1216_s25  ;;  %s1671_s28 = scalar_lea.vmem (%p1623_p8), [#allocation4], %s1162_s26 }
  0x35   : > { %s1165_s30 = sshll.u32 (%p1623_p8), %s201_s29, 2 }
  0x36   : > { %s1666_s27 = scalar_lea.vmem (%p1623_p8), %s1921_s1, %s1165_s30 }
  0x37   : > { %v219_v4 = vld [vmem:[%s1666_s27] sm:$0xf] (%p1623_p8)  ;;  %v221_v5 = vld [vmem:[%s1666_s27 + $0x10] sm:$0xf] (%p1623_p8) }
  0x38   : > { %v223_v6 = vld [vmem:[%s1666_s27 + $0x20] sm:$0xf] (%p1623_p8)  ;;  %220 = vst [vmem:[%s1671_s28] sm:$0xf] (%p1623_p8), %v219_v4  ;;  %222 = vst [vmem:[%s1671_s28 + $0x4] sm:$0xf] (%p1623_p8), %v221_v5 }
  0x39   : > { %224 = vst [vmem:[%s1671_s28 + $0x8] sm:$0xf] %v223_v6  ;;  %v225_v7 = vld [vmem:[%s1666_s27 + $0x30] sm:$0xf]  ;;  %v227_v8 = vld [vmem:[%s1666_s27 + $0x40] sm:$0xf] }
  0x3a   : > { %v229_v9 = vld [vmem:[%s1666_s27 + $0x50] sm:$0xf]  ;;  %226 = vst [vmem:[%s1671_s28 + $0xc] sm:$0xf] %v225_v7  ;;  %228 = vst [vmem:[%s1671_s28 + $0x10] sm:$0xf] %v227_v8 }
  0x3b   : > { %230 = vst [vmem:[%s1671_s28 + $0x14] sm:$0xf] %v229_v9  ;;  %v231_v10 = vld [vmem:[%s1666_s27 + $0x60] sm:$0xf]  ;;  %v233_v11 = vld [vmem:[%s1666_s27 + $0x70] sm:$0xf] }
  0x3c   : > { %v235_v12 = vld [vmem:[%s1666_s27 + $0x80] sm:$0xf]  ;;  %232 = vst [vmem:[%s1671_s28 + $0x18] sm:$0xf] %v231_v10  ;;  %234 = vst [vmem:[%s1671_s28 + $0x1c] sm:$0xf] %v233_v11 }
  0x3d   : > { %236 = vst [vmem:[%s1671_s28 + $0x20] sm:$0xf] %v235_v12  ;;  %v237_v13 = vld [vmem:[%s1666_s27 + $0x90] sm:$0xf]  ;;  %v239_v14 = vld [vmem:[%s1666_s27 + $0xa0] sm:$0xf] }
  0x3e   : > { %v241_v15 = vld [vmem:[%s1666_s27 + $0xb0] sm:$0xf]  ;;  %238 = vst [vmem:[%s1671_s28 + $0x24] sm:$0xf] %v237_v13  ;;  %240 = vst [vmem:[%s1671_s28 + $0x28] sm:$0xf] %v239_v14 }
  0x3f   : > { %242 = vst [vmem:[%s1671_s28 + $0x2c] sm:$0xf] %v241_v15  ;;  %v243_v16 = vld [vmem:[%s1666_s27 + $0xc0] sm:$0xf]  ;;  %v245_v17 = vld [vmem:[%s1666_s27 + $0xd0] sm:$0xf] }
  0x40   : > { %v247_v18 = vld [vmem:[%s1666_s27 + $0xe0] sm:$0xf]  ;;  %244 = vst [vmem:[%s1671_s28 + $0x30] sm:$0xf] %v243_v16  ;;  %246 = vst [vmem:[%s1671_s28 + $0x34] sm:$0xf] %v245_v17 }
  0x41   : > { %248 = vst [vmem:[%s1671_s28 + $0x38] sm:$0xf] %v247_v18  ;;  %v249_v19 = vld [vmem:[%s1666_s27 + $0xf0] sm:$0xf]  ;;  %v251_v20 = vld [vmem:[%s1666_s27 + $0x100] sm:$0xf] }
  0x42   : > { %v253_v21 = vld [vmem:[%s1666_s27 + $0x110] sm:$0xf]  ;;  %250 = vst [vmem:[%s1671_s28 + $0x3c] sm:$0xf] %v249_v19  ;;  %252 = vst [vmem:[%s1671_s28 + $0x40] sm:$0xf] %v251_v20 }
  0x43   : > { %254 = vst [vmem:[%s1671_s28 + $0x44] sm:$0xf] %v253_v21  ;;  %v255_v22 = vld [vmem:[%s1666_s27 + $0x120] sm:$0xf]  ;;  %v257_v23 = vld [vmem:[%s1666_s27 + $0x130] sm:$0xf] }
  0x44   : > { %v259_v24 = vld [vmem:[%s1666_s27 + $0x140] sm:$0xf]  ;;  %256 = vst [vmem:[%s1671_s28 + $0x48] sm:$0xf] %v255_v22  ;;  %258 = vst [vmem:[%s1671_s28 + $0x4c] sm:$0xf] %v257_v23 }
  0x45   : > { %260 = vst [vmem:[%s1671_s28 + $0x50] sm:$0xf] %v259_v24  ;;  %v261_v25 = vld [vmem:[%s1666_s27 + $0x150] sm:$0xf]  ;;  %v263_v26 = vld [vmem:[%s1666_s27 + $0x160] sm:$0xf] }
  0x46   : > { %v265_v27 = vld [vmem:[%s1666_s27 + $0x170] sm:$0xf]  ;;  %262 = vst [vmem:[%s1671_s28 + $0x54] sm:$0xf] %v261_v25  ;;  %264 = vst [vmem:[%s1671_s28 + $0x58] sm:$0xf] %v263_v26 }
  0x47   : > { %266 = vst [vmem:[%s1671_s28 + $0x5c] sm:$0xf] %v265_v27  ;;  %v267_v28 = vld [vmem:[%s1666_s27 + $0x180] sm:$0xf]  ;;  %v269_v29 = vld [vmem:[%s1666_s27 + $0x190] sm:$0xf] }
  0x48   : > { %v271_v30 = vld [vmem:[%s1666_s27 + $0x1a0] sm:$0xf]  ;;  %268 = vst [vmem:[%s1671_s28 + $0x60] sm:$0xf] %v267_v28  ;;  %270 = vst [vmem:[%s1671_s28 + $0x64] sm:$0xf] %v269_v29 }
  0x49   : > { %272 = vst [vmem:[%s1671_s28 + $0x68] sm:$0xf] %v271_v30  ;;  %v273_v31 = vld [vmem:[%s1666_s27 + $0x1b0] sm:$0xf]  ;;  %v275_v32 = vld [vmem:[%s1666_s27 + $0x1c0] sm:$0xf] }
  0x4a   : > { %v277_v33 = vld [vmem:[%s1666_s27 + $0x1d0] sm:$0xf]  ;;  %274 = vst [vmem:[%s1671_s28 + $0x6c] sm:$0xf] %v273_v31  ;;  %276 = vst [vmem:[%s1671_s28 + $0x70] sm:$0xf] %v275_v32 }
  0x4b   : > { %278 = vst [vmem:[%s1671_s28 + $0x74] sm:$0xf] %v277_v33  ;;  %v279_v34 = vld [vmem:[%s1666_s27 + $0x1e0] sm:$0xf]  ;;  %v281_v35 = vld [vmem:[%s1666_s27 + $0x1f0] sm:$0xf] }
  0x4c   : > { %v283_v36 = vld [vmem:[%s1666_s27 + $0x200] sm:$0xf]  ;;  %280 = vst [vmem:[%s1671_s28 + $0x78] sm:$0xf] %v279_v34  ;;  %282 = vst [vmem:[%s1671_s28 + $0x7c] sm:$0xf] %v281_v35 }
  0x4d   : > { %284 = vst [vmem:[%s1671_s28 + $0x80] sm:$0xf] %v283_v36  ;;  %v285_v37 = vld [vmem:[%s1666_s27 + $0x210] sm:$0xf]  ;;  %v287_v38 = vld [vmem:[%s1666_s27 + $0x220] sm:$0xf] }
  0x4e   : > { %v289_v39 = vld [vmem:[%s1666_s27 + $0x230] sm:$0xf]  ;;  %286 = vst [vmem:[%s1671_s28 + $0x84] sm:$0xf] %v285_v37  ;;  %288 = vst [vmem:[%s1671_s28 + $0x88] sm:$0xf] %v287_v38 }
  0x4f   : > { %290 = vst [vmem:[%s1671_s28 + $0x8c] sm:$0xf] %v289_v39  ;;  %v291_v40 = vld [vmem:[%s1666_s27 + $0x240] sm:$0xf]  ;;  %v293_v41 = vld [vmem:[%s1666_s27 + $0x250] sm:$0xf] }
  0x50   : > { %v295_v42 = vld [vmem:[%s1666_s27 + $0x260] sm:$0xf]  ;;  %292 = vst [vmem:[%s1671_s28 + $0x90] sm:$0xf] %v291_v40  ;;  %294 = vst [vmem:[%s1671_s28 + $0x94] sm:$0xf] %v293_v41 }
  0x51   : > { %296 = vst [vmem:[%s1671_s28 + $0x98] sm:$0xf] %v295_v42  ;;  %v297_v43 = vld [vmem:[%s1666_s27 + $0x270] sm:$0xf]  ;;  %v299_v44 = vld [vmem:[%s1666_s27 + $0x280] sm:$0xf] }
  0x52   : > { %v301_v45 = vld [vmem:[%s1666_s27 + $0x290] sm:$0xf]  ;;  %298 = vst [vmem:[%s1671_s28 + $0x9c] sm:$0xf] %v297_v43  ;;  %300 = vst [vmem:[%s1671_s28 + $0xa0] sm:$0xf] %v299_v44 }
  0x53   : > { %302 = vst [vmem:[%s1671_s28 + $0xa4] sm:$0xf] %v301_v45  ;;  %v303_v46 = vld [vmem:[%s1666_s27 + $0x2a0] sm:$0xf]  ;;  %v305_v47 = vld [vmem:[%s1666_s27 + $0x2b0] sm:$0xf] }
  0x54   : > { %v307_v48 = vld [vmem:[%s1666_s27 + $0x2c0] sm:$0xf]  ;;  %304 = vst [vmem:[%s1671_s28 + $0xa8] sm:$0xf] %v303_v46  ;;  %306 = vst [vmem:[%s1671_s28 + $0xac] sm:$0xf] %v305_v47 }
  0x55   : > { %308 = vst [vmem:[%s1671_s28 + $0xb0] sm:$0xf] %v307_v48  ;;  %v309_v49 = vld [vmem:[%s1666_s27 + $0x2d0] sm:$0xf]  ;;  %v311_v50 = vld [vmem:[%s1666_s27 + $0x2e0] sm:$0xf] }
  0x56   : > { %v313_v51 = vld [vmem:[%s1666_s27 + $0x2f0] sm:$0xf]  ;;  %310 = vst [vmem:[%s1671_s28 + $0xb4] sm:$0xf] %v309_v49  ;;  %312 = vst [vmem:[%s1671_s28 + $0xb8] sm:$0xf] %v311_v50 }
  0x57   : > { %314 = vst [vmem:[%s1671_s28 + $0xbc] sm:$0xf] %v313_v51  ;;  %v315_v52 = vld [vmem:[%s1666_s27 + $0x300] sm:$0xf]  ;;  %v317_v53 = vld [vmem:[%s1666_s27 + $0x310] sm:$0xf] }
  0x58   : > { %v319_v54 = vld [vmem:[%s1666_s27 + $0x320] sm:$0xf]  ;;  %316 = vst [vmem:[%s1671_s28 + $0xc0] sm:$0xf] %v315_v52  ;;  %318 = vst [vmem:[%s1671_s28 + $0xc4] sm:$0xf] %v317_v53 }
  0x59   : > { %320 = vst [vmem:[%s1671_s28 + $0xc8] sm:$0xf] %v319_v54  ;;  %v321_v55 = vld [vmem:[%s1666_s27 + $0x330] sm:$0xf]  ;;  %v323_v56 = vld [vmem:[%s1666_s27 + $0x340] sm:$0xf] }
  0x5a   : > { %v325_v57 = vld [vmem:[%s1666_s27 + $0x350] sm:$0xf]  ;;  %322 = vst [vmem:[%s1671_s28 + $0xcc] sm:$0xf] %v321_v55  ;;  %324 = vst [vmem:[%s1671_s28 + $0xd0] sm:$0xf] %v323_v56 }
  0x5b   : > { %326 = vst [vmem:[%s1671_s28 + $0xd4] sm:$0xf] %v325_v57  ;;  %v327_v58 = vld [vmem:[%s1666_s27 + $0x360] sm:$0xf]  ;;  %v329_v59 = vld [vmem:[%s1666_s27 + $0x370] sm:$0xf] }
  0x5c   : > { %v331_v60 = vld [vmem:[%s1666_s27 + $0x380] sm:$0xf]  ;;  %328 = vst [vmem:[%s1671_s28 + $0xd8] sm:$0xf] %v327_v58  ;;  %330 = vst [vmem:[%s1671_s28 + $0xdc] sm:$0xf] %v329_v59 }
  0x5d   : > { %332 = vst [vmem:[%s1671_s28 + $0xe0] sm:$0xf] %v331_v60  ;;  %v333_v61 = vld [vmem:[%s1666_s27 + $0x390] sm:$0xf]  ;;  %v335_v62 = vld [vmem:[%s1666_s27 + $0x3a0] sm:$0xf] }
  0x5e   : > { %v337_v63 = vld [vmem:[%s1666_s27 + $0x3b0] sm:$0xf]  ;;  %334 = vst [vmem:[%s1671_s28 + $0xe4] sm:$0xf] %v333_v61  ;;  %336 = vst [vmem:[%s1671_s28 + $0xe8] sm:$0xf] %v335_v62 }
  0x5f   : > { %338 = vst [vmem:[%s1671_s28 + $0xec] sm:$0xf] %v337_v63  ;;  %v339_v0 = vld [vmem:[%s1666_s27 + $0x3c0] sm:$0xf]  ;;  %v341_v1 = vld [vmem:[%s1666_s27 + $0x3d0] sm:$0xf] }
  0x60   : > { %v343_v2 = vld [vmem:[%s1666_s27 + $0x3e0] sm:$0xf]  ;;  %340 = vst [vmem:[%s1671_s28 + $0xf0] sm:$0xf] %v339_v0  ;;  %342 = vst [vmem:[%s1671_s28 + $0xf4] sm:$0xf] %v341_v1 }
  0x61   : > { %344 = vst [vmem:[%s1671_s28 + $0xf8] sm:$0xf] %v343_v2  ;;  %v345_v3 = vld [vmem:[%s1666_s27 + $0x3f0] sm:$0xf] }
  0x62   : > { %346 = vst [vmem:[%s1671_s28 + $0xfc] sm:$0xf] %v345_v3 }
  0x63 PF: > { %p1166_p1 = scmp.ge.s32.totalorder %s1510_s24, 1  ;;  %p502_p2 = scmp.lt.s32.totalorder %s1510_s24, 65 }
  0x65   : > { %p503_p3 = pnand %p1166_p1, %p502_p2 }
  0x66   : > { %s509_s8 = sand.u32 (!%p503_p3), 1, %s1478_s16   ;;  %s516_s10 = sand.u32 (!%p503_p3), 1, %s1470_s14  }
  0x67   : > { %506 = sbr.rel (%p503_p3) target bundleno = 440 (0x1b8), region = 88  ;;  %s1167_s11 = sshll.u32 (!%p503_p3), %s509_s8, 5 }
  0x68   : > { %s1168_s5 = sshll.u32 (!%p503_p3), %s516_s10, 8  ;;  %s542_s25 = sand.u32 (!%p503_p3), 1, %s1462_s12  }
  0x69   : > { %p547_p4 = scmp.lt.s32.totalorder (!%p503_p3), %s1490_s19, 3  ;;  %s1169_s26 = sshll.u32 (!%p503_p3), %s542_s25, 3 }
  0x6a   : > { %s1811_s27 = scalar_lea.vmem (!%p503_p3), [#allocation3], %s1167_s11  ;;  %s1813_s28 = scalar_lea.vmem (!%p503_p3), [#allocation4], %s1168_s5 }
  0x6b   : > { %s1815_s0 = scalar_lea.vmem (!%p503_p3), [#allocation5], %s1169_s26  ;;  %p1170_p5 = scmp.ne.s32.totalorder (!%p503_p3), %s1486_s18, 0 }
  0x6e   : > { %s1805_s29 = scalar_select %p547_p4, %s1490_s19, 3 }
  0x6f   : > { %554 = sbr.rel (%p1170_p5) target bundleno = 118 (0x76), region = 100  ;;  %v1512_v4 = vmov (!%p1170_p5), 0.0  }
  0x70   : > { %s549_s6 = scalar_lea.vmem %s1922_s2, %s1805_s29  ;;  %555 = vst [vmem:[#allocation2] sm:$0xff] (!%p1170_p5), %v1512_v4  ;;  %556 = vst [vmem:[#allocation2 + $0x8] sm:$0x1] (!%p1170_p5), %v1512_v4 }
  0x76 PF: > { %v1368_v5 = vld [vmem:[%s1813_s28 + $0x40] sm:$0xff]   ;;  %v1372_v9 = vld [vmem:[%s1813_s28 + $0x48] sm:$0xff]   ;;  %v1376_v13 = vld [vmem:[%s1813_s28 + $0x50] sm:$0xff]   ;;  %p1207_p6 = scmp.ne.s32.totalorder %s1486_s18, 7 }
  0x77   : > { %v1369_v6 = vld [vmem:[%s1813_s28 + $0xc0] sm:$0xff]   ;;  %1219 = vmatprep.subr.bf16.mxu0 %v1368_v5  ;;  %v1373_v10 = vld [vmem:[%s1813_s28 + $0xc8] sm:$0xff]   ;;  %v1377_v14 = vld [vmem:[%s1813_s28 + $0xd0] sm:$0xff]   ;;  %vm940_vm0 = vcmask (!%p1207_p6), 1040384   ;;  %vm987_vm1 = vsmask.f32 (!%p1207_p6), 256 }
  0x78   : > { %v1370_v7 = vld [vmem:[%s1813_s28] sm:$0xff]   ;;  %1241 = vmatprep.subr.bf16.mxu1 %v1369_v6  ;;  %v1374_v11 = vld [vmem:[%s1813_s28 + $0x8] sm:$0xff]   ;;  %v1378_v15 = vld [vmem:[%s1813_s28 + $0x10] sm:$0xff]  }
  0x79   : > { %v1371_v8 = vld [vmem:[%s1813_s28 + $0x80] sm:$0xff]   ;;  %1220 = vmatpush3.bf16.msra.mxu0 %v1370_v7  ;;  %v1375_v12 = vld [vmem:[%s1813_s28 + $0x88] sm:$0xff]   ;;  %v1379_v16 = vld [vmem:[%s1813_s28 + $0x90] sm:$0xff]  }
  0x7a   : > { %1242 = vmatpush3.bf16.msra.mxu1 %v1371_v8  ;;  %1221 = vmatprep.subr.bf16.mxu0 %v1372_v9  ;;  %v1380_v17 = vld [vmem:[%s1813_s28 + $0x58] sm:$0xff]   ;;  %v1384_v21 = vld [vmem:[%s1813_s28 + $0x60] sm:$0xff]   ;;  %v1388_v25 = vld [vmem:[%s1813_s28 + $0x68] sm:$0xff]  }
  0x7b   : > { %1243 = vmatprep.subr.bf16.mxu1 %v1373_v10  ;;  %v1381_v18 = vld [vmem:[%s1813_s28 + $0xd8] sm:$0xff]   ;;  %v1385_v22 = vld [vmem:[%s1813_s28 + $0xe0] sm:$0xff]   ;;  %v1389_v26 = vld [vmem:[%s1813_s28 + $0xe8] sm:$0xff]  }
  0x7c   : > { %v1382_v19 = vld [vmem:[%s1813_s28 + $0x18] sm:$0xff]   ;;  %v1386_v23 = vld [vmem:[%s1813_s28 + $0x20] sm:$0xff]   ;;  %v1390_v27 = vld [vmem:[%s1813_s28 + $0x28] sm:$0xff]  }
  0x7d   : > { %1222 = vmatpush3.bf16.msra.mxu0 %v1374_v11  ;;  %v1383_v20 = vld [vmem:[%s1813_s28 + $0x98] sm:$0xff]   ;;  %v1387_v24 = vld [vmem:[%s1813_s28 + $0xa0] sm:$0xff]   ;;  %v1391_v28 = vld [vmem:[%s1813_s28 + $0xa8] sm:$0xff]  }
  0x7e   : > { %1244 = vmatpush3.bf16.msra.mxu1 %v1375_v12  ;;  %1223 = vmatprep.subr.bf16.mxu0 %v1376_v13  ;;  %v1392_v29 = vld [vmem:[%s1813_s28 + $0x70] sm:$0xff]   ;;  %v1396_v33 = vld [vmem:[%s1813_s28 + $0x78] sm:$0xff]   ;;  %vm988_vm4 = vmand (!%p1207_p6), %vm940_vm0, %vm987_vm1 }
  0x7f   : > { %1245 = vmatprep.subr.bf16.mxu1 %v1377_v14  ;;  %v1393_v30 = vld [vmem:[%s1813_s28 + $0xf0] sm:$0xff]   ;;  %v1397_v34 = vld [vmem:[%s1813_s28 + $0xf8] sm:$0xff]  }
  0x80   : > { %v1394_v31 = vld [vmem:[%s1813_s28 + $0x30] sm:$0xff]   ;;  %v1398_v35 = vld [vmem:[%s1813_s28 + $0x38] sm:$0xff]  }
  0x81   : > { %1224 = vmatpush3.bf16.msra.mxu0 %v1378_v15  ;;  %v1395_v32 = vld [vmem:[%s1813_s28 + $0xb0] sm:$0xff]   ;;  %v1399_v36 = vld [vmem:[%s1813_s28 + $0xb8] sm:$0xff]  }
  0x82   : > { %1246 = vmatpush3.bf16.msra.mxu1 %v1379_v16  ;;  %1225 = vmatprep.subr.bf16.mxu0 %v1380_v17  ;;  %v1400_v37 = vld [vmem:[%s1811_s27] ss:$16 sps:$4 sm:$0x1f]   ;;  %v1402_v38 = vld [vmem:[%s1811_s27 + $0x4] ss:$16 sps:$4 sm:$0x1f]  }
  0x83   : > { %1247 = vmatprep.subr.bf16.mxu1 %v1381_v18  ;;  %v1403_v39 = vld [vmem:[%s1811_s27 + $0x8] ss:$16 sps:$4 sm:$0x1f]   ;;  %v1405_v40 = vld [vmem:[%s1811_s27 + $0xc] ss:$16 sps:$4 sm:$0x1f]   ;;  %871 = vmatprep.mubr.bf16.mxu0 %v1402_v38 }
  0x84   : > { %912 = vmatprep.mubr.bf16.mxu1 %v1405_v40  ;;  %v557_v50 = vld [vmem:[#allocation2] sm:$0xff]  ;;  %v558_v55 = vld [vmem:[#allocation2 + $0x8] sm:$0x1] }
  0x85   : > { %1226 = vmatpush3.bf16.msra.mxu0 %v1382_v19  ;;  %v1208_v61 = vld [vmem:[%s549_s6] ss:$0 sm:$0xff] (!%p1207_p6) }
  0x86   : > { %1248 = vmatpush3.bf16.msra.mxu1 %v1383_v20  ;;  %1227 = vmatprep.subr.bf16.mxu0 %v1384_v21 }
  0x87   : > { %1249 = vmatprep.subr.bf16.mxu1 %v1385_v22 }
  0x89   : > { %1228 = vmatpush3.bf16.msra.mxu0 %v1386_v23 }
  0x8a   : > { %1250 = vmatpush3.bf16.msra.mxu1 %v1387_v24  ;;  %1229 = vmatprep.subr.bf16.mxu0 %v1388_v25 }
  0x8b   : > { %1251 = vmatprep.subr.bf16.mxu1 %v1389_v26 }
  0x8d   : > { %1230 = vmatpush3.bf16.msra.mxu0 %v1390_v27 }
  0x8e   : > { %1252 = vmatpush3.bf16.msra.mxu1 %v1391_v28  ;;  %1231 = vmatprep.subr.bf16.mxu0 %v1392_v29 }
  0x8f   : > { %1253 = vmatprep.subr.bf16.mxu1 %v1393_v30 }
  0x91   : > { %1232 = vmatpush3.bf16.msra.mxu0 %v1394_v31 }
  0x92   : > { %1254 = vmatpush3.bf16.msra.mxu1 %v1395_v32  ;;  %1233 = vmatprep.subr.bf16.mxu0 %v1396_v33  ;;  %v989_v33 = vld [vmem:[%s1815_s0 + $0x4] sm:$0x1] (!%p1207_p6) }
  0x93   : > { %1255 = vmatprep.subr.bf16.mxu1 %v1397_v34 }
  0x95   : > { %1234 = vmatpush3.bf16.msra.mxu0 %v1398_v35 }
  0x96   : > { %1256 = vmatpush3.bf16.msra.mxu1 %v1399_v36 }
  0x98   : > { %872 = vmatmul.mubr.bf16.vlgmr.msra.gmra.mrb[0].mxu0 %v1400_v37 }
  0x99   : > { %913 = vmatmul.mubr.bf16.vlgmr.msra.gmra.mrb[0].mxu1 %v1403_v39 }
 0x16b   : > { %v1235_v41 = vpop.f32.mrb[0].mxu0 }
 0x16c   : > { %v1257_v42 = vpop.f32.mrb[0].mxu1  ;;  %v1236_v43 = vpop.f32.mrb[1].mxu0 }
 0x16d   : > { %v1237_v44 = vadd.f32 %v1236_v43, %v1235_v41  ;;  %v1258_v45 = vpop.f32.mrb[1].mxu1  ;;  %v1238_v46 = vpop.f32.mrb[2].mxu0 }
 0x16e   : > { %v1259_v47 = vadd.f32 %v1258_v45, %v1257_v42  ;;  %v1260_v48 = vpop.f32.mrb[2].mxu1  ;;  %v1239_v49 = vpop.f32.mrb[3].mxu0 }
 0x16f   : > { %v1240_v51 = vadd.f32 %v1239_v49, %v1238_v46  ;;  %v1261_v52 = vpop.f32.mrb[3].mxu1 }
 0x170   : > { %v915_v53 = vadd.f32 %v1259_v47, %v1237_v44  ;;  %v1262_v54 = vadd.f32 %v1261_v52, %v1260_v48  ;;  %928 = sbr.rel (%p1207_p6) target bundleno = 429 (0x1ad), region = 104 }
 0x172   : > { %v921_v56 = vadd.f32 %v915_v53, %v557_v50  ;;  %v918_v57 = vadd.f32 %v1262_v54, %v1240_v51 }
 0x174   : > { %923 = vst [vmem:[#allocation2] sm:$0xff] %v921_v56  ;;  %v922_v58 = vadd.f32 %v918_v57, %v558_v55 }
 0x176   : > { %924 = vst [vmem:[#allocation2 + $0x8] sm:$0x1] %v922_v58 }
 0x17b   : > { %v929_v59 = vld [vmem:[#allocation2] sm:$0xff] }
 0x17c   : > { %v938_v62 = vadd.f32 %v1208_v61, %v929_v59 }
 0x17d   : > { %v930_v60 = vld [vmem:[#allocation2 + $0x8] sm:$0x1] }
 0x17e   : > { %v939_v63 = vadd.f32 %v1208_v61, %v930_v60  ;;  %v951_v1 = vmul.f32 %v938_v62, %v938_v62 }
 0x180   : > { %v941_v0 = vsel %vm940_vm0, %v939_v63, 0.0  ;;  %v952_v2 = vmul.f32 %v939_v63, %v939_v63 }
 0x181   : > { %v942_v3 = vadd.f32 %v941_v0, %v938_v62 }
 0x182   : > { %v953_v4 = vsel %vm940_vm0, %v952_v2, 0.0 }
 0x183   : > { %v943_v5 = vrot.slane %v942_v3, 4  ;;  %v954_v6 = vadd.f32 %v953_v4, %v951_v1 }
 0x185   : > { %v944_v7 = vadd.f32 %v943_v5, %v942_v3  ;;  %v955_v8 = vrot.slane %v954_v6, 4 }
 0x187   : > { %v945_v9 = vrot.slane %v944_v7, 2  ;;  %v956_v10 = vadd.f32 %v955_v8, %v954_v6 }
 0x189   : > { %v946_v11 = vadd.f32 %v945_v9, %v944_v7  ;;  %v957_v12 = vrot.slane %v956_v10, 2 }
 0x18b   : > { %v947_v13 = vrot.slane %v946_v11, 1  ;;  %v958_v14 = vadd.f32 %v957_v12, %v956_v10 }
 0x18d   : > { %v948_v15 = vadd.f32 %v947_v13, %v946_v11  ;;  %v959_v16 = vrot.slane %v958_v14, 1 }
 0x18f   : > { %v950_v17 = vmul.f32 0.11111111, %v948_v15  ;;  %v960_v18 = vadd.f32 %v959_v16, %v958_v14 }
 0x191   : > { %v961_v19 = vmul.f32 0.11111111, %v960_v18  ;;  %v962_v20 = vmul.f32 %v950_v17, %v950_v17  ;;  %v965_v24 = vsub.f32 %v938_v62, %v950_v17  ;;  %v966_v25 = vsub.f32 %v939_v63, %v950_v17 }
 0x193   : > { %v963_v21 = vsub.f32 %v961_v19, %v962_v20 }
 0x195   : > { %v964_v22 = vmax.f32 %v963_v21, 0.0 }
 0x197   : > { %v967_v23 = vadd.f32 1e-05, %v964_v22 }
 0x199   : > { %1406 = vrsqrt.f32 %v967_v23 }
 0x1a3   : > { %v1407_v26 = vpop.eup %1406 }
 0x1a4   : > { %v969_v27 = vmul.f32 %v1407_v26, %v965_v24  ;;  %v970_v28 = vmul.f32 %v1407_v26, %v966_v25 }
 0x1a6   : > { %vm971_vm2 = vcmp.gt.f32.partialorder %v969_v27, 0.0  ;;  %v973_v29 = vmul.f32 0.2, %v969_v27  ;;  %vm972_vm3 = vcmp.gt.f32.partialorder %v970_v28, 0.0  ;;  %v974_v30 = vmul.f32 0.2, %v970_v28 }
 0x1a8   : > { %v975_v31 = vsel %vm971_vm2, %v969_v27, %v973_v29  ;;  %v976_v32 = vsel %vm972_vm3, %v970_v28, %v974_v30 }
 0x1a9   : > { %v1217_v34 = vpack.c.bf16 %v975_v31, %v975_v31  ;;  %v1218_v35 = vpack.c.bf16 %v976_v32, %v976_v32 }
 0x1ab   : > { %985 = vst [vmem:[%s1815_s0] sm:$0xf] %v1217_v34  ;;  %v990_v36 = vsel %vm988_vm4, %v1218_v35, %v989_v33 }
 0x1ac   : > { %991 = vst [vmem:[%s1815_s0 + $0x4] sm:$0x1] %v990_v36 }
 0x1ad PF: > { %998 = sbr.rel (!%p1645_p13) target bundleno = 440 (0x1b8), region = 108  ;;  %s1938_s16 = sld [smem:[#allocation6_spill]] (%p1645_p13) }
 0x1ae   : > { %s1939_s25 = sld [smem:[#allocation11_spill]] (%p1645_p13) }
 0x1b2   : > { %v1018_v37 = vld [vmem:[%s1815_s0] sm:$0xf] (%p1645_p13) }
 0x1b3   : > { %s1212_s18 = sshll.u32 (%p1645_p13), %s1938_s16, 3  ;;  %v1020_v38 = vld [vmem:[%s1815_s0 + $0x4] sm:$0xf] (%p1645_p13) }
 0x1b4   : > { %s1000_s8 = sadd.s32 %s1490_s19, %s1212_s18 }
 0x1b5   : > { %s1213_s10 = sshll.u32 %s1000_s8, 2 }
 0x1b6   : > { %s1002_s26 = scalar_lea.vmem %s1939_s25, %s1213_s10 }
 0x1b7   : > { %1019 = vst [vmem:[%s1002_s26] sm:$0xf] %v1018_v37  ;;  %1021 = vst [vmem:[%s1002_s26 + $0x10] sm:$0xf] %v1020_v38 }
 0x1b8 PF: > { %s13_s24 = sadd.s32 1, %s1510_s24   ;;  %s1941_s0 = sld [smem:[#allocation7_spill]] }
 0x1b9   : > { %p1876_p7 = scmp.ge.s32.totalorder %s13_s24, 66   ;;  %s1942_s29 = sld [smem:[#allocation8_spill]] }
 0x1ba   : > { %s1943_s30 = sld [smem:[#allocation9_spill]]  ;;  %s1945_s12 = smov %s1466_s13 }
 0x1bb   : > { %s1946_s13 = smov %s1643_s7  ;;  %s1947_s14 = smov %s1474_s15 }
 0x1bc   : > { %s1948_s15 = smov %s1630_s9  ;;  %s1949_s16 = smov %s1482_s17 }
 0x1bd   : > { %s1950_s17 = smov %s1640_s3  ;;  %s1951_s18 = smov %s1498_s21 }
 0x1be   : > { %s1952_s19 = smov %s1502_s22  ;;  %s1953_s20 = smov %s1506_s23 }
 0x1bf   : > { %s1954_s21 = smov %s1941_s0  ;;  %s1955_s22 = smov %s1942_s29 }
 0x1c0   : > { %s1956_s23 = smov %s1943_s30  ;;  %12 = sbr.rel (!%p1876_p7) target bundleno = 10 (0xa), region = 191 }

// kernel: patchgan_forward.9
= control target key start
LH: loop header
LB: loop body
LE: loop exit
PB: predicated region body
PF: predicated region fallthrough
CT: control target
= control target key end

     0   :  { %s982_s12 = smov 0   ;;  %s984_s13 = smov 0   ;;  %s1085_s0 = inlined_call_operand.vmem [shape: bf16[2,4,8192], index: 0, kind: input, shape index: {}]   ;;  %s1086_s1 = inlined_call_operand.vmem [shape: bf16[8192,128], index: 1, kind: input, shape index: {}]   ;;  %s1087_s2 = inlined_call_operand.vmem [shape: f32[1,128], index: 2, kind: input, shape index: {}]   ;;  %s1088_s3 = inlined_call_operand.vmem [shape: f32[2,4,128], index: 3, kind: output, shape index: {}]  }
   0x1   :  { %s986_s14 = smov 0   ;;  %s988_s15 = smov 0  }
   0x2   :  { %s990_s16 = smov 0  }
   0x3 LB: > { %s25_s17 = sadd.s32 1, %s950_s14  ;;  %s32_s18 = sadd.s32 1, %s954_s15  ;;  %s958_s16 = sphi %s990_s16, %s13_s16   ;;  %s954_s15 = sphi %s988_s15, %s1092_s15   ;;  %s950_s14 = sphi %s986_s14, %s1091_s14   ;;  %s946_s13 = sphi %s984_s13, %s1090_s13   ;;  %s942_s12 = sphi %s982_s12, %s1089_s12  }
   0x4   : > { %p26_p0 = scmp.ge.s32.totalorder %s25_s17, 16  ;;  %p757_p1 = scmp.ge.s32.totalorder %s958_s16, 1 }
   0x5   : > { %p189_p2 = scmp.lt.s32.totalorder %s958_s16, 33 }
   0x6   : > { %s1094_s17 = smov (%p26_p0, %s25_s17), 0  ;;  %s1096_s18 = smov (!%p26_p0, %s32_s18), %s954_s15 }
   0x7   : > { %p190_p3 = pnand %p757_p1, %p189_p2  ;;  %p34_p4 = scmp.ge.s32.totalorder %s1096_s18, 2 }
   0x8   : > { %s758_s19 = sshll.u32 (!%p190_p3), %s942_s12, 2  ;;  %p231_p5 = scmp.lt.s32.totalorder (!%p190_p3), %s946_s13, 1 }
   0x9   : > { %s1098_s18 = smov (%p34_p4, %s1096_s18), 0  ;;  %193 = sbr.rel (%p190_p3) target bundleno = 293 (0x125), region = 32 }
   0xa   : > { %p233_p6 = scmp.lt.s32.totalorder (!%p190_p3), %s758_s19, 63  ;;  %s761_s20 = sshll.u32 (!%p190_p3), %s942_s12, 6 }
   0xb   : > { %p241_p7 = scmp.lt.s32.totalorder (!%p190_p3), %s761_s20, 1023  ;;  %p764_p8 = scmp.ne.s32.totalorder (!%p190_p3), %s942_s12, 0 }
  0x10   : > { %s1100_s13 = smov (!%p231_p5, %s946_s13), 1  ;;  %s1102_s19 = smov (!%p233_p6, %s758_s19), 63 }
  0x11   : > { %s759_s21 = sshll.u32 %s1100_s13, 6  ;;  %s763_s23 = sshll.u32 %s1100_s13, 2  ;;  %v960_v0 = vmov (!%p764_p8), 0.0  }
  0x12   : > { %s236_s22 = sadd.s32 %s759_s21, %s1102_s19  ;;  %s1019_s27 = scalar_lea.vmem %s1088_s3, %s763_s23  ;;  %264 = vst [vmem:[#allocation2] sm:$0xf] (!%p764_p8), %v960_v0 }
  0x13   : > { %s760_s24 = sshll.u32 %s236_s22, 1  ;;  %s1104_s20 = smov (!%p241_p7, %s761_s20), 1023 }
  0x14   : > { %s1024_s30 = scalar_lea.vmem %s1085_s0, %s760_s24  ;;  %s762_s4 = sshll.u32 %s1104_s20, 2 }
  0x15   : > { %s1029_s7 = scalar_lea.vmem %s1086_s1, %s762_s4  ;;  %263 = sbr.rel (%p764_p8) target bundleno = 28 (0x1c), region = 36 }
  0x1c PF: > { %v887_v1 = vld [vmem:[%s1029_s7 + $0x40] sm:$0xff]   ;;  %v891_v5 = vld [vmem:[%s1029_s7 + $0x48] sm:$0xff]   ;;  %v895_v9 = vld [vmem:[%s1029_s7 + $0x50] sm:$0xff]   ;;  %v336_v31 = vlaneseq  ;;  %v961_v35 = vmov 1983009808   ;;  %p797_p9 = scmp.ne.s32.totalorder %s942_s12, 15 }
  0x1d   : > { %v888_v2 = vld [vmem:[%s1029_s7 + $0xc0] sm:$0xff]   ;;  %801 = vmatprep.subr.bf16.mxu0 %v887_v1  ;;  %v892_v6 = vld [vmem:[%s1029_s7 + $0xc8] sm:$0xff]   ;;  %v896_v10 = vld [vmem:[%s1029_s7 + $0xd0] sm:$0xff]   ;;  %v334_v36 = vunpack.c.l.s4 %v961_v35 }
  0x1e   : > { %v889_v3 = vld [vmem:[%s1029_s7] sm:$0xff]   ;;  %823 = vmatprep.subr.bf16.mxu1 %v888_v2  ;;  %v893_v7 = vld [vmem:[%s1029_s7 + $0x8] sm:$0xff]   ;;  %v897_v11 = vld [vmem:[%s1029_s7 + $0x10] sm:$0xff]   ;;  %v337_v37 = vshrl.u32 %v336_v31, 7 }
  0x1f   : > { %v890_v4 = vld [vmem:[%s1029_s7 + $0x80] sm:$0xff]   ;;  %802 = vmatpush3.bf16.msra.mxu0 %v889_v3  ;;  %v894_v8 = vld [vmem:[%s1029_s7 + $0x88] sm:$0xff]   ;;  %v898_v12 = vld [vmem:[%s1029_s7 + $0x90] sm:$0xff]   ;;  %v335_v38 = vunpack.c.0.s8 %v334_v36 }
  0x20   : > { %824 = vmatpush3.bf16.msra.mxu1 %v890_v4  ;;  %803 = vmatprep.subr.bf16.mxu0 %v891_v5  ;;  %v899_v13 = vld [vmem:[%s1029_s7 + $0x58] sm:$0xff]   ;;  %v903_v17 = vld [vmem:[%s1029_s7 + $0x60] sm:$0xff]   ;;  %v907_v21 = vld [vmem:[%s1029_s7 + $0x68] sm:$0xff]  }
  0x21   : > { %825 = vmatprep.subr.bf16.mxu1 %v892_v6  ;;  %v900_v14 = vld [vmem:[%s1029_s7 + $0xd8] sm:$0xff]   ;;  %v904_v18 = vld [vmem:[%s1029_s7 + $0xe0] sm:$0xff]   ;;  %v908_v22 = vld [vmem:[%s1029_s7 + $0xe8] sm:$0xff]   ;;  %v338_v40 = vsub.s32 %v335_v38, %v337_v37 }
  0x22   : > { %v901_v15 = vld [vmem:[%s1029_s7 + $0x18] sm:$0xff]   ;;  %v905_v19 = vld [vmem:[%s1029_s7 + $0x20] sm:$0xff]   ;;  %v909_v23 = vld [vmem:[%s1029_s7 + $0x28] sm:$0xff]  }
  0x23   : > { %804 = vmatpush3.bf16.msra.mxu0 %v893_v7  ;;  %v902_v16 = vld [vmem:[%s1029_s7 + $0x98] sm:$0xff]   ;;  %v906_v20 = vld [vmem:[%s1029_s7 + $0xa0] sm:$0xff]   ;;  %v910_v24 = vld [vmem:[%s1029_s7 + $0xa8] sm:$0xff]  }
  0x24   : > { %826 = vmatpush3.bf16.msra.mxu1 %v894_v8  ;;  %805 = vmatprep.subr.bf16.mxu0 %v895_v9  ;;  %v911_v25 = vld [vmem:[%s1029_s7 + $0x70] sm:$0xff]   ;;  %v915_v29 = vld [vmem:[%s1029_s7 + $0x78] sm:$0xff]   ;;  %v266_v34 = vld [vmem:[%s1024_s30] sm:$0xff] }
  0x25   : > { %827 = vmatprep.subr.bf16.mxu1 %v896_v10  ;;  %v912_v26 = vld [vmem:[%s1029_s7 + $0xf0] sm:$0xff]   ;;  %v916_v30 = vld [vmem:[%s1029_s7 + $0xf8] sm:$0xff]   ;;  %v332_v39 = vcombine.high %v266_v34, %v266_v34  ;;  %v339_v41 = vrot.slane %v266_v34, %v338_v40  ;;  %v265_v53 = vld [vmem:[#allocation2] sm:$0xf] }
  0x26   : > { %v913_v27 = vld [vmem:[%s1029_s7 + $0x30] sm:$0xff]   ;;  %v917_v32 = vld [vmem:[%s1029_s7 + $0x38] sm:$0xff]   ;;  %v798_v59 = vld [vmem:[%s1087_s2] ss:$0 sm:$0xff] (!%p797_p9) }
  0x27   : > { %806 = vmatpush3.bf16.msra.mxu0 %v897_v11  ;;  %v914_v28 = vld [vmem:[%s1029_s7 + $0xb0] sm:$0xff]   ;;  %v918_v33 = vld [vmem:[%s1029_s7 + $0xb8] sm:$0xff]   ;;  %v346_v42 = vrot.slane %v332_v39, %v338_v40  ;;  %v347_v43 = vcombine.high %v339_v41, %v339_v41 }
  0x28   : > { %828 = vmatpush3.bf16.msra.mxu1 %v898_v12  ;;  %807 = vmatprep.subr.bf16.mxu0 %v899_v13 }
  0x29   : > { %829 = vmatprep.subr.bf16.mxu1 %v900_v14  ;;  %v348_v44 = vcombine.high %v346_v42, %v346_v42  ;;  %577 = vmatprep.mubr.bf16.mxu0 %v347_v43 }
  0x2b   : > { %808 = vmatpush3.bf16.msra.mxu0 %v901_v15  ;;  %617 = vmatprep.mubr.bf16.mxu1 %v348_v44 }
  0x2c   : > { %830 = vmatpush3.bf16.msra.mxu1 %v902_v16  ;;  %809 = vmatprep.subr.bf16.mxu0 %v903_v17 }
  0x2d   : > { %831 = vmatprep.subr.bf16.mxu1 %v904_v18 }
  0x2f   : > { %810 = vmatpush3.bf16.msra.mxu0 %v905_v19 }
  0x30   : > { %832 = vmatpush3.bf16.msra.mxu1 %v906_v20  ;;  %811 = vmatprep.subr.bf16.mxu0 %v907_v21 }
  0x31   : > { %833 = vmatprep.subr.bf16.mxu1 %v908_v22 }
  0x33   : > { %812 = vmatpush3.bf16.msra.mxu0 %v909_v23 }
  0x34   : > { %834 = vmatpush3.bf16.msra.mxu1 %v910_v24  ;;  %813 = vmatprep.subr.bf16.mxu0 %v911_v25 }
  0x35   : > { %835 = vmatprep.subr.bf16.mxu1 %v912_v26 }
  0x37   : > { %814 = vmatpush3.bf16.msra.mxu0 %v913_v27 }
  0x38   : > { %836 = vmatpush3.bf16.msra.mxu1 %v914_v28  ;;  %815 = vmatprep.subr.bf16.mxu0 %v915_v29 }
  0x39   : > { %837 = vmatprep.subr.bf16.mxu1 %v916_v30 }
  0x3b   : > { %816 = vmatpush3.bf16.msra.mxu0 %v917_v32 }
  0x3c   : > { %838 = vmatpush3.bf16.msra.mxu1 %v918_v33 }
  0x3e   : > { %578 = vmatmul.mubr.bf16.vlgmr.msra.gmra.mrb[0].mxu0 %v339_v41 }
  0x3f   : > { %618 = vmatmul.mubr.bf16.vlgmr.msra.gmra.mrb[0].mxu1 %v346_v42 }
 0x111   : > { %v817_v45 = vpop.f32.mrb[0].mxu0 }
 0x112   : > { %v839_v46 = vpop.f32.mrb[0].mxu1  ;;  %v818_v47 = vpop.f32.mrb[1].mxu0 }
 0x113   : > { %v840_v48 = vpop.f32.mrb[1].mxu1  ;;  %v819_v49 = vadd.f32 %v818_v47, %v817_v45  ;;  %v820_v51 = vpop.f32.mrb[2].mxu0 }
 0x114   : > { %v841_v50 = vadd.f32 %v840_v48, %v839_v46  ;;  %v842_v52 = vpop.f32.mrb[2].mxu1  ;;  %v821_v54 = vpop.f32.mrb[3].mxu0  ;;  %630 = sbr.rel (%p797_p9) target bundleno = 293 (0x125), region = 40 }
 0x115   : > { %v843_v55 = vpop.f32.mrb[3].mxu1 }
 0x116   : > { %v620_v56 = vadd.f32 %v841_v50, %v819_v49 }
 0x118   : > { %v625_v57 = vadd.f32 %v620_v56, %v265_v53 }
 0x11a   : > { %626 = vst [vmem:[#allocation2] sm:$0xf] %v625_v57 }
 0x121   : > { %v631_v58 = vld [vmem:[#allocation2] sm:$0xf] }
 0x122   : > { %v639_v60 = vadd.f32 %v798_v59, %v631_v58 }
 0x124   : > { %640 = vst [vmem:[%s1019_s27] sm:$0xf] %v639_v60 }
 0x125 PF: > { %s13_s16 = sadd.s32 1, %s958_s16   ;;  %s1089_s12 = smov %s950_s14 }
 0x126   : > { %p10_p10 = scmp.ge.s32.totalorder %s13_s16, 34   ;;  %s1090_s13 = smov %s954_s15 }
 0x127   : > { %s1091_s14 = smov %s1094_s17  ;;  %s1092_s15 = smov %s1098_s18 }
 0x128   :  { %12 = sbr.rel (!%p10_p10) target bundleno = 3 (0x3), region = 76 }

</bundles_post_ra>
